<compile_context>
chip_gen: v7x
topology: tpu7x:2x2x1
jax: 0.10.0
libtpu: 0.0.40
codegen_flags: <defaults>
</compile_context>

<pallas_src>
import functools

import jax
import jax.numpy as jnp
from jax.experimental import pallas as pl
from jax.experimental.pallas import tpu as pltpu


# ----------------------------------------------------------------------------
# helpers
# ----------------------------------------------------------------------------
def _round_up(x, m):
    return ((x + m - 1) // m) * m


def _pick_tiling(n):
    """Node-axis padding + (row tile tm, reduction tile tk)."""
    n_pad = _round_up(max(n, 512), 512)      # multiple of 512 -> nb_rows even
    tm = 256                                 # row tile ("parallel" axis)
    tk = 512                                 # reduction tile ("arbitrary", last)
    for t in (2048, 1024, 512):
        if n_pad % t == 0:
            tk = t
            break
    return n_pad, tm, tk


# ----------------------------------------------------------------------------
# Kernel 1: one GCNConv layer
#   acc   = (A + I) @ Y                      (int8->bf16 MXU, f32 acc)
#   h     = (dinv * acc) @ W + b             (finalize, per row tile)
#   out   = relu(h)           (layers 1..L-1)
#   out   = dinv * relu(h)    (pre-scaled input for the next layer)
#   grid  = (row tiles [parallel], reduction tiles [arbitrary, last])
# ----------------------------------------------------------------------------
def _gcn_layer_kernel(a_ref, y_ref, dinv_ref, w_ref, b_ref, o_ref, acc_ref, *,
                      tk, apply_relu, scale_output, x_resident):
    k = pl.program_id(1)

    @pl.when(k == 0)
    def _init():
        acc_ref[...] = jnp.zeros_like(acc_ref)

    if x_resident:
        # Y is fully VMEM-resident for the whole layer; slice the k-tile.
        koff = pl.multiple_of(k * tk, tk)
        y_blk = y_ref[pl.ds(koff, tk), :]
    else:
        y_blk = y_ref[...]

    # int8 -> bf16 upcast rides the idle VPU slots; MXU accumulates in f32.
    acc_ref[...] += jnp.dot(a_ref[...].astype(jnp.bfloat16), y_blk,
                            preferred_element_type=jnp.float32)

    @pl.when(k == pl.num_programs(1) - 1)
    def _finalize():
        di = dinv_ref[...]                                      # (tm, 1) f32
        # (A @ Y) @ W == A @ (Y @ W): feature transform once per row tile.
        h = jnp.dot((acc_ref[...] * di).astype(jnp.bfloat16), w_ref[...],
                    preferred_element_type=jnp.float32) + b_ref[...]
        if apply_relu:
            h = jnp.maximum(h, 0.0)
        if scale_output:
            h = h * di                                          # pre-scale for next layer
        o_ref[...] = h.astype(o_ref.dtype)


def _gcn_layer(a01, y, dinv, w, b, *, tm, tk, apply_relu, scale_output):
    n_pad = a01.shape[0]
    c_in = y.shape[1]
    c_out = w.shape[1]
    nb_i = n_pad // tm
    nb_k = n_pad // tk

    # Keep Y (bf16, n_pad x c_in) fully resident in VMEM when it is small;
    # otherwise fall back to streaming (tk, c_in) reduction tiles.
    x_resident = (n_pad * c_in * 2) <= (6 << 20)
    if x_resident:
        y_spec = pl.BlockSpec((n_pad, c_in), lambda i, k: (0, 0))
    else:
        y_spec = pl.BlockSpec((tk, c_in), lambda i, k: (k, 0))

    kernel = functools.partial(_gcn_layer_kernel, tk=tk, apply_relu=apply_relu,
                               scale_output=scale_output, x_resident=x_resident)

    cost = pl.CostEstimate(
        flops=2 * n_pad * n_pad * c_in + 2 * n_pad * c_in * c_out,
        transcendentals=0,
        bytes_accessed=(n_pad * n_pad * 1                        # int8 A
                        + n_pad * c_in * 2 * (1 if x_resident else nb_i)
                        + c_in * c_out * 2
                        + n_pad * c_out * 2),
    )

    return pl.pallas_call(
        kernel,
        out_shape=jax.ShapeDtypeStruct((n_pad, c_out), jnp.bfloat16),
        grid_spec=pltpu.PrefetchScalarGridSpec(
            num_scalar_prefetch=0,
            grid=(nb_i, nb_k),
            in_specs=[
                pl.BlockSpec((tm, tk), lambda i, k: (i, k)),     # (A+I) int8 tile
                y_spec,                                          # node features
                pl.BlockSpec((tm, 1), lambda i, k: (i, 0)),      # dinv row block
                pl.BlockSpec((c_in, c_out), lambda i, k: (0, 0)),  # W (resident)
                pl.BlockSpec((1, c_out), lambda i, k: (0, 0)),     # bias (resident)
            ],
            out_specs=pl.BlockSpec((tm, c_out), lambda i, k: (i, 0)),
            scratch_shapes=[pltpu.VMEM((tm, c_in), jnp.float32)],
        ),
        compiler_params=pltpu.CompilerParams(
            dimension_semantics=("parallel", "arbitrary"),
            vmem_limit_bytes=48 * 1024 * 1024,   # safe on v5e/v6e/v7x
        ),
        cost_estimate=cost,
    )(a01, y, dinv, w, b)


# ----------------------------------------------------------------------------
# Kernel 2: fused global_mean_pool + Linear head
#   grid = (node reduction tiles [arbitrary])
# ----------------------------------------------------------------------------
def _pool_head_kernel(p_ref, h_ref, wl_ref, bl_ref, o_ref, emb_ref):
    k = pl.program_id(0)

    @pl.when(k == 0)
    def _init():
        emb_ref[...] = jnp.zeros_like(emb_ref)

    # emb += P[:, k-tile] @ H[k-tile, :]   (bf16 MXU, f32 acc)
    emb_ref[...] += jnp.dot(p_ref[...], h_ref[...],
                            preferred_element_type=jnp.float32)

    @pl.when(k == pl.num_programs(0) - 1)
    def _finalize():
        # TODO(synk): F.dropout(p=0.5) is identity here (inference mode).
        o_ref[...] = jnp.dot(emb_ref[...].astype(jnp.bfloat16), wl_ref[...],
                             preferred_element_type=jnp.float32) + bl_ref[...]


def _pool_head(pool, h, wl, bl, *, tk):
    g_pad, n_pad = pool.shape
    hid = h.shape[1]
    c_out = wl.shape[1]
    nb_k = n_pad // tk

    return pl.pallas_call(
        _pool_head_kernel,
        out_shape=jax.ShapeDtypeStruct((g_pad, c_out), jnp.float32),
        grid_spec=pltpu.PrefetchScalarGridSpec(
            num_scalar_prefetch=0,
            grid=(nb_k,),
            in_specs=[
                pl.BlockSpec((g_pad, tk), lambda k: (0, k)),     # pool tile (bf16)
                pl.BlockSpec((tk, hid), lambda k: (k, 0)),       # H tile (bf16)
                pl.BlockSpec((hid, c_out), lambda k: (0, 0)),    # head weight (bf16)
                pl.BlockSpec((1, c_out), lambda k: (0, 0)),      # head bias (f32)
            ],
            out_specs=pl.BlockSpec((g_pad, c_out), lambda k: (0, 0)),
            scratch_shapes=[pltpu.VMEM((g_pad, hid), jnp.float32)],
        ),
        compiler_params=pltpu.CompilerParams(
            dimension_semantics=("arbitrary",),
            vmem_limit_bytes=48 * 1024 * 1024,
        ),
    )(pool, h, wl, bl)


# ----------------------------------------------------------------------------
# Graph-structure operators (depend only on edge_index / batch; can be built
# once per graph batch and reused across forward passes).
# ----------------------------------------------------------------------------
def _build_graph_operators(edge_index, batch, n, n_pad, num_graphs, g_pad):
    src, dst = edge_index[0], edge_index[1]

    # (A + I) as int8 0/1, built directly into the padded buffer.  A[dst, src]
    # so row i aggregates messages arriving at node i (PyG GCNConv; duplicate
    # edges counted with multiplicity).  D^{-1/2} is factored OUT of this
    # matrix and applied in the layer kernels.
    adj = jnp.zeros((n_pad, n_pad), jnp.float32)
    adj = adj.at[dst, src].add(jnp.ones(src.shape, jnp.float32))
    idx = jnp.arange(n)
    adj = adj.at[idx, idx].add(1.0)
    adj01 = adj.astype(jnp.int8)

    # Degrees straight from the edge list (no dense row-sum pass).
    deg = jnp.ones((n,), jnp.float32).at[dst].add(1.0)     # in-degree + self loop
    dinv = jax.lax.rsqrt(deg)
    dinv_pad = jnp.zeros((n_pad, 1), jnp.float32).at[:n, 0].set(dinv)

    # Mean-pool matrix P [G_pad, N_pad] in bf16: P[g, i] = 1/|graph g|.
    onehot = (batch[None, :] == jnp.arange(num_graphs)[:, None]).astype(jnp.float32)
    counts = jnp.maximum(jnp.sum(onehot, axis=1, keepdims=True), 1.0)
    pool = jnp.zeros((g_pad, n_pad), jnp.bfloat16).at[:num_graphs, :n].set(
        (onehot / counts).astype(jnp.bfloat16))

    return adj01, dinv_pad, dinv, pool


# ----------------------------------------------------------------------------
# Forward pass
# ----------------------------------------------------------------------------
def gcn_forward(x, edge_index, batch, params, num_graphs):
    x = x.astype(jnp.float32)
    n, c_in = x.shape
    (w0, b0, w1, b1, w2, b2, wl, bl) = params
    hidden = w0.shape[1]
    out_channels = wl.shape[1]

    n_pad, tm, tk = _pick_tiling(n)
    c_in_pad = _round_up(c_in, 128)      # bandwidth-bound: 128 only, never wider
    hid_pad = _round_up(hidden, 128)
    out_pad = _round_up(out_channels, 128)
    g_pad = _round_up(max(num_graphs, 16), 16)

    adj01, dinv_pad, dinv, pool = _build_graph_operators(
        edge_index, batch, n, n_pad, num_graphs, g_pad)

    def pad2(a, r, c, dtype):
        return jnp.zeros((r, c), dtype).at[:a.shape[0], :a.shape[1]].set(
            a.astype(dtype))

    # Layer-1 input: Y0 = D^{-1/2} X (folded into the padding pass), bf16.
    y0 = pad2(x * dinv[:, None], n_pad, c_in_pad, jnp.bfloat16)

    w0p = pad2(w0, c_in_pad, hid_pad, jnp.bfloat16)
    w1p = pad2(w1, hid_pad, hid_pad, jnp.bfloat16)
    w2p = pad2(w2, hid_pad, hid_pad, jnp.bfloat16)
    b0p = pad2(b0, 1, hid_pad, jnp.float32)
    b1p = pad2(b1, 1, hid_pad, jnp.float32)
    b2p = pad2(b2, 1, hid_pad, jnp.float32)
    wlp = pad2(wl, hid_pad, out_pad, jnp.bfloat16)
    blp = pad2(bl, 1, out_pad, jnp.float32)

    # Layers 1/2 emit Y_L = D^{-1/2} relu(z_L) (pre-scaled for the next layer);
    # layer 3 emits H_3 = z_3 (no relu, unscaled) for the pooling head.
    y1 = _gcn_layer(adj01, y0, dinv_pad, w0p, b0p, tm=tm, tk=tk,
                    apply_relu=True, scale_output=True)
    y2 = _gcn_layer(adj01, y1, dinv_pad, w1p, b1p, tm=tm, tk=tk,
                    apply_relu=True, scale_output=True)
    h3 = _gcn_layer(adj01, y2, dinv_pad, w2p, b2p, tm=tm, tk=tk,
                    apply_relu=False, scale_output=False)

    out = _pool_head(pool, h3, wlp, blp, tk=tk)
    return out[:num_graphs, :out_channels]


# ----------------------------------------------------------------------------
# Deterministic parameter construction (synthetic; shapes follow the module)
# ----------------------------------------------------------------------------
def init_params(key, in_channels, hidden_channels, out_channels, nb_layers=3):
    params = []
    dims = [in_channels] + [hidden_channels] * nb_layers
    for layer in range(nb_layers):
        key, kw = jax.random.split(key)
        fan_in, fan_out = dims[layer], dims[layer + 1]
        scale = jnp.sqrt(2.0 / (fan_in + fan_out))             # glorot-like
        w = jax.random.normal(kw, (fan_in, fan_out), jnp.float32) * scale
        b = jnp.zeros((1, fan_out), jnp.float32)               # 2-D biases
        params += [w, b]
    key, kw, kb = jax.random.split(key, 3)
    bound = 1.0 / jnp.sqrt(hidden_channels)
    wl = jax.random.uniform(kw, (hidden_channels, out_channels), jnp.float32,
                            -bound, bound)
    bl = jax.random.uniform(kb, (1, out_channels), jnp.float32, -bound, bound)
    params += [wl, bl]
    return tuple(params)


if __name__ == "__main__":
    key = jax.random.PRNGKey(0)

    # Small synthetic graph batch: 2 graphs, 16 nodes total, 8 input features.
    N, E, IN_C, HID, OUT_C, G = 16, 40, 8, 32, 4, 2

    key, kx, ke_s, ke_d = jax.random.split(key, 4)
    x = jax.random.normal(kx, (N, IN_C), jnp.float32)
    src = jax.random.randint(ke_s, (E,), 0, N, dtype=jnp.int32)
    dst = jax.random.randint(ke_d, (E,), 0, N, dtype=jnp.int32)
    edge_index = jnp.stack([src, dst], axis=0)                     # [2, E]
    batch = jnp.concatenate([jnp.zeros((N // 2,), jnp.int32),
                             jnp.ones((N - N // 2,), jnp.int32)])  # [N]

    key, kp = jax.random.split(key)
    params = init_params(kp, IN_C, HID, OUT_C, nb_layers=3)

    fwd = jax.jit(gcn_forward, static_argnames=("num_graphs",))
    result = fwd(x, edge_index, batch, params, num_graphs=G)
    jax.block_until_ready(result)
    assert result.shape == (G, OUT_C)
    print("KERNEL_OK")
</pallas_src>

<mosaic_0001>
module attributes {stable_mosaic.version = 11 : i64} {
  func.func private @main(%arg0: i32) attributes {dimension_semantics = [#tpu.dimension_semantics<core_parallel>], iteration_bounds = array<i64: 2>, tpu.core_type = #tpu.core_type<sc_scalar_subcore>, window_params = []} {
    return
  }
}

module attributes {stable_mosaic.version = 11 : i64} {
  func.func private @main(%arg0: i32) attributes {dimension_semantics = [#tpu.dimension_semantics<core_parallel>], iteration_bounds = array<i64: 2>, tpu.core_type = #tpu.core_type<sc_scalar_subcore>, window_params = []} {
    return
  }
}

module attributes {stable_mosaic.version = 11 : i64} {
  func.func @_gcn_layer_kernel(%arg0: i32, %arg1: i32, %arg2: memref<256x512xi8, #tpu.memory_space<vmem>>, %arg3: memref<512x128xbf16, #tpu.memory_space<vmem>>, %arg4: memref<256x1xf32, #tpu.memory_space<vmem>>, %arg5: memref<128x128xbf16, #tpu.memory_space<vmem>>, %arg6: memref<1x128xf32, #tpu.memory_space<vmem>>, %arg7: memref<256x128xbf16, #tpu.memory_space<vmem>>, %arg8: memref<256x128xf32, #tpu.memory_space<vmem>>) attributes {dimension_semantics = [#tpu.dimension_semantics<parallel>, #tpu.dimension_semantics<arbitrary>], iteration_bounds = array<i64: 2, 1>, scalar_prefetch = 0 : i64, scratch_operands = 1 : i64, tpu.core_type = #tpu.core_type<tc>, window_params = [{transform_indices = @transform_0, window_bounds = array<i64: 256, 512>}, {pipeline_mode = #tpu.pipeline_mode<synchronous>, transform_indices = @transform_1, window_bounds = array<i64: 512, 128>}, {transform_indices = @transform_2, window_bounds = array<i64: 256, 1>}, {pipeline_mode = #tpu.pipeline_mode<synchronous>, transform_indices = @transform_3, window_bounds = array<i64: 128, 128>}, {pipeline_mode = #tpu.pipeline_mode<synchronous>, transform_indices = @transform_4, window_bounds = array<i64: 1, 128>}, {transform_indices = @transform_5, window_bounds = array<i64: 256, 128>}]} {
    %c0_i32 = arith.constant 0 : i32
    %0 = arith.cmpi eq, %arg1, %c0_i32 : i32
    %1 = arith.extui %0 : i1 to i32
    %c0_i32_0 = arith.constant 0 : i32
    %2 = arith.cmpi ne, %1, %c0_i32_0 : i32
    scf.if %2 {
      %cst_9 = arith.constant 0.000000e+00 : f32
      %16 = vector.broadcast %cst_9 : f32 to vector<256x128xf32>
      %c0_10 = arith.constant 0 : index
      %c0_11 = arith.constant 0 : index
      %17 = vector.load %arg8[%c0_10, %c0_11] : memref<256x128xf32, #tpu.memory_space<vmem>>, vector<256x128xf32>
      tpu.vector_store %arg8[%c0_10, %c0_11], %16 {strides = array<i32>} : memref<256x128xf32, #tpu.memory_space<vmem>>, vector<256x128xf32>,
    } else {
    }
    %c512_i32 = arith.constant 512 : i32
    %3 = arith.muli %arg1, %c512_i32 : i32
    %4 = tpu.assume_multiple %3, 512 : i32
    %5 = arith.index_cast %4 : i32 to index
    %c0 = arith.constant 0 : index
    %6 = vector.load %arg3[%5, %c0] : memref<512x128xbf16, #tpu.memory_space<vmem>>, vector<512x128xbf16>
    %c0_1 = arith.constant 0 : index
    %c0_2 = arith.constant 0 : index
    %7 = vector.load %arg8[%c0_1, %c0_2] : memref<256x128xf32, #tpu.memory_space<vmem>>, vector<256x128xf32>
    %c0_3 = arith.constant 0 : index
    %c0_4 = arith.constant 0 : index
    %8 = vector.load %arg2[%c0_3, %c0_4] : memref<256x512xi8, #tpu.memory_space<vmem>>, vector<256x512xi8>
    %9 = arith.sitofp %8 : vector<256x512xi8> to vector<256x512xbf16>
    %cst = arith.constant dense<0.000000e+00> : vector<256x128xf32>
    %10 = tpu.matmul %9, %6, %cst {dimension_numbers = #tpu.dot_dimension_numbers<[1], [0], [0], [1], [0, 0, 1, 1], [], []>} : vector<256x512xbf16>, vector<512x128xbf16>, vector<256x128xf32> -> vector<256x128xf32>
    %11 = arith.addf %7, %10 : vector<256x128xf32>
    %c0_5 = arith.constant 0 : index
    %c0_6 = arith.constant 0 : index
    %12 = vector.load %arg8[%c0_5, %c0_6] : memref<256x128xf32, #tpu.memory_space<vmem>>, vector<256x128xf32>
    tpu.vector_store %arg8[%c0_5, %c0_6], %11 {strides = array<i32>} : memref<256x128xf32, #tpu.memory_space<vmem>>, vector<256x128xf32>,
    %c0_i32_7 = arith.constant 0 : i32
    %13 = arith.cmpi eq, %arg1, %c0_i32_7 : i32
    %14 = arith.extui %13 : i1 to i32
    %c0_i32_8 = arith.constant 0 : i32
    %15 = arith.cmpi ne, %14, %c0_i32_8 : i32
    scf.if %15 {
      %c0_9 = arith.constant 0 : index
      %c0_10 = arith.constant 0 : index
      %16 = vector.load %arg4[%c0_9, %c0_10] : memref<256x1xf32, #tpu.memory_space<vmem>>, vector<256x1xf32>
      %c0_11 = arith.constant 0 : index
      %c0_12 = arith.constant 0 : index
      %17 = vector.load %arg8[%c0_11, %c0_12] : memref<256x128xf32, #tpu.memory_space<vmem>>, vector<256x128xf32>
      %18 = vector.broadcast %16 : vector<256x1xf32> to vector<256x128xf32>
      %19 = arith.mulf %17, %18 : vector<256x128xf32>
      %20 = arith.truncf %19 : vector<256x128xf32> to vector<256x128xbf16>
      %c0_13 = arith.constant 0 : index
      %c0_14 = arith.constant 0 : index
      %21 = vector.load %arg5[%c0_13, %c0_14] : memref<128x128xbf16, #tpu.memory_space<vmem>>, vector<128x128xbf16>
      %cst_15 = arith.constant dense<0.000000e+00> : vector<256x128xf32>
      %22 = tpu.matmul %20, %21, %cst_15 {dimension_numbers = #tpu.dot_dimension_numbers<[1], [0], [0], [1], [0, 0, 1, 1], [], []>} : vector<256x128xbf16>, vector<128x128xbf16>, vector<256x128xf32> -> vector<256x128xf32>
      %c0_16 = arith.constant 0 : index
      %c0_17 = arith.constant 0 : index
      %23 = vector.load %arg6[%c0_16, %c0_17] : memref<1x128xf32, #tpu.memory_space<vmem>>, vector<1x128xf32>
      %24 = vector.broadcast %23 : vector<1x128xf32> to vector<256x128xf32>
      %25 = arith.addf %22, %24 : vector<256x128xf32>
      %cst_18 = arith.constant 0.000000e+00 : f32
      %26 = vector.broadcast %cst_18 : f32 to vector<256x128xf32>
      %27 = arith.maximumf %25, %26 : vector<256x128xf32>
      %28 = vector.broadcast %16 : vector<256x1xf32> to vector<256x128xf32>
      %29 = arith.mulf %27, %28 : vector<256x128xf32>
      %30 = arith.truncf %29 : vector<256x128xf32> to vector<256x128xbf16>
      %c0_19 = arith.constant 0 : index
      %c0_20 = arith.constant 0 : index
      %31 = vector.load %arg7[%c0_19, %c0_20] : memref<256x128xbf16, #tpu.memory_space<vmem>>, vector<256x128xbf16>
      tpu.vector_store %arg7[%c0_19, %c0_20], %30 {strides = array<i32>} : memref<256x128xbf16, #tpu.memory_space<vmem>>, vector<256x128xbf16>,
    } else {
    }
    return
  }
  func.func @transform_0(%arg0: i32, %arg1: i32) -> (i32, i32) {
    %c0_i32 = arith.constant 0 : i32
    return %arg0, %arg1 : i32, i32
  }
  func.func @transform_1(%arg0: i32, %arg1: i32) -> (i32, i32) {
    %c0_i32 = arith.constant 0 : i32
    %c0_i32_0 = arith.constant 0 : i32
    %c0_i32_1 = arith.constant 0 : i32
    return %c0_i32, %c0_i32_0 : i32, i32
  }
  func.func @transform_2(%arg0: i32, %arg1: i32) -> (i32, i32) {
    %c0_i32 = arith.constant 0 : i32
    %c0_i32_0 = arith.constant 0 : i32
    return %arg0, %c0_i32 : i32, i32
  }
  func.func @transform_3(%arg0: i32, %arg1: i32) -> (i32, i32) {
    %c0_i32 = arith.constant 0 : i32
    %c0_i32_0 = arith.constant 0 : i32
    %c0_i32_1 = arith.constant 0 : i32
    return %c0_i32, %c0_i32_0 : i32, i32
  }
  func.func @transform_4(%arg0: i32, %arg1: i32) -> (i32, i32) {
    %c0_i32 = arith.constant 0 : i32
    %c0_i32_0 = arith.constant 0 : i32
    %c0_i32_1 = arith.constant 0 : i32
    return %c0_i32, %c0_i32_0 : i32, i32
  }
  func.func @transform_5(%arg0: i32, %arg1: i32) -> (i32, i32) {
    %c0_i32 = arith.constant 0 : i32
    %c0_i32_0 = arith.constant 0 : i32
    return %arg0, %c0_i32 : i32, i32
  }
}

module attributes {stable_mosaic.version = 11 : i64} {
  func.func @_gcn_layer_kernel(%arg0: i32, %arg1: i32, %arg2: memref<256x512xi8, #tpu.memory_space<vmem>>, %arg3: memref<512x128xbf16, #tpu.memory_space<vmem>>, %arg4: memref<256x1xf32, #tpu.memory_space<vmem>>, %arg5: memref<128x128xbf16, #tpu.memory_space<vmem>>, %arg6: memref<1x128xf32, #tpu.memory_space<vmem>>, %arg7: memref<256x128xbf16, #tpu.memory_space<vmem>>, %arg8: memref<256x128xf32, #tpu.memory_space<vmem>>) attributes {dimension_semantics = [#tpu.dimension_semantics<parallel>, #tpu.dimension_semantics<arbitrary>], iteration_bounds = array<i64: 2, 1>, scalar_prefetch = 0 : i64, scratch_operands = 1 : i64, tpu.core_type = #tpu.core_type<tc>, window_params = [{transform_indices = @transform_0, window_bounds = array<i64: 256, 512>}, {pipeline_mode = #tpu.pipeline_mode<synchronous>, transform_indices = @transform_1, window_bounds = array<i64: 512, 128>}, {transform_indices = @transform_2, window_bounds = array<i64: 256, 1>}, {pipeline_mode = #tpu.pipeline_mode<synchronous>, transform_indices = @transform_3, window_bounds = array<i64: 128, 128>}, {pipeline_mode = #tpu.pipeline_mode<synchronous>, transform_indices = @transform_4, window_bounds = array<i64: 1, 128>}, {transform_indices = @transform_5, window_bounds = array<i64: 256, 128>}]} {
    %c0_i32 = arith.constant 0 : i32
    %0 = arith.cmpi eq, %arg1, %c0_i32 : i32
    %1 = arith.extui %0 : i1 to i32
    %c0_i32_0 = arith.constant 0 : i32
    %2 = arith.cmpi ne, %1, %c0_i32_0 : i32
    scf.if %2 {
      %cst_9 = arith.constant 0.000000e+00 : f32
      %16 = vector.broadcast %cst_9 : f32 to vector<256x128xf32>
      %c0_10 = arith.constant 0 : index
      %c0_11 = arith.constant 0 : index
      %17 = vector.load %arg8[%c0_10, %c0_11] : memref<256x128xf32, #tpu.memory_space<vmem>>, vector<256x128xf32>
      tpu.vector_store %arg8[%c0_10, %c0_11], %16 {strides = array<i32>} : memref<256x128xf32, #tpu.memory_space<vmem>>, vector<256x128xf32>,
    } else {
    }
    %c512_i32 = arith.constant 512 : i32
    %3 = arith.muli %arg1, %c512_i32 : i32
    %4 = tpu.assume_multiple %3, 512 : i32
    %5 = arith.index_cast %4 : i32 to index
    %c0 = arith.constant 0 : index
    %6 = vector.load %arg3[%5, %c0] : memref<512x128xbf16, #tpu.memory_space<vmem>>, vector<512x128xbf16>
    %c0_1 = arith.constant 0 : index
    %c0_2 = arith.constant 0 : index
    %7 = vector.load %arg8[%c0_1, %c0_2] : memref<256x128xf32, #tpu.memory_space<vmem>>, vector<256x128xf32>
    %c0_3 = arith.constant 0 : index
    %c0_4 = arith.constant 0 : index
    %8 = vector.load %arg2[%c0_3, %c0_4] : memref<256x512xi8, #tpu.memory_space<vmem>>, vector<256x512xi8>
    %9 = arith.sitofp %8 : vector<256x512xi8> to vector<256x512xbf16>
    %cst = arith.constant dense<0.000000e+00> : vector<256x128xf32>
    %10 = tpu.matmul %9, %6, %cst {dimension_numbers = #tpu.dot_dimension_numbers<[1], [0], [0], [1], [0, 0, 1, 1], [], []>} : vector<256x512xbf16>, vector<512x128xbf16>, vector<256x128xf32> -> vector<256x128xf32>
    %11 = arith.addf %7, %10 : vector<256x128xf32>
    %c0_5 = arith.constant 0 : index
    %c0_6 = arith.constant 0 : index
    %12 = vector.load %arg8[%c0_5, %c0_6] : memref<256x128xf32, #tpu.memory_space<vmem>>, vector<256x128xf32>
    tpu.vector_store %arg8[%c0_5, %c0_6], %11 {strides = array<i32>} : memref<256x128xf32, #tpu.memory_space<vmem>>, vector<256x128xf32>,
    %c0_i32_7 = arith.constant 0 : i32
    %13 = arith.cmpi eq, %arg1, %c0_i32_7 : i32
    %14 = arith.extui %13 : i1 to i32
    %c0_i32_8 = arith.constant 0 : i32
    %15 = arith.cmpi ne, %14, %c0_i32_8 : i32
    scf.if %15 {
      %c0_9 = arith.constant 0 : index
      %c0_10 = arith.constant 0 : index
      %16 = vector.load %arg4[%c0_9, %c0_10] : memref<256x1xf32, #tpu.memory_space<vmem>>, vector<256x1xf32>
      %c0_11 = arith.constant 0 : index
      %c0_12 = arith.constant 0 : index
      %17 = vector.load %arg8[%c0_11, %c0_12] : memref<256x128xf32, #tpu.memory_space<vmem>>, vector<256x128xf32>
      %18 = vector.broadcast %16 : vector<256x1xf32> to vector<256x128xf32>
      %19 = arith.mulf %17, %18 : vector<256x128xf32>
      %20 = arith.truncf %19 : vector<256x128xf32> to vector<256x128xbf16>
      %c0_13 = arith.constant 0 : index
      %c0_14 = arith.constant 0 : index
      %21 = vector.load %arg5[%c0_13, %c0_14] : memref<128x128xbf16, #tpu.memory_space<vmem>>, vector<128x128xbf16>
      %cst_15 = arith.constant dense<0.000000e+00> : vector<256x128xf32>
      %22 = tpu.matmul %20, %21, %cst_15 {dimension_numbers = #tpu.dot_dimension_numbers<[1], [0], [0], [1], [0, 0, 1, 1], [], []>} : vector<256x128xbf16>, vector<128x128xbf16>, vector<256x128xf32> -> vector<256x128xf32>
      %c0_16 = arith.constant 0 : index
      %c0_17 = arith.constant 0 : index
      %23 = vector.load %arg6[%c0_16, %c0_17] : memref<1x128xf32, #tpu.memory_space<vmem>>, vector<1x128xf32>
      %24 = vector.broadcast %23 : vector<1x128xf32> to vector<256x128xf32>
      %25 = arith.addf %22, %24 : vector<256x128xf32>
      %26 = arith.truncf %25 : vector<256x128xf32> to vector<256x128xbf16>
      %c0_18 = arith.constant 0 : index
      %c0_19 = arith.constant 0 : index
      %27 = vector.load %arg7[%c0_18, %c0_19] : memref<256x128xbf16, #tpu.memory_space<vmem>>, vector<256x128xbf16>
      tpu.vector_store %arg7[%c0_18, %c0_19], %26 {strides = array<i32>} : memref<256x128xbf16, #tpu.memory_space<vmem>>, vector<256x128xbf16>,
    } else {
    }
    return
  }
  func.func @transform_0(%arg0: i32, %arg1: i32) -> (i32, i32) {
    %c0_i32 = arith.constant 0 : i32
    return %arg0, %arg1 : i32, i32
  }
  func.func @transform_1(%arg0: i32, %arg1: i32) -> (i32, i32) {
    %c0_i32 = arith.constant 0 : i32
    %c0_i32_0 = arith.constant 0 : i32
    %c0_i32_1 = arith.constant 0 : i32
    return %c0_i32, %c0_i32_0 : i32, i32
  }
  func.func @transform_2(%arg0: i32, %arg1: i32) -> (i32, i32) {
    %c0_i32 = arith.constant 0 : i32
    %c0_i32_0 = arith.constant 0 : i32
    return %arg0, %c0_i32 : i32, i32
  }
  func.func @transform_3(%arg0: i32, %arg1: i32) -> (i32, i32) {
    %c0_i32 = arith.constant 0 : i32
    %c0_i32_0 = arith.constant 0 : i32
    %c0_i32_1 = arith.constant 0 : i32
    return %c0_i32, %c0_i32_0 : i32, i32
  }
  func.func @transform_4(%arg0: i32, %arg1: i32) -> (i32, i32) {
    %c0_i32 = arith.constant 0 : i32
    %c0_i32_0 = arith.constant 0 : i32
    %c0_i32_1 = arith.constant 0 : i32
    return %c0_i32, %c0_i32_0 : i32, i32
  }
  func.func @transform_5(%arg0: i32, %arg1: i32) -> (i32, i32) {
    %c0_i32 = arith.constant 0 : i32
    %c0_i32_0 = arith.constant 0 : i32
    return %arg0, %c0_i32 : i32, i32
  }
}

module attributes {stable_mosaic.version = 11 : i64} {
  func.func @_pool_head_kernel(%arg0: i32, %arg1: memref<16x512xbf16, #tpu.memory_space<vmem>>, %arg2: memref<512x128xbf16, #tpu.memory_space<vmem>>, %arg3: memref<128x128xbf16, #tpu.memory_space<vmem>>, %arg4: memref<1x128xf32, #tpu.memory_space<vmem>>, %arg5: memref<16x128xf32, #tpu.memory_space<vmem>>, %arg6: memref<16x128xf32, #tpu.memory_space<vmem>>) attributes {dimension_semantics = [#tpu.dimension_semantics<arbitrary>], iteration_bounds = array<i64: 1>, scalar_prefetch = 0 : i64, scratch_operands = 1 : i64, tpu.core_type = #tpu.core_type<tc>, window_params = [{transform_indices = @transform_0, window_bounds = array<i64: 16, 512>}, {transform_indices = @transform_1, window_bounds = array<i64: 512, 128>}, {pipeline_mode = #tpu.pipeline_mode<synchronous>, transform_indices = @transform_2, window_bounds = array<i64: 128, 128>}, {pipeline_mode = #tpu.pipeline_mode<synchronous>, transform_indices = @transform_3, window_bounds = array<i64: 1, 128>}, {pipeline_mode = #tpu.pipeline_mode<synchronous>, transform_indices = @transform_4, window_bounds = array<i64: 16, 128>}]} {
    %c0_i32 = arith.constant 0 : i32
    %0 = arith.cmpi eq, %arg0, %c0_i32 : i32
    %1 = arith.extui %0 : i1 to i32
    %c0_i32_0 = arith.constant 0 : i32
    %2 = arith.cmpi ne, %1, %c0_i32_0 : i32
    scf.if %2 {
      %cst_10 = arith.constant 0.000000e+00 : f32
      %12 = vector.broadcast %cst_10 : f32 to vector<16x128xf32>
      %c0_11 = arith.constant 0 : index
      %c0_12 = arith.constant 0 : index
      %13 = vector.load %arg6[%c0_11, %c0_12] : memref<16x128xf32, #tpu.memory_space<vmem>>, vector<16x128xf32>
      tpu.vector_store %arg6[%c0_11, %c0_12], %12 {strides = array<i32>} : memref<16x128xf32, #tpu.memory_space<vmem>>, vector<16x128xf32>,
    } else {
    }
    %c0 = arith.constant 0 : index
    %c0_1 = arith.constant 0 : index
    %3 = vector.load %arg6[%c0, %c0_1] : memref<16x128xf32, #tpu.memory_space<vmem>>, vector<16x128xf32>
    %c0_2 = arith.constant 0 : index
    %c0_3 = arith.constant 0 : index
    %4 = vector.load %arg1[%c0_2, %c0_3] : memref<16x512xbf16, #tpu.memory_space<vmem>>, vector<16x512xbf16>
    %c0_4 = arith.constant 0 : index
    %c0_5 = arith.constant 0 : index
    %5 = vector.load %arg2[%c0_4, %c0_5] : memref<512x128xbf16, #tpu.memory_space<vmem>>, vector<512x128xbf16>
    %cst = arith.constant dense<0.000000e+00> : vector<16x128xf32>
    %6 = tpu.matmul %4, %5, %cst {dimension_numbers = #tpu.dot_dimension_numbers<[1], [0], [0], [1], [0, 0, 1, 1], [], []>} : vector<16x512xbf16>, vector<512x128xbf16>, vector<16x128xf32> -> vector<16x128xf32>
    %7 = arith.addf %3, %6 : vector<16x128xf32>
    %c0_6 = arith.constant 0 : index
    %c0_7 = arith.constant 0 : index
    %8 = vector.load %arg6[%c0_6, %c0_7] : memref<16x128xf32, #tpu.memory_space<vmem>>, vector<16x128xf32>
    tpu.vector_store %arg6[%c0_6, %c0_7], %7 {strides = array<i32>} : memref<16x128xf32, #tpu.memory_space<vmem>>, vector<16x128xf32>,
    %c0_i32_8 = arith.constant 0 : i32
    %9 = arith.cmpi eq, %arg0, %c0_i32_8 : i32
    %10 = arith.extui %9 : i1 to i32
    %c0_i32_9 = arith.constant 0 : i32
    %11 = arith.cmpi ne, %10, %c0_i32_9 : i32
    scf.if %11 {
      %c0_10 = arith.constant 0 : index
      %c0_11 = arith.constant 0 : index
      %12 = vector.load %arg6[%c0_10, %c0_11] : memref<16x128xf32, #tpu.memory_space<vmem>>, vector<16x128xf32>
      %13 = arith.truncf %12 : vector<16x128xf32> to vector<16x128xbf16>
      %c0_12 = arith.constant 0 : index
      %c0_13 = arith.constant 0 : index
      %14 = vector.load %arg3[%c0_12, %c0_13] : memref<128x128xbf16, #tpu.memory_space<vmem>>, vector<128x128xbf16>
      %cst_14 = arith.constant dense<0.000000e+00> : vector<16x128xf32>
      %15 = tpu.matmul %13, %14, %cst_14 {dimension_numbers = #tpu.dot_dimension_numbers<[1], [0], [0], [1], [0, 0, 1, 1], [], []>} : vector<16x128xbf16>, vector<128x128xbf16>, vector<16x128xf32> -> vector<16x128xf32>
      %c0_15 = arith.constant 0 : index
      %c0_16 = arith.constant 0 : index
      %16 = vector.load %arg4[%c0_15, %c0_16] : memref<1x128xf32, #tpu.memory_space<vmem>>, vector<1x128xf32>
      %17 = vector.broadcast %16 : vector<1x128xf32> to vector<16x128xf32>
      %18 = arith.addf %15, %17 : vector<16x128xf32>
      %c0_17 = arith.constant 0 : index
      %c0_18 = arith.constant 0 : index
      %19 = vector.load %arg5[%c0_17, %c0_18] : memref<16x128xf32, #tpu.memory_space<vmem>>, vector<16x128xf32>
      tpu.vector_store %arg5[%c0_17, %c0_18], %18 {strides = array<i32>} : memref<16x128xf32, #tpu.memory_space<vmem>>, vector<16x128xf32>,
    } else {
    }
    return
  }
  func.func @transform_0(%arg0: i32) -> (i32, i32) {
    %c0_i32 = arith.constant 0 : i32
    %c0_i32_0 = arith.constant 0 : i32
    return %c0_i32, %arg0 : i32, i32
  }
  func.func @transform_1(%arg0: i32) -> (i32, i32) {
    %c0_i32 = arith.constant 0 : i32
    %c0_i32_0 = arith.constant 0 : i32
    return %arg0, %c0_i32 : i32, i32
  }
  func.func @transform_2(%arg0: i32) -> (i32, i32) {
    %c0_i32 = arith.constant 0 : i32
    %c0_i32_0 = arith.constant 0 : i32
    %c0_i32_1 = arith.constant 0 : i32
    return %c0_i32, %c0_i32_0 : i32, i32
  }
  func.func @transform_3(%arg0: i32) -> (i32, i32) {
    %c0_i32 = arith.constant 0 : i32
    %c0_i32_0 = arith.constant 0 : i32
    %c0_i32_1 = arith.constant 0 : i32
    return %c0_i32, %c0_i32_0 : i32, i32
  }
  func.func @transform_4(%arg0: i32) -> (i32, i32) {
    %c0_i32 = arith.constant 0 : i32
    %c0_i32_0 = arith.constant 0 : i32
    %c0_i32_1 = arith.constant 0 : i32
    return %c0_i32, %c0_i32_0 : i32, i32
  }
}

</mosaic_0001>

<bundles_post_ra>
// kernel: gcn_forward.4
= control target key start
LH: loop header
LB: loop body
LE: loop exit
PB: predicated region body
PF: predicated region fallthrough
CT: control target
= control target key end

     0   :  { %s2558_s18 = smov 0   ;;  %s2560_s19 = smov 0   ;;  %s3045_s0 = inlined_call_operand.vmem [shape: s8[512,512], index: 0, kind: input, shape index: {}]   ;;  %s3046_s1 = inlined_call_operand.vmem [shape: bf16[512,128], index: 1, kind: input, shape index: {}]   ;;  %s3047_s2 = inlined_call_operand.vmem [shape: f32[512,1], index: 2, kind: input, shape index: {}]   ;;  %s3048_s3 = inlined_call_operand.vmem [shape: bf16[128,128], index: 3, kind: input, shape index: {}]   ;;  %s3049_s4 = inlined_call_operand.vmem [shape: f32[1,128], index: 4, kind: input, shape index: {}]   ;;  %s3050_s5 = inlined_call_operand.vmem [shape: bf16[512,128], index: 5, kind: output, shape index: {}]  }
   0x1   :  { %s2562_s20 = smov 0  }
   0x2 LB: > { %s27_s21 = sadd.s32 1, %s2521_s19  ;;  %p1913_p0 = scmp.ge.s32.totalorder %s2525_s20, 1  ;;  %s2525_s20 = sphi %s2562_s20, %s15_s20   ;;  %s2521_s19 = sphi %s2560_s19, %s3052_s19   ;;  %s2517_s18 = sphi %s2558_s18, %s3051_s18  }
   0x3   : > { %p29_p1 = scmp.ge.s32.totalorder %s27_s21, 2  ;;  %p219_p2 = scmp.lt.s32.totalorder %s2525_s20, 3 }
   0x5   : > { %s3054_s21 = smov (%p29_p1, %s27_s21), 0  ;;  %p220_p3 = pnand %p1913_p0, %p219_p2 }
   0x6   : > { %v2463_v0 = vld [vmem:[%s3046_s1 + $0x40] sm:$0xff] (!%p220_p3)   ;;  %s1914_s24 = sshll.u32 (!%p220_p3), %s2517_s18, 3  ;;  %v2465_v2 = vld [vmem:[%s3046_s1 + $0x48] sm:$0xff] (!%p220_p3)   ;;  %v2467_v4 = vld [vmem:[%s3046_s1 + $0x50] sm:$0xff] (!%p220_p3)   ;;  %v2527_v15 = vmov (!%p220_p3), 0   ;;  %s1917_s11 = sshll.u32 (!%p220_p3), %s2517_s18, 5 }
   0x7   : > { %223 = sbr.rel (%p220_p3) target bundleno = 638 (0x27e), region = 40  ;;  %v2464_v1 = vld [vmem:[%s3046_s1] sm:$0xff] (!%p220_p3)   ;;  %2420 = vmatprep.subr.bf16.mxu1 (!%p220_p3), %v2463_v0  ;;  %p259_p4 = scmp.lt.s32.totalorder (!%p220_p3), %s1914_s24, 15  ;;  %2124 = vmatprep.subr.bf16.mxu0 (!%p220_p3), %v2463_v0  ;;  %v2466_v3 = vld [vmem:[%s3046_s1 + $0x8] sm:$0xff] (!%p220_p3)   ;;  %v2468_v5 = vld [vmem:[%s3046_s1 + $0x10] sm:$0xff] (!%p220_p3)  }
   0x8   : > { %2428 = vmatpush3.bf16.msra.mxu1 (!%p220_p3), %v2464_v1  ;;  %2125 = vmatpush3.bf16.msra.mxu0 (!%p220_p3), %v2464_v1  ;;  %v2469_v6 = vld [vmem:[%s3046_s1 + $0x58] sm:$0xff] (!%p220_p3)   ;;  %v2471_v8 = vld [vmem:[%s3046_s1 + $0x60] sm:$0xff] (!%p220_p3)   ;;  %v2473_v10 = vld [vmem:[%s3046_s1 + $0x68] sm:$0xff] (!%p220_p3)   ;;  %p270_p5 = scmp.lt.s32.totalorder (!%p220_p3), %s1917_s11, 63 }
   0x9   : > { %2421 = vmatprep.subr.bf16.mxu1 (!%p220_p3), %v2465_v2  ;;  %2126 = vmatprep.subr.bf16.mxu0 (!%p220_p3), %v2465_v2  ;;  %v2470_v7 = vld [vmem:[%s3046_s1 + $0x18] sm:$0xff] (!%p220_p3)   ;;  %v2472_v9 = vld [vmem:[%s3046_s1 + $0x20] sm:$0xff] (!%p220_p3)   ;;  %v2474_v13 = vld [vmem:[%s3046_s1 + $0x28] sm:$0xff] (!%p220_p3)  }
   0xa   : > { %v2475_v14 = vld [vmem:[%s3046_s1 + $0x70] sm:$0xff] (!%p220_p3)   ;;  %2461 = vset.pattern.permute.xlu0 (!%p220_p3), %v2527_v15  ;;  %2462 = vset.pattern.permute.xlu1 (!%p220_p3), %v2527_v15  ;;  %v2477_v17 = vld [vmem:[%s3046_s1 + $0x78] sm:$0xff] (!%p220_p3)   ;;  %v2479_v20 = vld [vmem:[%s3046_s1 + $0xc0] sm:$0xff] (!%p220_p3)  }
   0xb   : > { %v2476_v16 = vld [vmem:[%s3046_s1 + $0x30] sm:$0xff] (!%p220_p3)   ;;  %v2478_v18 = vld [vmem:[%s3046_s1 + $0x38] sm:$0xff] (!%p220_p3)   ;;  %v2480_v23 = vld [vmem:[%s3046_s1 + $0x80] sm:$0xff] (!%p220_p3)  }
   0xc   : > { %2429 = vmatpush3.bf16.msra.mxu1 (!%p220_p3), %v2466_v3  ;;  %2127 = vmatpush3.bf16.msra.mxu0 (!%p220_p3), %v2466_v3  ;;  %v2481_v24 = vld [vmem:[%s3046_s1 + $0xc8] sm:$0xff] (!%p220_p3)   ;;  %v2483_v31 = vld [vmem:[%s3046_s1 + $0xd0] sm:$0xff] (!%p220_p3)   ;;  %v2485_v37 = vld [vmem:[%s3046_s1 + $0xd8] sm:$0xff] (!%p220_p3)  }
   0xd   : > { %2422 = vmatprep.subr.bf16.mxu1 (!%p220_p3), %v2467_v4  ;;  %2128 = vmatprep.subr.bf16.mxu0 (!%p220_p3), %v2467_v4  ;;  %v2482_v29 = vld [vmem:[%s3046_s1 + $0x88] sm:$0xff] (!%p220_p3)   ;;  %v2484_v34 = vld [vmem:[%s3046_s1 + $0x90] sm:$0xff] (!%p220_p3)   ;;  %v2486_v42 = vld [vmem:[%s3046_s1 + $0x98] sm:$0xff] (!%p220_p3)  }
   0xe   : > { %s3056_s24 = smov (!%p259_p4, %s1914_s24), 15  ;;  %s3058_s11 = smov (!%p270_p5, %s1917_s11), 63  ;;  %v2487_v45 = vld [vmem:[%s3046_s1 + $0xe0] sm:$0xff]   ;;  %v2489_v49 = vld [vmem:[%s3046_s1 + $0xe8] sm:$0xff]   ;;  %v2491_v56 = vld [vmem:[%s3046_s1 + $0xf0] sm:$0xff]  }
   0xf   : > { %s1996_s12 = sshll.u32 %s3056_s24, 5  ;;  %s1918_s26 = sshll.u32 %s3058_s11, 3  ;;  %v2488_v46 = vld [vmem:[%s3046_s1 + $0xa0] sm:$0xff]   ;;  %v2490_v55 = vld [vmem:[%s3046_s1 + $0xa8] sm:$0xff]   ;;  %v2492_v62 = vld [vmem:[%s3046_s1 + $0xb0] sm:$0xff]  }
  0x10   : > { %2430 = vmatpush3.bf16.msra.mxu1 %v2468_v5  ;;  %2129 = vmatpush3.bf16.msra.mxu0 %v2468_v5  ;;  %s2609_s23 = scalar_lea.vmem %s3045_s0, %s1996_s12  ;;  %s2659_s6 = scalar_lea.vmem %s3047_s2, %s1918_s26  ;;  %v2493_v2 = vld [vmem:[%s3046_s1 + $0xf8] sm:$0xff]  }
  0x11   : > { %2423 = vmatprep.subr.bf16.mxu1 %v2469_v6  ;;  %2130 = vmatprep.subr.bf16.mxu0 %v2469_v6  ;;  %v444_v11 = vld [vmem:[%s2609_s23 + $0xc8] sm:$0xff]  ;;  %v443_v19 = vld [vmem:[%s2609_s23 + $0xc0] sm:$0xff]  ;;  %v1098_v41 = vld [vmem:[%s2659_s6 + $0x10] sm:$0xff]  ;;  %s1920_s7 = sshll.u32 %s3058_s11, 2 }
  0x12   : > { %v500_v12 = vunpack.c.l.s8.bf16 %v444_v11  ;;  %v499_v21 = vunpack.c.l.s8.bf16 %v443_v19  ;;  %v504_v22 = vunpack.c.h.s8.bf16 %v444_v11  ;;  %v420_v25 = vld [vmem:[%s2609_s23 + $0x8] sm:$0xff]  ;;  %v419_v28 = vld [vmem:[%s2609_s23] sm:$0xff]  ;;  %v503_v33 = vunpack.c.h.s8.bf16 %v443_v19  ;;  %1172 = vperm.xlu1 %2462, %v1098_v41   ;;  %v1099_v47 = vld [vmem:[%s2659_s6 + $0x18] sm:$0xff] }
  0x13   : > { %v452_v26 = vunpack.c.l.s8.bf16 %v420_v25  ;;  %v456_v27 = vunpack.c.h.s8.bf16 %v420_v25  ;;  %v451_v30 = vunpack.c.l.s8.bf16 %v419_v28  ;;  %v448_v32 = vld [vmem:[%s2609_s23 + $0xe8] sm:$0xff]  ;;  %v455_v38 = vunpack.c.h.s8.bf16 %v419_v28  ;;  %v1096_v39 = vld [vmem:[%s2659_s6] sm:$0xff]  ;;  %v422_v57 = vld [vmem:[%s2609_s23 + $0x18] sm:$0xff] }
  0x14   : > { %2431 = vmatpush3.bf16.msra.mxu1 %v2470_v7  ;;  %2131 = vmatpush3.bf16.msra.mxu0 %v2470_v7  ;;  %v508_v35 = vunpack.c.l.s8.bf16 %v448_v32  ;;  %v424_v36 = vld [vmem:[%s2609_s23 + $0x28] sm:$0xff]  ;;  %v447_v43 = vld [vmem:[%s2609_s23 + $0xe0] sm:$0xff]  ;;  %v512_v52 = vunpack.c.h.s8.bf16 %v448_v32  ;;  %v1102_v59 = vld [vmem:[%s2659_s6 + $0x30] sm:$0xff]  ;;  %v454_v63 = vunpack.c.l.s8.bf16 %v422_v57 }
  0x15   : > { %2424 = vmatprep.subr.bf16.mxu1 %v2471_v8  ;;  %2132 = vmatprep.subr.bf16.mxu0 %v2471_v8  ;;  %v460_v40 = vunpack.c.l.s8.bf16 %v424_v36  ;;  %v1097_v44 = vld [vmem:[%s2659_s6 + $0x8] sm:$0xff]  ;;  %v507_v48 = vunpack.c.l.s8.bf16 %v447_v43  ;;  %v423_v50 = vld [vmem:[%s2609_s23 + $0x20] sm:$0xff]  ;;  %v464_v58 = vunpack.c.h.s8.bf16 %v424_v36  ;;  %v1103_v60 = vld [vmem:[%s2659_s6 + $0x38] sm:$0xff]  ;;  %v511_v61 = vunpack.c.h.s8.bf16 %v447_v43 }
  0x16   : > { %835 = vmatprep.mubr.bf16.mxu1 %v500_v12  ;;  %739 = vmatprep.mubr.bf16.mxu0 %v452_v26  ;;  %v1100_v51 = vld [vmem:[%s2659_s6 + $0x20] sm:$0xff]  ;;  %v1101_v53 = vld [vmem:[%s2659_s6 + $0x28] sm:$0xff]  ;;  %v459_v54 = vunpack.c.l.s8.bf16 %v423_v50  ;;  %v463_v3 = vunpack.c.h.s8.bf16 %v423_v50  ;;  %v2494_v6 = vld [vmem:[%s3046_s1 + $0xb8] sm:$0xff]   ;;  %v458_v12 = vunpack.c.h.s8.bf16 %v422_v57 }
  0x17   : > { %1162 = vperm.xlu0 %2461, %v1096_v39   ;;  %1177 = vperm.xlu1 %2462, %v1099_v47   ;;  %v428_v0 = vld [vmem:[%s2609_s23 + $0x48] sm:$0xff]  ;;  %v1104_v1 = vld [vmem:[%s2659_s6 + $0x40] sm:$0xff]  ;;  %v421_v7 = vld [vmem:[%s2609_s23 + $0x10] sm:$0xff] }
  0x18   : > { %2432 = vmatpush3.bf16.msra.mxu1 %v2472_v9  ;;  %2133 = vmatpush3.bf16.msra.mxu0 %v2472_v9  ;;  %v1105_v4 = vld [vmem:[%s2659_s6 + $0x48] sm:$0xff]  ;;  %v468_v5 = vunpack.c.l.s8.bf16 %v428_v0  ;;  %v1106_v8 = vld [vmem:[%s2659_s6 + $0x50] sm:$0xff]  ;;  %v1107_v9 = vld [vmem:[%s2659_s6 + $0x58] sm:$0xff] }
  0x19   : > { %2425 = vmatprep.subr.bf16.mxu1 %v2473_v10  ;;  %2134 = vmatprep.subr.bf16.mxu0 %v2473_v10  ;;  %v453_v10 = vunpack.c.l.s8.bf16 %v421_v7  ;;  %v427_v11 = vld [vmem:[%s2609_s23 + $0x40] sm:$0xff]  ;;  %v1109_v15 = vld [vmem:[%s2659_s6 + $0x68] sm:$0xff]  ;;  %v1111_v19 = vld [vmem:[%s2659_s6 + $0x78] sm:$0xff] }
  0x1a   : > { %v1113_v25 = vld [vmem:[%s2659_s6 + $0x88] sm:$0xff]  ;;  %v1114_v28 = vld [vmem:[%s2659_s6 + $0x90] sm:$0xff]  ;;  %v1119_v39 = vld [vmem:[%s2659_s6 + $0xb8] sm:$0xff] }
  0x1b   : > { %1167 = vperm.xlu0 %2461, %v1097_v44   ;;  %1187 = vperm.xlu1 %2462, %v1101_v53   ;;  %v1120_v43 = vld [vmem:[%s2659_s6 + $0xc0] sm:$0xff]  ;;  %v429_v47 = vld [vmem:[%s2609_s23 + $0x50] sm:$0xff] }
  0x1c   : > { %2433 = vmatpush3.bf16.msra.mxu1 %v2474_v13  ;;  %2135 = vmatpush3.bf16.msra.mxu0 %v2474_v13  ;;  %v1108_v13 = vld [vmem:[%s2659_s6 + $0x60] sm:$0xff]  ;;  %v469_v50 = vunpack.c.l.s8.bf16 %v429_v47  ;;  %v1126_v57 = vld [vmem:[%s2659_s6 + $0xf0] sm:$0xff] }
  0x1d   : > { %2426 = vmatprep.subr.bf16.mxu1 %v2475_v14  ;;  %2136 = vmatprep.subr.bf16.mxu0 %v2475_v14  ;;  %v467_v14 = vunpack.c.l.s8.bf16 %v427_v11  ;;  %v1124_v53 = vld [vmem:[%s2659_s6 + $0xe0] sm:$0xff] }
  0x1f   : > { %1182 = vperm.xlu0 %2461, %v1100_v51   ;;  %1197 = vperm.xlu1 %2462, %v1103_v60   ;;  %v435_v51 = vld [vmem:[%s2609_s23 + $0x80] sm:$0xff]  ;;  %v473_v60 = vunpack.c.h.s8.bf16 %v429_v47 }
  0x20   : > { %2434 = vmatpush3.bf16.msra.mxu1 %v2476_v16  ;;  %2137 = vmatpush3.bf16.msra.mxu0 %v2476_v16  ;;  %v472_v16 = vunpack.c.h.s8.bf16 %v428_v0 }
  0x21   : > { %2427 = vmatprep.subr.bf16.mxu1 %v2477_v17  ;;  %2138 = vmatprep.subr.bf16.mxu0 %v2477_v17  ;;  %v1110_v17 = vld [vmem:[%s2659_s6 + $0x70] sm:$0xff] }
  0x23   : > { %1192 = vperm.xlu0 %2461, %v1102_v59   ;;  %1207 = vperm.xlu1 %2462, %v1105_v4   ;;  %v1127_v59 = vld [vmem:[%s2659_s6 + $0xf8] sm:$0xff] }
  0x24   : > { %2435 = vmatpush3.bf16.msra.mxu1 %v2478_v18  ;;  %2139 = vmatpush3.bf16.msra.mxu0 %v2478_v18  ;;  %v426_v18 = vld [vmem:[%s2609_s23 + $0x38] sm:$0xff] }
  0x25   : > { %2236 = vmatprep.subr.bf16.mxu1 %v2479_v20  ;;  %v457_v20 = vunpack.c.h.s8.bf16 %v421_v7  ;;  %v466_v32 = vunpack.c.h.s8.bf16 %v426_v18  ;;  %v438_v7 = vld [vmem:[%s2609_s23 + $0x98] sm:$0xff] }
  0x27   : > { %836 = vmatmul.mubr.bf16.vlgmr.msra.gmra.mrb[0].mxu1 %v499_v21  ;;  %740 = vmatmul.mubr.bf16.vlgmr.msra.gmra.mrb[0].mxu0 %v451_v30  ;;  %v462_v21 = vunpack.c.l.s8.bf16 %v426_v18  ;;  %v441_v18 = vld [vmem:[%s2609_s23 + $0xb0] sm:$0xff] }
  0x28   : > { %2237 = vmatpush3.bf16.msra.mxu1 %v2480_v23  ;;  %843 = vmatprep.mubr.bf16.mxu1 %v504_v22  ;;  %v432_v22 = vld [vmem:[%s2609_s23 + $0x68] sm:$0xff]  ;;  %v1112_v23 = vld [vmem:[%s2659_s6 + $0x80] sm:$0xff] }
  0x29   : > { %2238 = vmatprep.subr.bf16.mxu1 %v2481_v24  ;;  %747 = vmatprep.mubr.bf16.mxu0 %v456_v27  ;;  %v471_v24 = vunpack.c.h.s8.bf16 %v427_v11  ;;  %v476_v26 = vunpack.c.l.s8.bf16 %v432_v22  ;;  %v425_v27 = vld [vmem:[%s2609_s23 + $0x30] sm:$0xff]  ;;  %v480_v36 = vunpack.c.h.s8.bf16 %v432_v22 }
  0x2a   : > { %1202 = vperm.xlu0 %2461, %v1104_v1   ;;  %1217 = vperm.xlu1 %2462, %v1107_v9   ;;  %v461_v30 = vunpack.c.l.s8.bf16 %v425_v27  ;;  %v433_v1 = vld [vmem:[%s2609_s23 + $0x70] sm:$0xff]  ;;  %v486_v9 = vunpack.c.l.s8.bf16 %v438_v7 }
  0x2b   : > { %v437_v11 = vld [vmem:[%s2609_s23 + $0x90] sm:$0xff] }
  0x2c   : > { %2239 = vmatpush3.bf16.msra.mxu1 %v2482_v29  ;;  %v1115_v29 = vld [vmem:[%s2659_s6 + $0x98] sm:$0xff]  ;;  %v2497_v22 = vld [vmem:[%s3048_s3 + $0x10] sm:$0xff]  }
  0x2d   : > { %2240 = vmatprep.subr.bf16.mxu1 %v2483_v31  ;;  %v431_v31 = vld [vmem:[%s2609_s23 + $0x60] sm:$0xff] }
  0x2e   : > { %1212 = vperm.xlu0 %2461, %v1106_v8   ;;  %1227 = vperm.xlu1 %2462, %v1109_v15   ;;  %v479_v44 = vunpack.c.h.s8.bf16 %v431_v31  ;;  %v481_v8 = vunpack.c.h.s8.bf16 %v433_v1  ;;  %v442_v15 = vld [vmem:[%s2609_s23 + $0xb8] sm:$0xff] }
  0x2f   : > { %844 = vmatmul.mubr.bf16.gmra.mrb[4].mxu1 %v503_v33  ;;  %748 = vmatmul.mubr.bf16.gmra.mrb[4].mxu0 %v455_v38  ;;  %v1116_v33 = vld [vmem:[%s2659_s6 + $0xa0] sm:$0xff]  ;;  %v430_v38 = vld [vmem:[%s2609_s23 + $0x58] sm:$0xff] }
  0x30   : > { %2241 = vmatpush3.bf16.msra.mxu1 %v2484_v34  ;;  %851 = vmatprep.mubr.bf16.mxu1 %v508_v35  ;;  %v475_v34 = vunpack.c.l.s8.bf16 %v431_v31  ;;  %v1117_v35 = vld [vmem:[%s2659_s6 + $0xa8] sm:$0xff]  ;;  %v470_v41 = vunpack.c.l.s8.bf16 %v430_v38 }
  0x31   : > { %2242 = vmatprep.subr.bf16.mxu1 %v2485_v37  ;;  %755 = vmatprep.mubr.bf16.mxu0 %v460_v40  ;;  %v1118_v37 = vld [vmem:[%s2659_s6 + $0xb0] sm:$0xff]  ;;  %v465_v40 = vunpack.c.h.s8.bf16 %v425_v27  ;;  %v2499_v27 = vld [vmem:[%s3048_s3 + $0x20] sm:$0xff]  }
  0x32   : > { %1222 = vperm.xlu0 %2461, %v1108_v13   ;;  %1237 = vperm.xlu1 %2462, %v1111_v19   ;;  %v490_v13 = vunpack.c.h.s8.bf16 %v438_v7  ;;  %v2496_v19 = vld [vmem:[%s3048_s3 + $0x8] sm:$0xff]  }
  0x34   : > { %2243 = vmatpush3.bf16.msra.mxu1 %v2486_v42  ;;  %v436_v42 = vld [vmem:[%s2609_s23 + $0x88] sm:$0xff] }
  0x35   : > { %2244 = vmatprep.subr.bf16.mxu1 %v2487_v45  ;;  %v1121_v45 = vld [vmem:[%s2659_s6 + $0xc8] sm:$0xff] }
  0x36   : > { %1232 = vperm.xlu0 %2461, %v1110_v17   ;;  %1247 = vperm.xlu1 %2462, %v1113_v25   ;;  %v494_v17 = vunpack.c.l.s8.bf16 %v442_v15  ;;  %v497_v25 = vunpack.c.h.s8.bf16 %v441_v18 }
  0x37   : > { %852 = vmatmul.mubr.bf16.gmra.mrb[8].mxu1 %v507_v48  ;;  %756 = vmatmul.mubr.bf16.gmra.mrb[8].mxu0 %v459_v54  ;;  %v1122_v48 = vld [vmem:[%s2659_s6 + $0xd0] sm:$0xff]  ;;  %v483_v54 = vunpack.c.l.s8.bf16 %v435_v51 }
  0x38   : > { %2245 = vmatpush3.bf16.msra.mxu1 %v2488_v46  ;;  %859 = vmatprep.mubr.bf16.mxu1 %v512_v52  ;;  %v484_v46 = vunpack.c.l.s8.bf16 %v436_v42  ;;  %v474_v52 = vunpack.c.h.s8.bf16 %v430_v38 }
  0x39   : > { %2246 = vmatprep.subr.bf16.mxu1 %v2489_v49  ;;  %763 = vmatprep.mubr.bf16.mxu0 %v464_v58  ;;  %v1123_v49 = vld [vmem:[%s2659_s6 + $0xd8] sm:$0xff] }
  0x3a   : > { %1242 = vperm.xlu0 %2461, %v1112_v23   ;;  %1257 = vperm.xlu1 %2462, %v1115_v29   ;;  %v434_v58 = vld [vmem:[%s2609_s23 + $0x78] sm:$0xff]  ;;  %v2500_v29 = vld [vmem:[%s3048_s3 + $0x28] sm:$0xff]  }
  0x3b   : > { %v482_v4 = vunpack.c.h.s8.bf16 %v434_v58  ;;  %v2498_v23 = vld [vmem:[%s3048_s3 + $0x18] sm:$0xff]  }
  0x3c   : > { %2247 = vmatpush3.bf16.msra.mxu1 %v2490_v55  ;;  %v1125_v55 = vld [vmem:[%s2659_s6 + $0xe8] sm:$0xff]  ;;  %s2961_s6 = scalar_lea.vmem %s3050_s5, %s1920_s7 }
  0x3d   : > { %2248 = vmatprep.subr.bf16.mxu1 %v2491_v56  ;;  %v488_v56 = vunpack.c.h.s8.bf16 %v436_v42 }
  0x3e   : > { %1252 = vperm.xlu0 %2461, %v1114_v28   ;;  %1267 = vperm.xlu1 %2462, %v1117_v35   ;;  %v445_v28 = vld [vmem:[%s2609_s23 + $0xd0] sm:$0xff] }
  0x3f   : > { %860 = vmatmul.mubr.bf16.gmra.mrb[12].mxu1 %v511_v61  ;;  %764 = vmatmul.mubr.bf16.gmra.mrb[12].mxu0 %v463_v3  ;;  %v478_v61 = vunpack.c.l.s8.bf16 %v434_v58  ;;  %v439_v3 = vld [vmem:[%s2609_s23 + $0xa0] sm:$0xff]  ;;  %v505_v35 = vunpack.c.h.s8.bf16 %v445_v28 }
  0x40   : > { %2249 = vmatpush3.bf16.msra.mxu1 %v2492_v62  ;;  %900 = vmatprep.mubr.bf16.mxu1 %v454_v63  ;;  %v440_v62 = vld [vmem:[%s2609_s23 + $0xa8] sm:$0xff]  ;;  %v487_v63 = vunpack.c.h.s8.bf16 %v435_v51 }
  0x41   : > { %2250 = vmatprep.subr.bf16.mxu1 %v2493_v2  ;;  %771 = vmatprep.mubr.bf16.mxu0 %v468_v5  ;;  %v492_v0 = vunpack.c.l.s8.bf16 %v440_v62  ;;  %v477_v2 = vunpack.c.l.s8.bf16 %v433_v1  ;;  %v491_v5 = vunpack.c.l.s8.bf16 %v439_v3 }
  0x42   : > { %1262 = vperm.xlu0 %2461, %v1116_v33   ;;  %1277 = vperm.xlu1 %2462, %v1119_v39   ;;  %v2502_v33 = vld [vmem:[%s3048_s3 + $0x38] sm:$0xff]  }
  0x44   : > { %2251 = vmatpush3.bf16.msra.mxu1 %v2494_v6  ;;  %v496_v6 = vunpack.c.h.s8.bf16 %v440_v62 }
  0x46   : > { %1272 = vperm.xlu0 %2461, %v1118_v37   ;;  %1287 = vperm.xlu1 %2462, %v1121_v45   ;;  %v449_v37 = vld [vmem:[%s2609_s23 + $0xf0] sm:$0xff] }
  0x47   : > { %901 = vmatmul.mubr.bf16.vlgmr.msra.gmra.mrb[16].mxu1 %v453_v10  ;;  %772 = vmatmul.mubr.bf16.gmra.mrb[16].mxu0 %v467_v14  ;;  %v495_v10 = vunpack.c.h.s8.bf16 %v439_v3  ;;  %v2495_v14 = vld [vmem:[%s3048_s3] sm:$0xff]   ;;  %v509_v38 = vunpack.c.l.s8.bf16 %v449_v37 }
  0x48   : > { %908 = vmatprep.mubr.bf16.mxu1 %v458_v12  ;;  %779 = vmatprep.mubr.bf16.mxu0 %v472_v16  ;;  %v485_v12 = vunpack.c.l.s8.bf16 %v437_v11  ;;  %v489_v16 = vunpack.c.h.s8.bf16 %v437_v11 }
  0x49   : > { %2372 = vmatprep.subr.bf16.mxu0 %v2495_v14 }
  0x4a   : > { %1282 = vperm.xlu0 %2461, %v1120_v43   ;;  %1297 = vperm.xlu1 %2462, %v1123_v49  }
  0x4b   : > { %2373 = vmatpush3.bf16.msra.mxu0 %v2495_v14 }
  0x4c   : > { %2374 = vmatprep.subr.bf16.mxu0 %v2496_v19 }
  0x4e   : > { %1292 = vperm.xlu0 %2461, %v1122_v48   ;;  %1307 = vperm.xlu1 %2462, %v1125_v55  }
  0x4f   : > { %909 = vmatmul.mubr.bf16.gmra.mrb[20].mxu1 %v457_v20  ;;  %780 = vmatmul.mubr.bf16.gmra.mrb[20].mxu0 %v471_v24  ;;  %v493_v20 = vunpack.c.l.s8.bf16 %v441_v18  ;;  %v446_v24 = vld [vmem:[%s2609_s23 + $0xd8] sm:$0xff] }
  0x50   : > { %916 = vmatprep.mubr.bf16.mxu1 %v462_v21  ;;  %787 = vmatprep.mubr.bf16.mxu0 %v476_v26  ;;  %v498_v21 = vunpack.c.h.s8.bf16 %v442_v15  ;;  %v502_v26 = vunpack.c.l.s8.bf16 %v446_v24  ;;  %v506_v31 = vunpack.c.h.s8.bf16 %v446_v24 }
  0x51   : > { %2375 = vmatpush3.bf16.msra.mxu0 %v2496_v19 }
  0x52   : > { %1302 = vperm.xlu0 %2461, %v1124_v53   ;;  %1317 = vperm.xlu1 %2462, %v1127_v59  }
  0x53   : > { %2376 = vmatprep.subr.bf16.mxu0 %v2497_v22 }
  0x55   : > { %2377 = vmatpush3.bf16.msra.mxu0 %v2497_v22 }
  0x56   : > { %1312 = vperm.xlu0 %2461, %v1126_v57   ;;  %2378 = vmatprep.subr.bf16.mxu0 %v2498_v23 }
  0x57   : > { %917 = vmatmul.mubr.bf16.gmra.mrb[24].mxu1 %v461_v30  ;;  %788 = vmatmul.mubr.bf16.gmra.mrb[24].mxu0 %v475_v34  ;;  %v501_v30 = vunpack.c.l.s8.bf16 %v445_v28  ;;  %v450_v34 = vld [vmem:[%s2609_s23 + $0xf8] sm:$0xff] }
  0x58   : > { %924 = vmatprep.mubr.bf16.mxu1 %v466_v32  ;;  %795 = vmatprep.mubr.bf16.mxu0 %v480_v36  ;;  %v2501_v32 = vld [vmem:[%s3048_s3 + $0x30] sm:$0xff]   ;;  %v510_v36 = vunpack.c.l.s8.bf16 %v450_v34  ;;  %v514_v39 = vunpack.c.h.s8.bf16 %v450_v34 }
  0x59   : > { %2379 = vmatpush3.bf16.msra.mxu0 %v2498_v23 }
  0x5a   : > { %2380 = vmatprep.subr.bf16.mxu0 %v2499_v27 }
  0x5d   : > { %2381 = vmatpush3.bf16.msra.mxu0 %v2499_v27 }
  0x5e   : > { %2382 = vmatprep.subr.bf16.mxu0 %v2500_v29 }
  0x5f   : > { %925 = vmatmul.mubr.bf16.gmra.mrb[28].mxu1 %v465_v40  ;;  %796 = vmatmul.mubr.bf16.gmra.mrb[28].mxu0 %v479_v44  ;;  %v513_v40 = vunpack.c.h.s8.bf16 %v449_v37 }
  0x60   : > { %932 = vmatprep.mubr.bf16.mxu1 %v470_v41  ;;  %803 = vmatprep.mubr.bf16.mxu0 %v484_v46 }
  0x61   : > { %2383 = vmatpush3.bf16.msra.mxu0 %v2500_v29 }
  0x62   : > { %2384 = vmatprep.subr.bf16.mxu0 %v2501_v32 }
  0x65   : > { %2385 = vmatpush3.bf16.msra.mxu0 %v2501_v32 }
  0x66   : > { %2386 = vmatprep.subr.bf16.mxu0 %v2502_v33 }
  0x67   : > { %933 = vmatmul.mubr.bf16.gmra.mrb[32].mxu1 %v469_v50  ;;  %804 = vmatmul.mubr.bf16.gmra.mrb[32].mxu0 %v483_v54 }
  0x68   : > { %940 = vmatprep.mubr.bf16.mxu1 %v474_v52  ;;  %811 = vmatprep.mubr.bf16.mxu0 %v488_v56 }
  0x69   : > { %2387 = vmatpush3.bf16.msra.mxu0 %v2502_v33 }
  0x6f   : > { %941 = vmatmul.mubr.bf16.gmra.mrb[36].mxu1 %v473_v60  ;;  %812 = vmatmul.mubr.bf16.gmra.mrb[36].mxu0 %v487_v63 }
  0x70   : > { %948 = vmatprep.mubr.bf16.mxu1 %v478_v61  ;;  %819 = vmatprep.mubr.bf16.mxu0 %v492_v0 }
  0x77   : > { %949 = vmatmul.mubr.bf16.gmra.mrb[40].mxu1 %v477_v2  ;;  %820 = vmatmul.mubr.bf16.gmra.mrb[40].mxu0 %v491_v5 }
  0x78   : > { %956 = vmatprep.mubr.bf16.mxu1 %v482_v4  ;;  %827 = vmatprep.mubr.bf16.mxu0 %v496_v6 }
  0x7f   : > { %957 = vmatmul.mubr.bf16.gmra.mrb[44].mxu1 %v481_v8  ;;  %828 = vmatmul.mubr.bf16.gmra.mrb[44].mxu0 %v495_v10 }
  0x80   : > { %964 = vmatprep.mubr.bf16.mxu1 %v486_v9 }
  0x87   : > { %965 = vmatmul.mubr.bf16.gmra.mrb[48].mxu1 %v485_v12 }
  0x88   : > { %972 = vmatprep.mubr.bf16.mxu1 %v490_v13 }
  0x8f   : > { %973 = vmatmul.mubr.bf16.gmra.mrb[52].mxu1 %v489_v16 }
  0x90   : > { %980 = vmatprep.mubr.bf16.mxu1 %v494_v17 }
  0x96   : > { %v2797_v24 = vpop.permute.xlu0 %1162 }
  0x97   : > { %981 = vmatmul.mubr.bf16.gmra.mrb[56].mxu1 %v493_v20 }
  0x98   : > { %988 = vmatprep.mubr.bf16.mxu1 %v498_v21 }
  0x9f   : > { %989 = vmatmul.mubr.bf16.gmra.mrb[60].mxu1 %v497_v25 }
  0xa0   : > { %996 = vmatprep.mubr.bf16.mxu1 %v502_v26 }
  0xa7   : > { %997 = vmatmul.mubr.bf16.gmra.mrb[64].mxu1 %v501_v30 }
  0xa8   : > { %1004 = vmatprep.mubr.bf16.mxu1 %v506_v31 }
  0xaf   : > { %1005 = vmatmul.mubr.bf16.gmra.mrb[68].mxu1 %v505_v35  ;;  %v2801_v35 = vpop.permute.xlu0 %1167 }
  0xb0   : > { %1012 = vmatprep.mubr.bf16.mxu1 %v510_v36 }
  0xb7   : > { %1013 = vmatmul.mubr.bf16.gmra.mrb[72].mxu1 %v509_v38 }
  0xb8   : > { %1020 = vmatprep.mubr.bf16.mxu1 %v514_v39 }
  0xbf   : > { %1021 = vmatmul.mubr.bf16.gmra.mrb[76].mxu1 %v513_v40 }
  0xfa   : > { %v2212_v41 = vpop.f32.mrb[0].mxu1  ;;  %v2140_v46 = vpop.f32.mrb[0].mxu0 }
  0xfb   : > { %v2213_v42 = vpop.f32.mrb[1].mxu1  ;;  %v2141_v48 = vpop.f32.mrb[1].mxu0 }
  0xfc   : > { %v2777_v43 = vadd.f32 %v2213_v42, %v2212_v41  ;;  %v2215_v44 = vpop.f32.mrb[2].mxu1  ;;  %v2142_v49 = vadd.f32 %v2141_v48, %v2140_v46  ;;  %v2143_v50 = vpop.f32.mrb[2].mxu0 }
  0xfd   : > { %v2216_v45 = vpop.f32.mrb[3].mxu1  ;;  %v2144_v51 = vpop.f32.mrb[3].mxu0 }
  0xfe   : > { %v2779_v47 = vadd.f32 %v2216_v45, %v2215_v44  ;;  %v2145_v52 = vadd.f32 %v2144_v51, %v2143_v50  ;;  %v2809_v45 = vpop.permute.xlu1 %1172 }
 0x102   : > { %v2218_v53 = vpop.f32.mrb[4].mxu1  ;;  %v2146_v58 = vpop.f32.mrb[4].mxu0 }
 0x103   : > { %v2219_v54 = vpop.f32.mrb[5].mxu1  ;;  %v2147_v60 = vpop.f32.mrb[5].mxu0 }
 0x104   : > { %v2781_v55 = vadd.f32 %v2219_v54, %v2218_v53  ;;  %v2221_v56 = vpop.f32.mrb[6].mxu1  ;;  %v2148_v61 = vadd.f32 %v2147_v60, %v2146_v58  ;;  %v2149_v62 = vpop.f32.mrb[6].mxu0 }
 0x105   : > { %v2222_v57 = vpop.f32.mrb[7].mxu1  ;;  %v2150_v63 = vpop.f32.mrb[7].mxu0 }
 0x106   : > { %v2783_v59 = vadd.f32 %v2222_v57, %v2221_v56  ;;  %v2151_v0 = vadd.f32 %v2150_v63, %v2149_v62  ;;  %v2813_v63 = vpop.permute.xlu1 %1177 }
 0x10a   : > { %v2224_v1 = vpop.f32.mrb[8].mxu1  ;;  %v2152_v6 = vpop.f32.mrb[8].mxu0 }
 0x10b   : > { %v2225_v2 = vpop.f32.mrb[9].mxu1  ;;  %v2153_v8 = vpop.f32.mrb[9].mxu0 }
 0x10c   : > { %v2785_v3 = vadd.f32 %v2225_v2, %v2224_v1  ;;  %v2227_v4 = vpop.f32.mrb[10].mxu1  ;;  %v2154_v9 = vadd.f32 %v2153_v8, %v2152_v6  ;;  %v2155_v10 = vpop.f32.mrb[10].mxu0 }
 0x10d   : > { %v2228_v5 = vpop.f32.mrb[11].mxu1  ;;  %v2156_v11 = vpop.f32.mrb[11].mxu0 }
 0x10e   : > { %v2787_v7 = vadd.f32 %v2228_v5, %v2227_v4  ;;  %v2789_v12 = vadd.f32 %v2156_v11, %v2155_v10 }
 0x112   : > { %v2230_v13 = vpop.f32.mrb[12].mxu1  ;;  %v2158_v18 = vpop.f32.mrb[12].mxu0 }
 0x113   : > { %v2231_v14 = vpop.f32.mrb[13].mxu1  ;;  %v2159_v20 = vpop.f32.mrb[13].mxu0 }
 0x114   : > { %v2791_v15 = vadd.f32 %v2231_v14, %v2230_v13  ;;  %v2233_v16 = vpop.f32.mrb[14].mxu1  ;;  %v2795_v21 = vadd.f32 %v2159_v20, %v2158_v18  ;;  %v2161_v22 = vpop.f32.mrb[14].mxu0 }
 0x115   : > { %v2234_v17 = vpop.f32.mrb[15].mxu1  ;;  %v2162_v23 = vpop.f32.mrb[15].mxu0 }
 0x116   : > { %v2793_v19 = vadd.f32 %v2234_v17, %v2233_v16  ;;  %v2799_v25 = vadd.f32 %v2162_v23, %v2161_v22  ;;  %v2822_v23 = vpop.permute.xlu0 %1182 }
 0x11a   : > { %v2252_v26 = vpop.f32.mrb[16].mxu1  ;;  %v2164_v31 = vpop.f32.mrb[16].mxu0 }
 0x11b   : > { %v2253_v27 = vpop.f32.mrb[17].mxu1  ;;  %v2165_v34 = vpop.f32.mrb[17].mxu0 }
 0x11c   : > { %v2254_v28 = vadd.f32 %v2253_v27, %v2252_v26  ;;  %v2255_v29 = vpop.f32.mrb[18].mxu1  ;;  %v2803_v36 = vadd.f32 %v2165_v34, %v2164_v31  ;;  %v2167_v37 = vpop.f32.mrb[18].mxu0 }
 0x11d   : > { %v2256_v30 = vpop.f32.mrb[19].mxu1  ;;  %v2168_v39 = vpop.f32.mrb[19].mxu0 }
 0x11e   : > { %v903_v32 = vadd.f32 %v2254_v28, %v2142_v49  ;;  %v2257_v33 = vadd.f32 %v2256_v30, %v2255_v29  ;;  %v2805_v40 = vadd.f32 %v2168_v39, %v2167_v37  ;;  %v2824_v26 = vpop.permute.xlu1 %1187 }
 0x120   : > { %v906_v38 = vadd.f32 %v2257_v33, %v2145_v52  ;;  %v1320_v41 = vmul.f32 %v2797_v24, %v903_v32 }
 0x122   : > { %v1321_v42 = vmul.f32 %v2801_v35, %v906_v38  ;;  %v2258_v44 = vpop.f32.mrb[20].mxu1  ;;  %v2170_v53 = vpop.f32.mrb[20].mxu0 }
 0x123   : > { %v2259_v46 = vpop.f32.mrb[21].mxu1  ;;  %v2171_v52 = vpop.f32.mrb[21].mxu0 }
 0x124   : > { %v1352_v48 = vpack.c.bf16 %v1321_v42, %v1320_v41  ;;  %v2260_v49 = vadd.f32 %v2259_v46, %v2258_v44  ;;  %v2261_v50 = vpop.f32.mrb[22].mxu1  ;;  %v2811_v57 = vadd.f32 %v2171_v52, %v2170_v53  ;;  %v2173_v58 = vpop.f32.mrb[22].mxu0 }
 0x125   : > { %v2262_v51 = vpop.f32.mrb[23].mxu1  ;;  %v2174_v62 = vpop.f32.mrb[23].mxu0 }
 0x126   : > { %v911_v54 = vadd.f32 %v2260_v49, %v2148_v61  ;;  %v2263_v56 = vadd.f32 %v2262_v51, %v2261_v50  ;;  %2388 = vmatprep.mubr.bf16.mxu0 %v1352_v48  ;;  %v2815_v1 = vadd.f32 %v2174_v62, %v2173_v58  ;;  %v2834_v48 = vpop.permute.xlu0 %1192  ;;  %v2836_v49 = vpop.permute.xlu1 %1197 }
 0x128   : > { %v914_v60 = vadd.f32 %v2263_v56, %v2151_v0  ;;  %v1322_v2 = vmul.f32 %v2809_v45, %v911_v54 }
 0x12a   : > { %v1323_v4 = vmul.f32 %v2813_v63, %v914_v60  ;;  %v2264_v5 = vpop.f32.mrb[24].mxu1  ;;  %v2176_v13 = vpop.f32.mrb[24].mxu0 }
 0x12b   : > { %v2265_v6 = vpop.f32.mrb[25].mxu1  ;;  %v2177_v0 = vpop.f32.mrb[25].mxu0 }
 0x12c   : > { %v1353_v8 = vpack.c.bf16 %v1323_v4, %v1322_v2  ;;  %v2266_v61 = vadd.f32 %v2265_v6, %v2264_v5  ;;  %v2267_v10 = vpop.f32.mrb[26].mxu1  ;;  %v2819_v17 = vadd.f32 %v2177_v0, %v2176_v13  ;;  %v2179_v18 = vpop.f32.mrb[26].mxu0 }
 0x12d   : > { %v2268_v11 = vpop.f32.mrb[27].mxu1  ;;  %v2180_v22 = vpop.f32.mrb[27].mxu0 }
 0x12e   : > { %v919_v14 = vadd.f32 %v2266_v61, %v2154_v9  ;;  %v2269_v16 = vadd.f32 %v2268_v11, %v2267_v10  ;;  %2389 = vmatmul.mubr.bf16.vlgmr.msra.gmra.mrb[48].mxu0 %v1353_v8  ;;  %v2826_v27 = vadd.f32 %v2180_v22, %v2179_v18  ;;  %v2846_v10 = vpop.permute.xlu0 %1202  ;;  %v2848_v11 = vpop.permute.xlu1 %1207 }
 0x130   : > { %v922_v20 = vadd.f32 %v2269_v16, %v2789_v12  ;;  %v1324_v28 = vmul.f32 %v2822_v23, %v919_v14 }
 0x132   : > { %v1325_v29 = vmul.f32 %v2824_v26, %v922_v20  ;;  %v2270_v9 = vpop.f32.mrb[28].mxu1  ;;  %v2182_v37 = vpop.f32.mrb[28].mxu0 }
 0x133   : > { %v2271_v30 = vpop.f32.mrb[29].mxu1  ;;  %v2183_v39 = vpop.f32.mrb[29].mxu0 }
 0x134   : > { %v2272_v31 = vadd.f32 %v2271_v30, %v2270_v9  ;;  %v2273_v32 = vpop.f32.mrb[30].mxu1  ;;  %v1354_v33 = vpack.c.bf16 %v1325_v29, %v1324_v28  ;;  %v2831_v41 = vadd.f32 %v2183_v39, %v2182_v37  ;;  %v2185_v42 = vpop.f32.mrb[30].mxu0 }
 0x135   : > { %v2274_v34 = vpop.f32.mrb[31].mxu1  ;;  %v2186_v46 = vpop.f32.mrb[31].mxu0 }
 0x136   : > { %v927_v12 = vadd.f32 %v2272_v31, %v2795_v21  ;;  %v2275_v38 = vadd.f32 %v2274_v34, %v2273_v32  ;;  %2392 = vmatprep.mubr.bf16.mxu0 %v1354_v33  ;;  %v2838_v50 = vadd.f32 %v2186_v46, %v2185_v42  ;;  %v2858_v37 = vpop.permute.xlu0 %1212 }
 0x138   : > { %v930_v44 = vadd.f32 %v2275_v38, %v2799_v25  ;;  %v1326_v51 = vmul.f32 %v2834_v48, %v927_v12  ;;  %v2860_v12 = vpop.permute.xlu1 %1217 }
 0x13a   : > { %v1327_v53 = vmul.f32 %v2836_v49, %v930_v44  ;;  %v2276_v21 = vpop.f32.mrb[32].mxu1  ;;  %v2188_v62 = vpop.f32.mrb[32].mxu0 }
 0x13b   : > { %v2277_v54 = vpop.f32.mrb[33].mxu1  ;;  %v2189_v4 = vpop.f32.mrb[33].mxu0 }
 0x13c   : > { %v2278_v56 = vadd.f32 %v2277_v54, %v2276_v21  ;;  %v2279_v52 = vpop.f32.mrb[34].mxu1  ;;  %v1355_v58 = vpack.c.bf16 %v1327_v53, %v1326_v51  ;;  %v2843_v5 = vadd.f32 %v2189_v4, %v2188_v62  ;;  %v2191_v6 = vpop.f32.mrb[34].mxu0 }
 0x13d   : > { %v2280_v60 = vpop.f32.mrb[35].mxu1  ;;  %v2192_v61 = vpop.f32.mrb[35].mxu0 }
 0x13e   : > { %v935_v25 = vadd.f32 %v2278_v56, %v2803_v36  ;;  %v2281_v2 = vadd.f32 %v2280_v60, %v2279_v52  ;;  %2393 = vmatmul.mubr.bf16.gmra.mrb[52].mxu0 %v1355_v58  ;;  %v2850_v13 = vadd.f32 %v2192_v61, %v2191_v6  ;;  %v2872_v4 = vpop.permute.xlu1 %1227 }
 0x140   : > { %v938_v8 = vadd.f32 %v2281_v2, %v2805_v40  ;;  %v1328_v14 = vmul.f32 %v2846_v10, %v935_v25  ;;  %v2870_v2 = vpop.permute.xlu0 %1222 }
 0x142   : > { %v1329_v16 = vmul.f32 %v2848_v11, %v938_v8  ;;  %v2282_v36 = vpop.f32.mrb[36].mxu1  ;;  %v2194_v29 = vpop.f32.mrb[36].mxu0 }
 0x143   : > { %v2283_v0 = vpop.f32.mrb[37].mxu1  ;;  %v2195_v30 = vpop.f32.mrb[37].mxu0 }
 0x144   : > { %v2284_v18 = vadd.f32 %v2283_v0, %v2282_v36  ;;  %v2285_v20 = vpop.f32.mrb[38].mxu1  ;;  %v1356_v22 = vpack.c.bf16 %v1329_v16, %v1328_v14  ;;  %v2855_v31 = vadd.f32 %v2195_v30, %v2194_v29  ;;  %v2197_v32 = vpop.f32.mrb[38].mxu0 }
 0x145   : > { %v2286_v28 = vpop.f32.mrb[39].mxu1  ;;  %v2198_v34 = vpop.f32.mrb[39].mxu0 }
 0x146   : > { %v943_v40 = vadd.f32 %v2284_v18, %v2811_v57  ;;  %v2287_v9 = vadd.f32 %v2286_v28, %v2285_v20  ;;  %2396 = vmatprep.mubr.bf16.mxu0 %v1356_v22  ;;  %v2862_v38 = vadd.f32 %v2198_v34, %v2197_v32  ;;  %v2878_v32 = vpop.permute.xlu0 %1232 }
 0x148   : > { %v946_v33 = vadd.f32 %v2287_v9, %v2815_v1  ;;  %v1330_v39 = vmul.f32 %v2858_v37, %v943_v40 }
 0x14a   : > { %v1331_v42 = vmul.f32 %v2860_v12, %v946_v33  ;;  %v2288_v57 = vpop.f32.mrb[40].mxu1  ;;  %v2200_v54 = vpop.f32.mrb[40].mxu0 }
 0x14b   : > { %v2289_v44 = vpop.f32.mrb[41].mxu1  ;;  %v2201_v52 = vpop.f32.mrb[41].mxu0 }
 0x14c   : > { %v2290_v46 = vadd.f32 %v2289_v44, %v2288_v57  ;;  %v2291_v51 = vpop.f32.mrb[42].mxu1  ;;  %v1357_v53 = vpack.c.bf16 %v1331_v42, %v1330_v39  ;;  %v2867_v58 = vadd.f32 %v2201_v52, %v2200_v54  ;;  %v2203_v60 = vpop.f32.mrb[42].mxu0 }
 0x14d   : > { %v2292_v21 = vpop.f32.mrb[43].mxu1  ;;  %v2204_v25 = vpop.f32.mrb[43].mxu0 }
 0x14e   : > { %v951_v1 = vadd.f32 %v2290_v46, %v2819_v17  ;;  %v2293_v56 = vadd.f32 %v2292_v21, %v2291_v51  ;;  %2397 = vmatmul.mubr.bf16.gmra.mrb[56].mxu0 %v1357_v53  ;;  %v2205_v6 = vadd.f32 %v2204_v25, %v2203_v60  ;;  %v2880_v33 = vpop.permute.xlu1 %1237 }
 0x150   : > { %v954_v62 = vadd.f32 %v2293_v56, %v2826_v27  ;;  %v1332_v8 = vmul.f32 %v2870_v2, %v951_v1  ;;  %v2886_v1 = vpop.permute.xlu0 %1242 }
 0x152   : > { %v1333_v61 = vmul.f32 %v2872_v4, %v954_v62  ;;  %v2294_v14 = vpop.f32.mrb[44].mxu1  ;;  %v2206_v20 = vpop.f32.mrb[44].mxu0 }
 0x153   : > { %v2295_v17 = vpop.f32.mrb[45].mxu1  ;;  %v2207_v28 = vpop.f32.mrb[45].mxu0 }
 0x154   : > { %v2296_v16 = vadd.f32 %v2295_v17, %v2294_v14  ;;  %v2297_v36 = vpop.f32.mrb[46].mxu1  ;;  %v1358_v0 = vpack.c.bf16 %v1333_v61, %v1332_v8  ;;  %v2208_v29 = vadd.f32 %v2207_v28, %v2206_v20  ;;  %v2209_v40 = vpop.f32.mrb[46].mxu0 }
 0x155   : > { %v2298_v18 = vpop.f32.mrb[47].mxu1  ;;  %v2210_v30 = vpop.f32.mrb[47].mxu0 }
 0x156   : > { %v959_v22 = vadd.f32 %v2296_v16, %v2831_v41  ;;  %v2299_v27 = vadd.f32 %v2298_v18, %v2297_v36  ;;  %2400 = vmatprep.mubr.bf16.mxu0 %v1358_v0  ;;  %v2211_v34 = vadd.f32 %v2210_v30, %v2209_v40  ;;  %v2888_v56 = vpop.permute.xlu1 %1247  ;;  %v2894_v36 = vpop.permute.xlu0 %1252 }
 0x158   : > { %v962_v9 = vadd.f32 %v2299_v27, %v2838_v50  ;;  %v1334_v39 = vmul.f32 %v2878_v32, %v959_v22 }
 0x15a   : > { %v1335_v42 = vmul.f32 %v2880_v33, %v962_v9  ;;  %v2300_v57 = vpop.f32.mrb[48].mxu1  ;;  %v2896_v0 = vpop.permute.xlu1 %1257 }
 0x15b   : > { %v2301_v44 = vpop.f32.mrb[49].mxu1 }
 0x15c   : > { %v2302_v41 = vadd.f32 %v2301_v44, %v2300_v57  ;;  %v2303_v46 = vpop.f32.mrb[50].mxu1  ;;  %v1359_v51 = vpack.c.bf16 %v1335_v42, %v1334_v39 }
 0x15d   : > { %v2304_v53 = vpop.f32.mrb[51].mxu1 }
 0x15e   : > { %v967_v21 = vadd.f32 %v2302_v41, %v2843_v5  ;;  %v2305_v54 = vadd.f32 %v2304_v53, %v2303_v46  ;;  %2401 = vmatmul.mubr.bf16.gmra.mrb[60].mxu0 %v1359_v51  ;;  %v2903_v57 = vpop.permute.xlu1 %1267 }
 0x160   : > { %v970_v50 = vadd.f32 %v2305_v54, %v2850_v13  ;;  %v1336_v52 = vmul.f32 %v2886_v1, %v967_v21 }
 0x162   : > { %v1337_v60 = vmul.f32 %v2888_v56, %v970_v50  ;;  %v2306_v62 = vpop.f32.mrb[52].mxu1 }
 0x163   : > { %v2307_v25 = vpop.f32.mrb[53].mxu1 }
 0x164   : > { %v2308_v8 = vadd.f32 %v2307_v25, %v2306_v62  ;;  %v2309_v61 = vpop.f32.mrb[54].mxu1  ;;  %v1360_v14 = vpack.c.bf16 %v1337_v60, %v1336_v52 }
 0x165   : > { %v2310_v17 = vpop.f32.mrb[55].mxu1 }
 0x166   : > { %v975_v5 = vadd.f32 %v2308_v8, %v2855_v31  ;;  %v2311_v16 = vadd.f32 %v2310_v17, %v2309_v61  ;;  %2404 = vmatprep.mubr.bf16.mxu0 %v1360_v14 }
 0x168   : > { %v978_v13 = vadd.f32 %v2311_v16, %v2862_v38  ;;  %v1338_v18 = vmul.f32 %v2894_v36, %v975_v5  ;;  %v2901_v38 = vpop.permute.xlu0 %1262 }
 0x16a   : > { %v1339_v20 = vmul.f32 %v2896_v0, %v978_v13  ;;  %v2312_v22 = vpop.f32.mrb[56].mxu1 }
 0x16b   : > { %v2313_v27 = vpop.f32.mrb[57].mxu1 }
 0x16c   : > { %v2314_v28 = vadd.f32 %v2313_v27, %v2312_v22  ;;  %v2315_v40 = vpop.f32.mrb[58].mxu1  ;;  %v1361_v9 = vpack.c.bf16 %v1339_v20, %v1338_v18  ;;  %v2907_v62 = vpop.permute.xlu0 %1272 }
 0x16d   : > { %v2316_v30 = vpop.f32.mrb[59].mxu1 }
 0x16e   : > { %v983_v31 = vadd.f32 %v2314_v28, %v2867_v58  ;;  %v2317_v39 = vadd.f32 %v2316_v30, %v2315_v40  ;;  %2405 = vmatmul.mubr.bf16.gmra.mrb[64].mxu0 %v1361_v9 }
 0x170   : > { %v986_v42 = vadd.f32 %v2317_v39, %v2205_v6  ;;  %v1340_v44 = vmul.f32 %v2901_v38, %v983_v31  ;;  %v2909_v6 = vpop.permute.xlu1 %1277  ;;  %v2915_v20 = vpop.permute.xlu0 %1282 }
 0x172   : > { %v1341_v41 = vmul.f32 %v2903_v57, %v986_v42  ;;  %v2318_v46 = vpop.f32.mrb[60].mxu1 }
 0x173   : > { %v2319_v51 = vpop.f32.mrb[61].mxu1 }
 0x174   : > { %v2320_v53 = vadd.f32 %v2319_v51, %v2318_v46  ;;  %v2321_v21 = vpop.f32.mrb[62].mxu1  ;;  %v1362_v54 = vpack.c.bf16 %v1341_v41, %v1340_v44  ;;  %v2917_v22 = vpop.permute.xlu1 %1287 }
 0x175   : > { %v2322_v50 = vpop.f32.mrb[63].mxu1  ;;  %v2923_v41 = vpop.permute.xlu0 %1292 }
 0x176   : > { %v991_v52 = vadd.f32 %v2320_v53, %v2208_v29  ;;  %v2323_v60 = vadd.f32 %v2322_v50, %v2321_v21  ;;  %2408 = vmatprep.mubr.bf16.mxu0 %v1362_v54 }
 0x178   : > { %v994_v58 = vadd.f32 %v2323_v60, %v2211_v34  ;;  %v1342_v25 = vmul.f32 %v2907_v62, %v991_v52  ;;  %v2925_v46 = vpop.permute.xlu1 %1297 }
 0x17a   : > { %v1343_v8 = vmul.f32 %v2909_v6, %v994_v58  ;;  %v2324_v61 = vpop.f32.mrb[64].mxu1 }
 0x17b   : > { %v2325_v14 = vpop.f32.mrb[65].mxu1 }
 0x17c   : > { %v2326_v17 = vadd.f32 %v2325_v14, %v2324_v61  ;;  %v2327_v5 = vpop.f32.mrb[66].mxu1  ;;  %v1363_v16 = vpack.c.bf16 %v1343_v8, %v1342_v25  ;;  %v2931_v8 = vpop.permute.xlu0 %1302 }
 0x17d   : > { %v2328_v13 = vpop.f32.mrb[67].mxu1  ;;  %v2933_v61 = vpop.permute.xlu1 %1307 }
 0x17e   : > { %v999_v18 = vadd.f32 %v2326_v17, %v2777_v43  ;;  %v2329_v29 = vadd.f32 %v2328_v13, %v2327_v5  ;;  %2409 = vmatmul.mubr.bf16.gmra.mrb[68].mxu0 %v1363_v16 }
 0x180   : > { %v1002_v34 = vadd.f32 %v2329_v29, %v2779_v47  ;;  %v1344_v27 = vmul.f32 %v2915_v20, %v999_v18 }
 0x182   : > { %v1345_v28 = vmul.f32 %v2917_v22, %v1002_v34  ;;  %v2330_v40 = vpop.f32.mrb[68].mxu1 }
 0x183   : > { %v2331_v9 = vpop.f32.mrb[69].mxu1 }
 0x184   : > { %v2332_v30 = vadd.f32 %v2331_v9, %v2330_v40  ;;  %v2333_v31 = vpop.f32.mrb[70].mxu1  ;;  %v1364_v39 = vpack.c.bf16 %v1345_v28, %v1344_v27  ;;  %v2939_v28 = vpop.permute.xlu0 %1312 }
 0x185   : > { %v2334_v42 = vpop.f32.mrb[71].mxu1  ;;  %v2941_v40 = vpop.permute.xlu1 %1317 }
 0x186   : > { %v1007_v43 = vadd.f32 %v2332_v30, %v2781_v55  ;;  %v2335_v44 = vadd.f32 %v2334_v42, %v2333_v31  ;;  %2412 = vmatprep.mubr.bf16.mxu0 %v1364_v39  ;;  %v2948_v39 = vld [vmem:[%s3049_s4] ss:$0 sm:$0xff] }
 0x188   : > { %v1010_v47 = vadd.f32 %v2335_v44, %v2783_v59  ;;  %v1346_v51 = vmul.f32 %v2923_v41, %v1007_v43 }
 0x18a   : > { %v1347_v53 = vmul.f32 %v2925_v46, %v1010_v47  ;;  %v2336_v21 = vpop.f32.mrb[72].mxu1 }
 0x18b   : > { %v2337_v54 = vpop.f32.mrb[73].mxu1 }
 0x18c   : > { %v2338_v50 = vadd.f32 %v2337_v54, %v2336_v21  ;;  %v2339_v52 = vpop.f32.mrb[74].mxu1  ;;  %v1365_v60 = vpack.c.bf16 %v1347_v53, %v1346_v51 }
 0x18d   : > { %v2340_v58 = vpop.f32.mrb[75].mxu1 }
 0x18e   : > { %v1015_v55 = vadd.f32 %v2338_v50, %v2785_v3  ;;  %v2341_v25 = vadd.f32 %v2340_v58, %v2339_v52  ;;  %2413 = vmatmul.mubr.bf16.gmra.mrb[72].mxu0 %v1365_v60 }
 0x190   : > { %v1018_v59 = vadd.f32 %v2341_v25, %v2787_v7  ;;  %v1348_v14 = vmul.f32 %v2931_v8, %v1015_v55 }
 0x192   : > { %v1349_v17 = vmul.f32 %v2933_v61, %v1018_v59  ;;  %v2342_v5 = vpop.f32.mrb[76].mxu1 }
 0x193   : > { %v2343_v16 = vpop.f32.mrb[77].mxu1 }
 0x194   : > { %v2344_v13 = vadd.f32 %v2343_v16, %v2342_v5  ;;  %v2345_v18 = vpop.f32.mrb[78].mxu1  ;;  %v1366_v29 = vpack.c.bf16 %v1349_v17, %v1348_v14 }
 0x195   : > { %v2346_v34 = vpop.f32.mrb[79].mxu1 }
 0x196   : > { %v1023_v3 = vadd.f32 %v2344_v13, %v2791_v15  ;;  %v2347_v27 = vadd.f32 %v2346_v34, %v2345_v18  ;;  %2416 = vmatprep.mubr.bf16.mxu0 %v1366_v29 }
 0x198   : > { %v1026_v7 = vadd.f32 %v2347_v27, %v2793_v19  ;;  %v1350_v9 = vmul.f32 %v2939_v28, %v1023_v3 }
 0x19a   : > { %v1351_v30 = vmul.f32 %v2941_v40, %v1026_v7 }
 0x19c   : > { %v1367_v31 = vpack.c.bf16 %v1351_v30, %v1350_v9 }
 0x19e   : > { %2417 = vmatmul.mubr.bf16.gmra.mrb[76].mxu0 %v1367_v31 }
 0x201   : > { %v2390_v15 = vpop.f32.mrb[48].mxu0 }
 0x202   : > { %v1482_v42 = vadd.f32 %v2390_v15, %v2948_v39  ;;  %v1473_v19 = vpop.f32.mrb[49].mxu0 }
 0x203   : > { %v1474_v43 = vadd.f32 %v2948_v39, %v1473_v19  ;;  %v2391_v44 = vpop.f32.mrb[50].mxu0 }
 0x204   : > { %v1602_v47 = vmax.f32 %v1482_v42, 0.0  ;;  %v1485_v51 = vadd.f32 %v2391_v44, %v2948_v39  ;;  %v1476_v53 = vpop.f32.mrb[51].mxu0 }
 0x205   : > { %v1600_v21 = vmax.f32 %v1474_v43, 0.0  ;;  %v1477_v54 = vadd.f32 %v2948_v39, %v1476_v53 }
 0x206   : > { %v1603_v50 = vmax.f32 %v1485_v51, 0.0  ;;  %v1634_v60 = vmul.f32 %v1602_v47, %v2809_v45 }
 0x207   : > { %v1601_v52 = vmax.f32 %v1477_v54, 0.0  ;;  %v1632_v55 = vmul.f32 %v1600_v21, %v2797_v24 }
 0x208   : > { %v1635_v58 = vmul.f32 %v1603_v50, %v2813_v63 }
 0x209   : > { %v1633_v25 = vmul.f32 %v1601_v52, %v2801_v35 }
 0x20a   : > { %v2037_v59 = vpack.c.bf16 %v1635_v58, %v1634_v60 }
 0x20b   : > { %v2032_v14 = vpack.c.bf16 %v1633_v25, %v1632_v55 }
 0x20c   : > { %2109 = vst [vmem:[%s2961_s6 + $0x8] sm:$0xff] %v2037_v59  }
 0x20d   : > { %2033 = vst [vmem:[%s2961_s6] sm:$0xff] %v2032_v14  }
 0x211   : > { %v2394_v17 = vpop.f32.mrb[52].mxu0 }
 0x212   : > { %v1498_v45 = vadd.f32 %v2394_v17, %v2948_v39  ;;  %v1489_v5 = vpop.f32.mrb[53].mxu0 }
 0x213   : > { %v1490_v24 = vadd.f32 %v2948_v39, %v1489_v5  ;;  %v2395_v63 = vpop.f32.mrb[54].mxu0 }
 0x214   : > { %v1606_v16 = vmax.f32 %v1498_v45, 0.0  ;;  %v1501_v13 = vadd.f32 %v2395_v63, %v2948_v39  ;;  %v1492_v18 = vpop.f32.mrb[55].mxu0 }
 0x215   : > { %v1604_v29 = vmax.f32 %v1490_v24, 0.0  ;;  %v1493_v35 = vadd.f32 %v2948_v39, %v1492_v18 }
 0x216   : > { %v1607_v34 = vmax.f32 %v1501_v13, 0.0  ;;  %v1638_v27 = vmul.f32 %v1606_v16, %v2834_v48 }
 0x217   : > { %v1605_v3 = vmax.f32 %v1493_v35, 0.0  ;;  %v1636_v9 = vmul.f32 %v1604_v29, %v2822_v23 }
 0x218   : > { %v1639_v7 = vmul.f32 %v1607_v34, %v2836_v49 }
 0x219   : > { %v1637_v30 = vmul.f32 %v1605_v3, %v2824_v26 }
 0x21a   : > { %v2047_v31 = vpack.c.bf16 %v1639_v7, %v1638_v27 }
 0x21b   : > { %v2042_v15 = vpack.c.bf16 %v1637_v30, %v1636_v9 }
 0x21c   : > { %2111 = vst [vmem:[%s2961_s6 + $0x18] sm:$0xff] %v2047_v31  }
 0x21d   : > { %2110 = vst [vmem:[%s2961_s6 + $0x10] sm:$0xff] %v2042_v15  }
 0x221   : > { %v2398_v42 = vpop.f32.mrb[56].mxu0 }
 0x222   : > { %v1514_v19 = vadd.f32 %v2398_v42, %v2948_v39  ;;  %v1505_v43 = vpop.f32.mrb[57].mxu0 }
 0x223   : > { %v1506_v44 = vadd.f32 %v2948_v39, %v1505_v43  ;;  %v2399_v47 = vpop.f32.mrb[58].mxu0 }
 0x224   : > { %v1610_v48 = vmax.f32 %v1514_v19, 0.0  ;;  %v1517_v49 = vadd.f32 %v2399_v47, %v2948_v39  ;;  %v1508_v51 = vpop.f32.mrb[59].mxu0 }
 0x225   : > { %v1608_v23 = vmax.f32 %v1506_v44, 0.0  ;;  %v1509_v26 = vadd.f32 %v2948_v39, %v1508_v51 }
 0x226   : > { %v1611_v53 = vmax.f32 %v1517_v49, 0.0  ;;  %v1642_v54 = vmul.f32 %v1610_v48, %v2858_v37 }
 0x227   : > { %v1609_v21 = vmax.f32 %v1509_v26, 0.0  ;;  %v1640_v52 = vmul.f32 %v1608_v23, %v2846_v10 }
 0x228   : > { %v1643_v50 = vmul.f32 %v1611_v53, %v2860_v12 }
 0x229   : > { %v1641_v60 = vmul.f32 %v1609_v21, %v2848_v11 }
 0x22a   : > { %v2057_v58 = vpack.c.bf16 %v1643_v50, %v1642_v54 }
 0x22b   : > { %v2052_v55 = vpack.c.bf16 %v1641_v60, %v1640_v52 }
 0x22c   : > { %2113 = vst [vmem:[%s2961_s6 + $0x28] sm:$0xff] %v2057_v58  }
 0x22d   : > { %2112 = vst [vmem:[%s2961_s6 + $0x20] sm:$0xff] %v2052_v55  }
 0x231   : > { %v2402_v25 = vpop.f32.mrb[60].mxu0 }
 0x232   : > { %v1530_v59 = vadd.f32 %v2402_v25, %v2948_v39  ;;  %v1521_v14 = vpop.f32.mrb[61].mxu0 }
 0x233   : > { %v1522_v17 = vadd.f32 %v2948_v39, %v1521_v14  ;;  %v2403_v45 = vpop.f32.mrb[62].mxu0 }
 0x234   : > { %v1614_v37 = vmax.f32 %v1530_v59, 0.0  ;;  %v1533_v12 = vadd.f32 %v2403_v45, %v2948_v39  ;;  %v1524_v5 = vpop.f32.mrb[63].mxu0 }
 0x235   : > { %v1612_v10 = vmax.f32 %v1522_v17, 0.0  ;;  %v1525_v11 = vadd.f32 %v2948_v39, %v1524_v5 }
 0x236   : > { %v1615_v24 = vmax.f32 %v1533_v12, 0.0  ;;  %v1646_v16 = vmul.f32 %v1614_v37, %v2878_v32 }
 0x237   : > { %v1613_v63 = vmax.f32 %v1525_v11, 0.0  ;;  %v1644_v18 = vmul.f32 %v1612_v10, %v2870_v2 }
 0x238   : > { %v1647_v13 = vmul.f32 %v1615_v24, %v2880_v33 }
 0x239   : > { %v1645_v29 = vmul.f32 %v1613_v63, %v2872_v4 }
 0x23a   : > { %v2067_v35 = vpack.c.bf16 %v1647_v13, %v1646_v16 }
 0x23b   : > { %v2062_v34 = vpack.c.bf16 %v1645_v29, %v1644_v18 }
 0x23c   : > { %2115 = vst [vmem:[%s2961_s6 + $0x38] sm:$0xff] %v2067_v35  }
 0x23d   : > { %2114 = vst [vmem:[%s2961_s6 + $0x30] sm:$0xff] %v2062_v34  }
 0x241   : > { %v2406_v3 = vpop.f32.mrb[64].mxu0 }
 0x242   : > { %v1546_v27 = vadd.f32 %v2406_v3, %v2948_v39  ;;  %v1537_v7 = vpop.f32.mrb[65].mxu0 }
 0x243   : > { %v1538_v9 = vadd.f32 %v2948_v39, %v1537_v7  ;;  %v2407_v30 = vpop.f32.mrb[66].mxu0 }
 0x244   : > { %v1618_v32 = vmax.f32 %v1546_v27, 0.0  ;;  %v1549_v33 = vadd.f32 %v2407_v30, %v2948_v39  ;;  %v1540_v31 = vpop.f32.mrb[67].mxu0 }
 0x245   : > { %v1616_v2 = vmax.f32 %v1538_v9, 0.0  ;;  %v1541_v4 = vadd.f32 %v2948_v39, %v1540_v31 }
 0x246   : > { %v1619_v15 = vmax.f32 %v1549_v33, 0.0  ;;  %v1650_v19 = vmul.f32 %v1618_v32, %v2894_v36 }
 0x247   : > { %v1617_v42 = vmax.f32 %v1541_v4, 0.0  ;;  %v1648_v44 = vmul.f32 %v1616_v2, %v2886_v1 }
 0x248   : > { %v1651_v43 = vmul.f32 %v1619_v15, %v2896_v0 }
 0x249   : > { %v1649_v47 = vmul.f32 %v1617_v42, %v2888_v56 }
 0x24a   : > { %v2077_v48 = vpack.c.bf16 %v1651_v43, %v1650_v19 }
 0x24b   : > { %v2072_v49 = vpack.c.bf16 %v1649_v47, %v1648_v44 }
 0x24c   : > { %2117 = vst [vmem:[%s2961_s6 + $0x48] sm:$0xff] %v2077_v48  }
 0x24d   : > { %2116 = vst [vmem:[%s2961_s6 + $0x40] sm:$0xff] %v2072_v49  }
 0x251   : > { %v2410_v51 = vpop.f32.mrb[68].mxu0 }
 0x252   : > { %v1562_v23 = vadd.f32 %v2410_v51, %v2948_v39  ;;  %v1553_v26 = vpop.f32.mrb[69].mxu0 }
 0x253   : > { %v1554_v53 = vadd.f32 %v2948_v39, %v1553_v26  ;;  %v2411_v21 = vpop.f32.mrb[70].mxu0 }
 0x254   : > { %v1622_v36 = vmax.f32 %v1562_v23, 0.0  ;;  %v1565_v0 = vadd.f32 %v2411_v21, %v2948_v39  ;;  %v1556_v54 = vpop.f32.mrb[71].mxu0 }
 0x255   : > { %v1620_v1 = vmax.f32 %v1554_v53, 0.0  ;;  %v1557_v56 = vadd.f32 %v2948_v39, %v1556_v54 }
 0x256   : > { %v1623_v50 = vmax.f32 %v1565_v0, 0.0  ;;  %v1654_v60 = vmul.f32 %v1622_v36, %v2907_v62 }
 0x257   : > { %v1621_v52 = vmax.f32 %v1557_v56, 0.0  ;;  %v1652_v55 = vmul.f32 %v1620_v1, %v2901_v38 }
 0x258   : > { %v1655_v58 = vmul.f32 %v1623_v50, %v2909_v6 }
 0x259   : > { %v1653_v25 = vmul.f32 %v1621_v52, %v2903_v57 }
 0x25a   : > { %v2087_v59 = vpack.c.bf16 %v1655_v58, %v1654_v60 }
 0x25b   : > { %v2082_v14 = vpack.c.bf16 %v1653_v25, %v1652_v55 }
 0x25c   : > { %2119 = vst [vmem:[%s2961_s6 + $0x58] sm:$0xff] %v2087_v59  }
 0x25d   : > { %2118 = vst [vmem:[%s2961_s6 + $0x50] sm:$0xff] %v2082_v14  }
 0x261   : > { %v2414_v17 = vpop.f32.mrb[72].mxu0 }
 0x262   : > { %v1578_v45 = vadd.f32 %v2414_v17, %v2948_v39  ;;  %v1569_v37 = vpop.f32.mrb[73].mxu0 }
 0x263   : > { %v1570_v12 = vadd.f32 %v2948_v39, %v1569_v37  ;;  %v2415_v5 = vpop.f32.mrb[74].mxu0 }
 0x264   : > { %v1626_v62 = vmax.f32 %v1578_v45, 0.0  ;;  %v1581_v6 = vadd.f32 %v2415_v5, %v2948_v39  ;;  %v1572_v10 = vpop.f32.mrb[75].mxu0 }
 0x265   : > { %v1624_v38 = vmax.f32 %v1570_v12, 0.0  ;;  %v1573_v57 = vadd.f32 %v2948_v39, %v1572_v10 }
 0x266   : > { %v1627_v11 = vmax.f32 %v1581_v6, 0.0  ;;  %v1658_v63 = vmul.f32 %v1626_v62, %v2923_v41 }
 0x267   : > { %v1625_v24 = vmax.f32 %v1573_v57, 0.0  ;;  %v1656_v13 = vmul.f32 %v1624_v38, %v2915_v20 }
 0x268   : > { %v1659_v16 = vmul.f32 %v1627_v11, %v2925_v46 }
 0x269   : > { %v1657_v18 = vmul.f32 %v1625_v24, %v2917_v22 }
 0x26a   : > { %v2097_v29 = vpack.c.bf16 %v1659_v16, %v1658_v63 }
 0x26b   : > { %v2092_v35 = vpack.c.bf16 %v1657_v18, %v1656_v13 }
 0x26c   : > { %2121 = vst [vmem:[%s2961_s6 + $0x68] sm:$0xff] %v2097_v29  }
 0x26d   : > { %2120 = vst [vmem:[%s2961_s6 + $0x60] sm:$0xff] %v2092_v35  }
 0x271   : > { %v2418_v34 = vpop.f32.mrb[76].mxu0 }
 0x272   : > { %v1594_v3 = vadd.f32 %v2418_v34, %v2948_v39  ;;  %v1585_v27 = vpop.f32.mrb[77].mxu0 }
 0x273   : > { %v1586_v7 = vadd.f32 %v2948_v39, %v1585_v27  ;;  %v2419_v9 = vpop.f32.mrb[78].mxu0 }
 0x274   : > { %v1630_v41 = vmax.f32 %v1594_v3, 0.0  ;;  %v1597_v46 = vadd.f32 %v2419_v9, %v2948_v39  ;;  %v1588_v30 = vpop.f32.mrb[79].mxu0 }
 0x275   : > { %v1628_v20 = vmax.f32 %v1586_v7, 0.0  ;;  %v1589_v22 = vadd.f32 %v2948_v39, %v1588_v30 }
 0x276   : > { %v1631_v32 = vmax.f32 %v1597_v46, 0.0  ;;  %v1662_v31 = vmul.f32 %v1630_v41, %v2939_v28 }
 0x277   : > { %v1629_v33 = vmax.f32 %v1589_v22, 0.0  ;;  %v1660_v4 = vmul.f32 %v1628_v20, %v2931_v8 }
 0x278   : > { %v1663_v2 = vmul.f32 %v1631_v32, %v2941_v40 }
 0x279   : > { %v1661_v15 = vmul.f32 %v1629_v33, %v2933_v61 }
 0x27a   : > { %v2107_v42 = vpack.c.bf16 %v1663_v2, %v1662_v31 }
 0x27b   : > { %v2102_v19 = vpack.c.bf16 %v1661_v15, %v1660_v4 }
 0x27c   : > { %2123 = vst [vmem:[%s2961_s6 + $0x78] sm:$0xff] %v2107_v42  }
 0x27d   : > { %2122 = vst [vmem:[%s2961_s6 + $0x70] sm:$0xff] %v2102_v19  }
 0x27e PF: > { %s15_s20 = sadd.s32 1, %s2525_s20   ;;  %s3051_s18 = smov %s2521_s19 }
 0x27f   : > { %p12_p6 = scmp.ge.s32.totalorder %s15_s20, 4   ;;  %s3052_s19 = smov %s3054_s21 }
 0x281   :  { %14 = sbr.rel (!%p12_p6) target bundleno = 2 (0x2), region = 82 }

// kernel: gcn_forward.6
= control target key start
LH: loop header
LB: loop body
LE: loop exit
PB: predicated region body
PF: predicated region fallthrough
CT: control target
= control target key end

     0   :  { %s2494_s18 = smov 0   ;;  %s2496_s19 = smov 0   ;;  %s2853_s0 = inlined_call_operand.vmem [shape: s8[512,512], index: 0, kind: input, shape index: {}]   ;;  %s2854_s1 = inlined_call_operand.vmem [shape: bf16[512,128], index: 1, kind: input, shape index: {}]   ;;  %s2855_s2 = inlined_call_operand.vmem [shape: f32[512,1], index: 2, kind: input, shape index: {}]   ;;  %s2856_s3 = inlined_call_operand.vmem [shape: bf16[128,128], index: 3, kind: input, shape index: {}]   ;;  %s2857_s4 = inlined_call_operand.vmem [shape: f32[1,128], index: 4, kind: input, shape index: {}]   ;;  %s2858_s5 = inlined_call_operand.vmem [shape: bf16[512,128], index: 5, kind: output, shape index: {}]  }
   0x1   :  { %s2498_s20 = smov 0  }
   0x2 LB: > { %s27_s21 = sadd.s32 1, %s2457_s19  ;;  %p1849_p0 = scmp.ge.s32.totalorder %s2461_s20, 1  ;;  %s2461_s20 = sphi %s2498_s20, %s15_s20   ;;  %s2457_s19 = sphi %s2496_s19, %s2860_s19   ;;  %s2453_s18 = sphi %s2494_s18, %s2859_s18  }
   0x3   : > { %p29_p1 = scmp.ge.s32.totalorder %s27_s21, 2  ;;  %p219_p2 = scmp.lt.s32.totalorder %s2461_s20, 3 }
   0x5   : > { %s2862_s21 = smov (%p29_p1, %s27_s21), 0  ;;  %p220_p3 = pnand %p1849_p0, %p219_p2 }
   0x6   : > { %v2399_v0 = vld [vmem:[%s2854_s1 + $0x40] sm:$0xff] (!%p220_p3)   ;;  %s1850_s24 = sshll.u32 (!%p220_p3), %s2453_s18, 3  ;;  %v2401_v2 = vld [vmem:[%s2854_s1 + $0x48] sm:$0xff] (!%p220_p3)   ;;  %v2403_v4 = vld [vmem:[%s2854_s1 + $0x50] sm:$0xff] (!%p220_p3)   ;;  %v2463_v15 = vmov (!%p220_p3), 0   ;;  %s1853_s11 = sshll.u32 (!%p220_p3), %s2453_s18, 5 }
   0x7   : > { %223 = sbr.rel (%p220_p3) target bundleno = 634 (0x27a), region = 40  ;;  %v2400_v1 = vld [vmem:[%s2854_s1] sm:$0xff] (!%p220_p3)   ;;  %2356 = vmatprep.subr.bf16.mxu1 (!%p220_p3), %v2399_v0  ;;  %p259_p4 = scmp.lt.s32.totalorder (!%p220_p3), %s1850_s24, 15  ;;  %2060 = vmatprep.subr.bf16.mxu0 (!%p220_p3), %v2399_v0  ;;  %v2402_v3 = vld [vmem:[%s2854_s1 + $0x8] sm:$0xff] (!%p220_p3)   ;;  %v2404_v5 = vld [vmem:[%s2854_s1 + $0x10] sm:$0xff] (!%p220_p3)  }
   0x8   : > { %2364 = vmatpush3.bf16.msra.mxu1 (!%p220_p3), %v2400_v1  ;;  %2061 = vmatpush3.bf16.msra.mxu0 (!%p220_p3), %v2400_v1  ;;  %v2405_v6 = vld [vmem:[%s2854_s1 + $0x58] sm:$0xff] (!%p220_p3)   ;;  %v2407_v8 = vld [vmem:[%s2854_s1 + $0x60] sm:$0xff] (!%p220_p3)   ;;  %v2409_v10 = vld [vmem:[%s2854_s1 + $0x68] sm:$0xff] (!%p220_p3)   ;;  %p270_p5 = scmp.lt.s32.totalorder (!%p220_p3), %s1853_s11, 63 }
   0x9   : > { %2357 = vmatprep.subr.bf16.mxu1 (!%p220_p3), %v2401_v2  ;;  %2062 = vmatprep.subr.bf16.mxu0 (!%p220_p3), %v2401_v2  ;;  %v2406_v7 = vld [vmem:[%s2854_s1 + $0x18] sm:$0xff] (!%p220_p3)   ;;  %v2408_v9 = vld [vmem:[%s2854_s1 + $0x20] sm:$0xff] (!%p220_p3)   ;;  %v2410_v13 = vld [vmem:[%s2854_s1 + $0x28] sm:$0xff] (!%p220_p3)  }
   0xa   : > { %v2411_v14 = vld [vmem:[%s2854_s1 + $0x70] sm:$0xff] (!%p220_p3)   ;;  %2397 = vset.pattern.permute.xlu0 (!%p220_p3), %v2463_v15  ;;  %2398 = vset.pattern.permute.xlu1 (!%p220_p3), %v2463_v15  ;;  %v2413_v17 = vld [vmem:[%s2854_s1 + $0x78] sm:$0xff] (!%p220_p3)   ;;  %v2415_v20 = vld [vmem:[%s2854_s1 + $0xc0] sm:$0xff] (!%p220_p3)  }
   0xb   : > { %v2412_v16 = vld [vmem:[%s2854_s1 + $0x30] sm:$0xff] (!%p220_p3)   ;;  %v2414_v18 = vld [vmem:[%s2854_s1 + $0x38] sm:$0xff] (!%p220_p3)   ;;  %v2416_v23 = vld [vmem:[%s2854_s1 + $0x80] sm:$0xff] (!%p220_p3)  }
   0xc   : > { %2365 = vmatpush3.bf16.msra.mxu1 (!%p220_p3), %v2402_v3  ;;  %2063 = vmatpush3.bf16.msra.mxu0 (!%p220_p3), %v2402_v3  ;;  %v2417_v24 = vld [vmem:[%s2854_s1 + $0xc8] sm:$0xff] (!%p220_p3)   ;;  %v2419_v31 = vld [vmem:[%s2854_s1 + $0xd0] sm:$0xff] (!%p220_p3)   ;;  %v2421_v37 = vld [vmem:[%s2854_s1 + $0xd8] sm:$0xff] (!%p220_p3)  }
   0xd   : > { %2358 = vmatprep.subr.bf16.mxu1 (!%p220_p3), %v2403_v4  ;;  %2064 = vmatprep.subr.bf16.mxu0 (!%p220_p3), %v2403_v4  ;;  %v2418_v29 = vld [vmem:[%s2854_s1 + $0x88] sm:$0xff] (!%p220_p3)   ;;  %v2420_v34 = vld [vmem:[%s2854_s1 + $0x90] sm:$0xff] (!%p220_p3)   ;;  %v2422_v42 = vld [vmem:[%s2854_s1 + $0x98] sm:$0xff] (!%p220_p3)  }
   0xe   : > { %s2864_s24 = smov (!%p259_p4, %s1850_s24), 15  ;;  %s2866_s11 = smov (!%p270_p5, %s1853_s11), 63  ;;  %v2423_v45 = vld [vmem:[%s2854_s1 + $0xe0] sm:$0xff]   ;;  %v2425_v49 = vld [vmem:[%s2854_s1 + $0xe8] sm:$0xff]   ;;  %v2427_v56 = vld [vmem:[%s2854_s1 + $0xf0] sm:$0xff]  }
   0xf   : > { %s1932_s12 = sshll.u32 %s2864_s24, 5  ;;  %s1854_s26 = sshll.u32 %s2866_s11, 3  ;;  %v2424_v46 = vld [vmem:[%s2854_s1 + $0xa0] sm:$0xff]   ;;  %v2426_v55 = vld [vmem:[%s2854_s1 + $0xa8] sm:$0xff]   ;;  %v2428_v62 = vld [vmem:[%s2854_s1 + $0xb0] sm:$0xff]  }
  0x10   : > { %2366 = vmatpush3.bf16.msra.mxu1 %v2404_v5  ;;  %2065 = vmatpush3.bf16.msra.mxu0 %v2404_v5  ;;  %s2545_s23 = scalar_lea.vmem %s2853_s0, %s1932_s12  ;;  %s2595_s6 = scalar_lea.vmem %s2855_s2, %s1854_s26  ;;  %v2429_v2 = vld [vmem:[%s2854_s1 + $0xf8] sm:$0xff]  }
  0x11   : > { %2359 = vmatprep.subr.bf16.mxu1 %v2405_v6  ;;  %2066 = vmatprep.subr.bf16.mxu0 %v2405_v6  ;;  %v444_v11 = vld [vmem:[%s2545_s23 + $0xc8] sm:$0xff]  ;;  %v443_v19 = vld [vmem:[%s2545_s23 + $0xc0] sm:$0xff]  ;;  %v1098_v41 = vld [vmem:[%s2595_s6 + $0x10] sm:$0xff]  ;;  %s1856_s7 = sshll.u32 %s2866_s11, 2 }
  0x12   : > { %v500_v12 = vunpack.c.l.s8.bf16 %v444_v11  ;;  %v499_v21 = vunpack.c.l.s8.bf16 %v443_v19  ;;  %v504_v22 = vunpack.c.h.s8.bf16 %v444_v11  ;;  %v420_v25 = vld [vmem:[%s2545_s23 + $0x8] sm:$0xff]  ;;  %v419_v28 = vld [vmem:[%s2545_s23] sm:$0xff]  ;;  %v503_v33 = vunpack.c.h.s8.bf16 %v443_v19  ;;  %1172 = vperm.xlu1 %2398, %v1098_v41   ;;  %v1099_v47 = vld [vmem:[%s2595_s6 + $0x18] sm:$0xff] }
  0x13   : > { %v452_v26 = vunpack.c.l.s8.bf16 %v420_v25  ;;  %v456_v27 = vunpack.c.h.s8.bf16 %v420_v25  ;;  %v451_v30 = vunpack.c.l.s8.bf16 %v419_v28  ;;  %v448_v32 = vld [vmem:[%s2545_s23 + $0xe8] sm:$0xff]  ;;  %v455_v38 = vunpack.c.h.s8.bf16 %v419_v28  ;;  %v1096_v39 = vld [vmem:[%s2595_s6] sm:$0xff]  ;;  %v422_v57 = vld [vmem:[%s2545_s23 + $0x18] sm:$0xff] }
  0x14   : > { %2367 = vmatpush3.bf16.msra.mxu1 %v2406_v7  ;;  %2067 = vmatpush3.bf16.msra.mxu0 %v2406_v7  ;;  %v508_v35 = vunpack.c.l.s8.bf16 %v448_v32  ;;  %v424_v36 = vld [vmem:[%s2545_s23 + $0x28] sm:$0xff]  ;;  %v447_v43 = vld [vmem:[%s2545_s23 + $0xe0] sm:$0xff]  ;;  %v512_v52 = vunpack.c.h.s8.bf16 %v448_v32  ;;  %v1102_v59 = vld [vmem:[%s2595_s6 + $0x30] sm:$0xff]  ;;  %v454_v63 = vunpack.c.l.s8.bf16 %v422_v57 }
  0x15   : > { %2360 = vmatprep.subr.bf16.mxu1 %v2407_v8  ;;  %2068 = vmatprep.subr.bf16.mxu0 %v2407_v8  ;;  %v460_v40 = vunpack.c.l.s8.bf16 %v424_v36  ;;  %v1097_v44 = vld [vmem:[%s2595_s6 + $0x8] sm:$0xff]  ;;  %v507_v48 = vunpack.c.l.s8.bf16 %v447_v43  ;;  %v423_v50 = vld [vmem:[%s2545_s23 + $0x20] sm:$0xff]  ;;  %v464_v58 = vunpack.c.h.s8.bf16 %v424_v36  ;;  %v1103_v60 = vld [vmem:[%s2595_s6 + $0x38] sm:$0xff]  ;;  %v511_v61 = vunpack.c.h.s8.bf16 %v447_v43 }
  0x16   : > { %835 = vmatprep.mubr.bf16.mxu1 %v500_v12  ;;  %739 = vmatprep.mubr.bf16.mxu0 %v452_v26  ;;  %v1100_v51 = vld [vmem:[%s2595_s6 + $0x20] sm:$0xff]  ;;  %v1101_v53 = vld [vmem:[%s2595_s6 + $0x28] sm:$0xff]  ;;  %v459_v54 = vunpack.c.l.s8.bf16 %v423_v50  ;;  %v463_v3 = vunpack.c.h.s8.bf16 %v423_v50  ;;  %v2430_v6 = vld [vmem:[%s2854_s1 + $0xb8] sm:$0xff]   ;;  %v458_v12 = vunpack.c.h.s8.bf16 %v422_v57 }
  0x17   : > { %1162 = vperm.xlu0 %2397, %v1096_v39   ;;  %1177 = vperm.xlu1 %2398, %v1099_v47   ;;  %v428_v0 = vld [vmem:[%s2545_s23 + $0x48] sm:$0xff]  ;;  %v1104_v1 = vld [vmem:[%s2595_s6 + $0x40] sm:$0xff]  ;;  %v421_v7 = vld [vmem:[%s2545_s23 + $0x10] sm:$0xff] }
  0x18   : > { %2368 = vmatpush3.bf16.msra.mxu1 %v2408_v9  ;;  %2069 = vmatpush3.bf16.msra.mxu0 %v2408_v9  ;;  %v1105_v4 = vld [vmem:[%s2595_s6 + $0x48] sm:$0xff]  ;;  %v468_v5 = vunpack.c.l.s8.bf16 %v428_v0  ;;  %v1106_v8 = vld [vmem:[%s2595_s6 + $0x50] sm:$0xff]  ;;  %v1107_v9 = vld [vmem:[%s2595_s6 + $0x58] sm:$0xff] }
  0x19   : > { %2361 = vmatprep.subr.bf16.mxu1 %v2409_v10  ;;  %2070 = vmatprep.subr.bf16.mxu0 %v2409_v10  ;;  %v453_v10 = vunpack.c.l.s8.bf16 %v421_v7  ;;  %v427_v11 = vld [vmem:[%s2545_s23 + $0x40] sm:$0xff]  ;;  %v1109_v15 = vld [vmem:[%s2595_s6 + $0x68] sm:$0xff]  ;;  %v1111_v19 = vld [vmem:[%s2595_s6 + $0x78] sm:$0xff] }
  0x1a   : > { %v1113_v25 = vld [vmem:[%s2595_s6 + $0x88] sm:$0xff]  ;;  %v1114_v28 = vld [vmem:[%s2595_s6 + $0x90] sm:$0xff]  ;;  %v1119_v39 = vld [vmem:[%s2595_s6 + $0xb8] sm:$0xff] }
  0x1b   : > { %1167 = vperm.xlu0 %2397, %v1097_v44   ;;  %1187 = vperm.xlu1 %2398, %v1101_v53   ;;  %v1120_v43 = vld [vmem:[%s2595_s6 + $0xc0] sm:$0xff]  ;;  %v429_v47 = vld [vmem:[%s2545_s23 + $0x50] sm:$0xff] }
  0x1c   : > { %2369 = vmatpush3.bf16.msra.mxu1 %v2410_v13  ;;  %2071 = vmatpush3.bf16.msra.mxu0 %v2410_v13  ;;  %v1108_v13 = vld [vmem:[%s2595_s6 + $0x60] sm:$0xff]  ;;  %v469_v50 = vunpack.c.l.s8.bf16 %v429_v47  ;;  %v1126_v57 = vld [vmem:[%s2595_s6 + $0xf0] sm:$0xff] }
  0x1d   : > { %2362 = vmatprep.subr.bf16.mxu1 %v2411_v14  ;;  %2072 = vmatprep.subr.bf16.mxu0 %v2411_v14  ;;  %v467_v14 = vunpack.c.l.s8.bf16 %v427_v11  ;;  %v1124_v53 = vld [vmem:[%s2595_s6 + $0xe0] sm:$0xff] }
  0x1f   : > { %1182 = vperm.xlu0 %2397, %v1100_v51   ;;  %1197 = vperm.xlu1 %2398, %v1103_v60   ;;  %v435_v51 = vld [vmem:[%s2545_s23 + $0x80] sm:$0xff]  ;;  %v473_v60 = vunpack.c.h.s8.bf16 %v429_v47 }
  0x20   : > { %2370 = vmatpush3.bf16.msra.mxu1 %v2412_v16  ;;  %2073 = vmatpush3.bf16.msra.mxu0 %v2412_v16  ;;  %v472_v16 = vunpack.c.h.s8.bf16 %v428_v0 }
  0x21   : > { %2363 = vmatprep.subr.bf16.mxu1 %v2413_v17  ;;  %2074 = vmatprep.subr.bf16.mxu0 %v2413_v17  ;;  %v1110_v17 = vld [vmem:[%s2595_s6 + $0x70] sm:$0xff] }
  0x23   : > { %1192 = vperm.xlu0 %2397, %v1102_v59   ;;  %1207 = vperm.xlu1 %2398, %v1105_v4   ;;  %v1127_v59 = vld [vmem:[%s2595_s6 + $0xf8] sm:$0xff] }
  0x24   : > { %2371 = vmatpush3.bf16.msra.mxu1 %v2414_v18  ;;  %2075 = vmatpush3.bf16.msra.mxu0 %v2414_v18  ;;  %v426_v18 = vld [vmem:[%s2545_s23 + $0x38] sm:$0xff] }
  0x25   : > { %2172 = vmatprep.subr.bf16.mxu1 %v2415_v20  ;;  %v457_v20 = vunpack.c.h.s8.bf16 %v421_v7  ;;  %v466_v32 = vunpack.c.h.s8.bf16 %v426_v18  ;;  %v438_v7 = vld [vmem:[%s2545_s23 + $0x98] sm:$0xff] }
  0x27   : > { %836 = vmatmul.mubr.bf16.vlgmr.msra.gmra.mrb[0].mxu1 %v499_v21  ;;  %740 = vmatmul.mubr.bf16.vlgmr.msra.gmra.mrb[0].mxu0 %v451_v30  ;;  %v462_v21 = vunpack.c.l.s8.bf16 %v426_v18  ;;  %v441_v18 = vld [vmem:[%s2545_s23 + $0xb0] sm:$0xff] }
  0x28   : > { %2173 = vmatpush3.bf16.msra.mxu1 %v2416_v23  ;;  %843 = vmatprep.mubr.bf16.mxu1 %v504_v22  ;;  %v432_v22 = vld [vmem:[%s2545_s23 + $0x68] sm:$0xff]  ;;  %v1112_v23 = vld [vmem:[%s2595_s6 + $0x80] sm:$0xff] }
  0x29   : > { %2174 = vmatprep.subr.bf16.mxu1 %v2417_v24  ;;  %747 = vmatprep.mubr.bf16.mxu0 %v456_v27  ;;  %v471_v24 = vunpack.c.h.s8.bf16 %v427_v11  ;;  %v476_v26 = vunpack.c.l.s8.bf16 %v432_v22  ;;  %v425_v27 = vld [vmem:[%s2545_s23 + $0x30] sm:$0xff]  ;;  %v480_v36 = vunpack.c.h.s8.bf16 %v432_v22 }
  0x2a   : > { %1202 = vperm.xlu0 %2397, %v1104_v1   ;;  %1217 = vperm.xlu1 %2398, %v1107_v9   ;;  %v461_v30 = vunpack.c.l.s8.bf16 %v425_v27  ;;  %v433_v1 = vld [vmem:[%s2545_s23 + $0x70] sm:$0xff]  ;;  %v486_v9 = vunpack.c.l.s8.bf16 %v438_v7 }
  0x2b   : > { %v437_v11 = vld [vmem:[%s2545_s23 + $0x90] sm:$0xff] }
  0x2c   : > { %2175 = vmatpush3.bf16.msra.mxu1 %v2418_v29  ;;  %v1115_v29 = vld [vmem:[%s2595_s6 + $0x98] sm:$0xff]  ;;  %v2433_v22 = vld [vmem:[%s2856_s3 + $0x10] sm:$0xff]  }
  0x2d   : > { %2176 = vmatprep.subr.bf16.mxu1 %v2419_v31  ;;  %v431_v31 = vld [vmem:[%s2545_s23 + $0x60] sm:$0xff] }
  0x2e   : > { %1212 = vperm.xlu0 %2397, %v1106_v8   ;;  %1227 = vperm.xlu1 %2398, %v1109_v15   ;;  %v479_v44 = vunpack.c.h.s8.bf16 %v431_v31  ;;  %v481_v8 = vunpack.c.h.s8.bf16 %v433_v1  ;;  %v442_v15 = vld [vmem:[%s2545_s23 + $0xb8] sm:$0xff] }
  0x2f   : > { %844 = vmatmul.mubr.bf16.gmra.mrb[4].mxu1 %v503_v33  ;;  %748 = vmatmul.mubr.bf16.gmra.mrb[4].mxu0 %v455_v38  ;;  %v1116_v33 = vld [vmem:[%s2595_s6 + $0xa0] sm:$0xff]  ;;  %v430_v38 = vld [vmem:[%s2545_s23 + $0x58] sm:$0xff] }
  0x30   : > { %2177 = vmatpush3.bf16.msra.mxu1 %v2420_v34  ;;  %851 = vmatprep.mubr.bf16.mxu1 %v508_v35  ;;  %v475_v34 = vunpack.c.l.s8.bf16 %v431_v31  ;;  %v1117_v35 = vld [vmem:[%s2595_s6 + $0xa8] sm:$0xff]  ;;  %v470_v41 = vunpack.c.l.s8.bf16 %v430_v38 }
  0x31   : > { %2178 = vmatprep.subr.bf16.mxu1 %v2421_v37  ;;  %755 = vmatprep.mubr.bf16.mxu0 %v460_v40  ;;  %v1118_v37 = vld [vmem:[%s2595_s6 + $0xb0] sm:$0xff]  ;;  %v465_v40 = vunpack.c.h.s8.bf16 %v425_v27  ;;  %v2435_v27 = vld [vmem:[%s2856_s3 + $0x20] sm:$0xff]  }
  0x32   : > { %1222 = vperm.xlu0 %2397, %v1108_v13   ;;  %1237 = vperm.xlu1 %2398, %v1111_v19   ;;  %v490_v13 = vunpack.c.h.s8.bf16 %v438_v7  ;;  %v2432_v19 = vld [vmem:[%s2856_s3 + $0x8] sm:$0xff]  }
  0x34   : > { %2179 = vmatpush3.bf16.msra.mxu1 %v2422_v42  ;;  %v436_v42 = vld [vmem:[%s2545_s23 + $0x88] sm:$0xff] }
  0x35   : > { %2180 = vmatprep.subr.bf16.mxu1 %v2423_v45  ;;  %v1121_v45 = vld [vmem:[%s2595_s6 + $0xc8] sm:$0xff] }
  0x36   : > { %1232 = vperm.xlu0 %2397, %v1110_v17   ;;  %1247 = vperm.xlu1 %2398, %v1113_v25   ;;  %v494_v17 = vunpack.c.l.s8.bf16 %v442_v15  ;;  %v497_v25 = vunpack.c.h.s8.bf16 %v441_v18 }
  0x37   : > { %852 = vmatmul.mubr.bf16.gmra.mrb[8].mxu1 %v507_v48  ;;  %756 = vmatmul.mubr.bf16.gmra.mrb[8].mxu0 %v459_v54  ;;  %v1122_v48 = vld [vmem:[%s2595_s6 + $0xd0] sm:$0xff]  ;;  %v483_v54 = vunpack.c.l.s8.bf16 %v435_v51 }
  0x38   : > { %2181 = vmatpush3.bf16.msra.mxu1 %v2424_v46  ;;  %859 = vmatprep.mubr.bf16.mxu1 %v512_v52  ;;  %v484_v46 = vunpack.c.l.s8.bf16 %v436_v42  ;;  %v474_v52 = vunpack.c.h.s8.bf16 %v430_v38 }
  0x39   : > { %2182 = vmatprep.subr.bf16.mxu1 %v2425_v49  ;;  %763 = vmatprep.mubr.bf16.mxu0 %v464_v58  ;;  %v1123_v49 = vld [vmem:[%s2595_s6 + $0xd8] sm:$0xff] }
  0x3a   : > { %1242 = vperm.xlu0 %2397, %v1112_v23   ;;  %1257 = vperm.xlu1 %2398, %v1115_v29   ;;  %v434_v58 = vld [vmem:[%s2545_s23 + $0x78] sm:$0xff]  ;;  %v2436_v29 = vld [vmem:[%s2856_s3 + $0x28] sm:$0xff]  }
  0x3b   : > { %v482_v4 = vunpack.c.h.s8.bf16 %v434_v58  ;;  %v2434_v23 = vld [vmem:[%s2856_s3 + $0x18] sm:$0xff]  }
  0x3c   : > { %2183 = vmatpush3.bf16.msra.mxu1 %v2426_v55  ;;  %v1125_v55 = vld [vmem:[%s2595_s6 + $0xe8] sm:$0xff]  ;;  %s2797_s6 = scalar_lea.vmem %s2858_s5, %s1856_s7 }
  0x3d   : > { %2184 = vmatprep.subr.bf16.mxu1 %v2427_v56  ;;  %v488_v56 = vunpack.c.h.s8.bf16 %v436_v42 }
  0x3e   : > { %1252 = vperm.xlu0 %2397, %v1114_v28   ;;  %1267 = vperm.xlu1 %2398, %v1117_v35   ;;  %v445_v28 = vld [vmem:[%s2545_s23 + $0xd0] sm:$0xff] }
  0x3f   : > { %860 = vmatmul.mubr.bf16.gmra.mrb[12].mxu1 %v511_v61  ;;  %764 = vmatmul.mubr.bf16.gmra.mrb[12].mxu0 %v463_v3  ;;  %v478_v61 = vunpack.c.l.s8.bf16 %v434_v58  ;;  %v439_v3 = vld [vmem:[%s2545_s23 + $0xa0] sm:$0xff]  ;;  %v505_v35 = vunpack.c.h.s8.bf16 %v445_v28 }
  0x40   : > { %2185 = vmatpush3.bf16.msra.mxu1 %v2428_v62  ;;  %900 = vmatprep.mubr.bf16.mxu1 %v454_v63  ;;  %v440_v62 = vld [vmem:[%s2545_s23 + $0xa8] sm:$0xff]  ;;  %v487_v63 = vunpack.c.h.s8.bf16 %v435_v51 }
  0x41   : > { %2186 = vmatprep.subr.bf16.mxu1 %v2429_v2  ;;  %771 = vmatprep.mubr.bf16.mxu0 %v468_v5  ;;  %v492_v0 = vunpack.c.l.s8.bf16 %v440_v62  ;;  %v477_v2 = vunpack.c.l.s8.bf16 %v433_v1  ;;  %v491_v5 = vunpack.c.l.s8.bf16 %v439_v3 }
  0x42   : > { %1262 = vperm.xlu0 %2397, %v1116_v33   ;;  %1277 = vperm.xlu1 %2398, %v1119_v39   ;;  %v2438_v33 = vld [vmem:[%s2856_s3 + $0x38] sm:$0xff]  }
  0x44   : > { %2187 = vmatpush3.bf16.msra.mxu1 %v2430_v6  ;;  %v496_v6 = vunpack.c.h.s8.bf16 %v440_v62 }
  0x46   : > { %1272 = vperm.xlu0 %2397, %v1118_v37   ;;  %1287 = vperm.xlu1 %2398, %v1121_v45   ;;  %v449_v37 = vld [vmem:[%s2545_s23 + $0xf0] sm:$0xff] }
  0x47   : > { %901 = vmatmul.mubr.bf16.vlgmr.msra.gmra.mrb[16].mxu1 %v453_v10  ;;  %772 = vmatmul.mubr.bf16.gmra.mrb[16].mxu0 %v467_v14  ;;  %v495_v10 = vunpack.c.h.s8.bf16 %v439_v3  ;;  %v2431_v14 = vld [vmem:[%s2856_s3] sm:$0xff]   ;;  %v509_v38 = vunpack.c.l.s8.bf16 %v449_v37 }
  0x48   : > { %908 = vmatprep.mubr.bf16.mxu1 %v458_v12  ;;  %779 = vmatprep.mubr.bf16.mxu0 %v472_v16  ;;  %v485_v12 = vunpack.c.l.s8.bf16 %v437_v11  ;;  %v489_v16 = vunpack.c.h.s8.bf16 %v437_v11 }
  0x49   : > { %2308 = vmatprep.subr.bf16.mxu0 %v2431_v14 }
  0x4a   : > { %1282 = vperm.xlu0 %2397, %v1120_v43   ;;  %1297 = vperm.xlu1 %2398, %v1123_v49  }
  0x4b   : > { %2309 = vmatpush3.bf16.msra.mxu0 %v2431_v14 }
  0x4c   : > { %2310 = vmatprep.subr.bf16.mxu0 %v2432_v19 }
  0x4e   : > { %1292 = vperm.xlu0 %2397, %v1122_v48   ;;  %1307 = vperm.xlu1 %2398, %v1125_v55  }
  0x4f   : > { %909 = vmatmul.mubr.bf16.gmra.mrb[20].mxu1 %v457_v20  ;;  %780 = vmatmul.mubr.bf16.gmra.mrb[20].mxu0 %v471_v24  ;;  %v493_v20 = vunpack.c.l.s8.bf16 %v441_v18  ;;  %v446_v24 = vld [vmem:[%s2545_s23 + $0xd8] sm:$0xff] }
  0x50   : > { %916 = vmatprep.mubr.bf16.mxu1 %v462_v21  ;;  %787 = vmatprep.mubr.bf16.mxu0 %v476_v26  ;;  %v498_v21 = vunpack.c.h.s8.bf16 %v442_v15  ;;  %v502_v26 = vunpack.c.l.s8.bf16 %v446_v24  ;;  %v506_v31 = vunpack.c.h.s8.bf16 %v446_v24 }
  0x51   : > { %2311 = vmatpush3.bf16.msra.mxu0 %v2432_v19 }
  0x52   : > { %1302 = vperm.xlu0 %2397, %v1124_v53   ;;  %1317 = vperm.xlu1 %2398, %v1127_v59  }
  0x53   : > { %2312 = vmatprep.subr.bf16.mxu0 %v2433_v22 }
  0x55   : > { %2313 = vmatpush3.bf16.msra.mxu0 %v2433_v22 }
  0x56   : > { %1312 = vperm.xlu0 %2397, %v1126_v57   ;;  %2314 = vmatprep.subr.bf16.mxu0 %v2434_v23 }
  0x57   : > { %917 = vmatmul.mubr.bf16.gmra.mrb[24].mxu1 %v461_v30  ;;  %788 = vmatmul.mubr.bf16.gmra.mrb[24].mxu0 %v475_v34  ;;  %v501_v30 = vunpack.c.l.s8.bf16 %v445_v28  ;;  %v450_v34 = vld [vmem:[%s2545_s23 + $0xf8] sm:$0xff] }
  0x58   : > { %924 = vmatprep.mubr.bf16.mxu1 %v466_v32  ;;  %795 = vmatprep.mubr.bf16.mxu0 %v480_v36  ;;  %v2437_v32 = vld [vmem:[%s2856_s3 + $0x30] sm:$0xff]   ;;  %v510_v36 = vunpack.c.l.s8.bf16 %v450_v34  ;;  %v514_v39 = vunpack.c.h.s8.bf16 %v450_v34 }
  0x59   : > { %2315 = vmatpush3.bf16.msra.mxu0 %v2434_v23 }
  0x5a   : > { %2316 = vmatprep.subr.bf16.mxu0 %v2435_v27 }
  0x5d   : > { %2317 = vmatpush3.bf16.msra.mxu0 %v2435_v27 }
  0x5e   : > { %2318 = vmatprep.subr.bf16.mxu0 %v2436_v29 }
  0x5f   : > { %925 = vmatmul.mubr.bf16.gmra.mrb[28].mxu1 %v465_v40  ;;  %796 = vmatmul.mubr.bf16.gmra.mrb[28].mxu0 %v479_v44  ;;  %v513_v40 = vunpack.c.h.s8.bf16 %v449_v37 }
  0x60   : > { %932 = vmatprep.mubr.bf16.mxu1 %v470_v41  ;;  %803 = vmatprep.mubr.bf16.mxu0 %v484_v46 }
  0x61   : > { %2319 = vmatpush3.bf16.msra.mxu0 %v2436_v29 }
  0x62   : > { %2320 = vmatprep.subr.bf16.mxu0 %v2437_v32 }
  0x65   : > { %2321 = vmatpush3.bf16.msra.mxu0 %v2437_v32 }
  0x66   : > { %2322 = vmatprep.subr.bf16.mxu0 %v2438_v33 }
  0x67   : > { %933 = vmatmul.mubr.bf16.gmra.mrb[32].mxu1 %v469_v50  ;;  %804 = vmatmul.mubr.bf16.gmra.mrb[32].mxu0 %v483_v54 }
  0x68   : > { %940 = vmatprep.mubr.bf16.mxu1 %v474_v52  ;;  %811 = vmatprep.mubr.bf16.mxu0 %v488_v56 }
  0x69   : > { %2323 = vmatpush3.bf16.msra.mxu0 %v2438_v33 }
  0x6f   : > { %941 = vmatmul.mubr.bf16.gmra.mrb[36].mxu1 %v473_v60  ;;  %812 = vmatmul.mubr.bf16.gmra.mrb[36].mxu0 %v487_v63 }
  0x70   : > { %948 = vmatprep.mubr.bf16.mxu1 %v478_v61  ;;  %819 = vmatprep.mubr.bf16.mxu0 %v492_v0 }
  0x77   : > { %949 = vmatmul.mubr.bf16.gmra.mrb[40].mxu1 %v477_v2  ;;  %820 = vmatmul.mubr.bf16.gmra.mrb[40].mxu0 %v491_v5 }
  0x78   : > { %956 = vmatprep.mubr.bf16.mxu1 %v482_v4  ;;  %827 = vmatprep.mubr.bf16.mxu0 %v496_v6 }
  0x7f   : > { %957 = vmatmul.mubr.bf16.gmra.mrb[44].mxu1 %v481_v8  ;;  %828 = vmatmul.mubr.bf16.gmra.mrb[44].mxu0 %v495_v10 }
  0x80   : > { %964 = vmatprep.mubr.bf16.mxu1 %v486_v9 }
  0x87   : > { %965 = vmatmul.mubr.bf16.gmra.mrb[48].mxu1 %v485_v12 }
  0x88   : > { %972 = vmatprep.mubr.bf16.mxu1 %v490_v13 }
  0x8f   : > { %973 = vmatmul.mubr.bf16.gmra.mrb[52].mxu1 %v489_v16 }
  0x90   : > { %980 = vmatprep.mubr.bf16.mxu1 %v494_v17 }
  0x96   : > { %v1163_v24 = vpop.permute.xlu0 %1162 }
  0x97   : > { %981 = vmatmul.mubr.bf16.gmra.mrb[56].mxu1 %v493_v20 }
  0x98   : > { %988 = vmatprep.mubr.bf16.mxu1 %v498_v21 }
  0x9f   : > { %989 = vmatmul.mubr.bf16.gmra.mrb[60].mxu1 %v497_v25 }
  0xa0   : > { %996 = vmatprep.mubr.bf16.mxu1 %v502_v26 }
  0xa7   : > { %997 = vmatmul.mubr.bf16.gmra.mrb[64].mxu1 %v501_v30 }
  0xa8   : > { %1004 = vmatprep.mubr.bf16.mxu1 %v506_v31 }
  0xaf   : > { %1005 = vmatmul.mubr.bf16.gmra.mrb[68].mxu1 %v505_v35  ;;  %v1168_v35 = vpop.permute.xlu0 %1167 }
  0xb0   : > { %1012 = vmatprep.mubr.bf16.mxu1 %v510_v36 }
  0xb7   : > { %1013 = vmatmul.mubr.bf16.gmra.mrb[72].mxu1 %v509_v38 }
  0xb8   : > { %1020 = vmatprep.mubr.bf16.mxu1 %v514_v39 }
  0xbf   : > { %1021 = vmatmul.mubr.bf16.gmra.mrb[76].mxu1 %v513_v40 }
  0xfa   : > { %v2148_v41 = vpop.f32.mrb[0].mxu1  ;;  %v2076_v46 = vpop.f32.mrb[0].mxu0 }
  0xfb   : > { %v2149_v42 = vpop.f32.mrb[1].mxu1  ;;  %v2077_v48 = vpop.f32.mrb[1].mxu0 }
  0xfc   : > { %v2713_v43 = vadd.f32 %v2149_v42, %v2148_v41  ;;  %v2151_v44 = vpop.f32.mrb[2].mxu1  ;;  %v2078_v49 = vadd.f32 %v2077_v48, %v2076_v46  ;;  %v2079_v50 = vpop.f32.mrb[2].mxu0 }
  0xfd   : > { %v2152_v45 = vpop.f32.mrb[3].mxu1  ;;  %v2080_v51 = vpop.f32.mrb[3].mxu0 }
  0xfe   : > { %v2715_v47 = vadd.f32 %v2152_v45, %v2151_v44  ;;  %v2081_v52 = vadd.f32 %v2080_v51, %v2079_v50  ;;  %v1173_v45 = vpop.permute.xlu1 %1172 }
 0x102   : > { %v2154_v53 = vpop.f32.mrb[4].mxu1  ;;  %v2082_v58 = vpop.f32.mrb[4].mxu0 }
 0x103   : > { %v2155_v54 = vpop.f32.mrb[5].mxu1  ;;  %v2083_v60 = vpop.f32.mrb[5].mxu0 }
 0x104   : > { %v2717_v55 = vadd.f32 %v2155_v54, %v2154_v53  ;;  %v2157_v56 = vpop.f32.mrb[6].mxu1  ;;  %v2084_v61 = vadd.f32 %v2083_v60, %v2082_v58  ;;  %v2085_v62 = vpop.f32.mrb[6].mxu0 }
 0x105   : > { %v2158_v57 = vpop.f32.mrb[7].mxu1  ;;  %v2086_v63 = vpop.f32.mrb[7].mxu0 }
 0x106   : > { %v2719_v59 = vadd.f32 %v2158_v57, %v2157_v56  ;;  %v2087_v0 = vadd.f32 %v2086_v63, %v2085_v62  ;;  %v1178_v63 = vpop.permute.xlu1 %1177 }
 0x10a   : > { %v2160_v1 = vpop.f32.mrb[8].mxu1  ;;  %v2088_v6 = vpop.f32.mrb[8].mxu0 }
 0x10b   : > { %v2161_v2 = vpop.f32.mrb[9].mxu1  ;;  %v2089_v8 = vpop.f32.mrb[9].mxu0 }
 0x10c   : > { %v2721_v3 = vadd.f32 %v2161_v2, %v2160_v1  ;;  %v2163_v4 = vpop.f32.mrb[10].mxu1  ;;  %v2090_v9 = vadd.f32 %v2089_v8, %v2088_v6  ;;  %v2091_v10 = vpop.f32.mrb[10].mxu0 }
 0x10d   : > { %v2164_v5 = vpop.f32.mrb[11].mxu1  ;;  %v2092_v11 = vpop.f32.mrb[11].mxu0 }
 0x10e   : > { %v2723_v7 = vadd.f32 %v2164_v5, %v2163_v4  ;;  %v2725_v12 = vadd.f32 %v2092_v11, %v2091_v10 }
 0x112   : > { %v2166_v13 = vpop.f32.mrb[12].mxu1  ;;  %v2094_v18 = vpop.f32.mrb[12].mxu0 }
 0x113   : > { %v2167_v14 = vpop.f32.mrb[13].mxu1  ;;  %v2095_v20 = vpop.f32.mrb[13].mxu0 }
 0x114   : > { %v2727_v15 = vadd.f32 %v2167_v14, %v2166_v13  ;;  %v2169_v16 = vpop.f32.mrb[14].mxu1  ;;  %v2731_v21 = vadd.f32 %v2095_v20, %v2094_v18  ;;  %v2097_v22 = vpop.f32.mrb[14].mxu0 }
 0x115   : > { %v2170_v17 = vpop.f32.mrb[15].mxu1  ;;  %v2098_v23 = vpop.f32.mrb[15].mxu0 }
 0x116   : > { %v2729_v19 = vadd.f32 %v2170_v17, %v2169_v16  ;;  %v2733_v25 = vadd.f32 %v2098_v23, %v2097_v22  ;;  %v1183_v23 = vpop.permute.xlu0 %1182 }
 0x11a   : > { %v2188_v26 = vpop.f32.mrb[16].mxu1  ;;  %v2100_v31 = vpop.f32.mrb[16].mxu0 }
 0x11b   : > { %v2189_v27 = vpop.f32.mrb[17].mxu1  ;;  %v2101_v34 = vpop.f32.mrb[17].mxu0 }
 0x11c   : > { %v2190_v28 = vadd.f32 %v2189_v27, %v2188_v26  ;;  %v2191_v29 = vpop.f32.mrb[18].mxu1  ;;  %v2735_v36 = vadd.f32 %v2101_v34, %v2100_v31  ;;  %v2103_v37 = vpop.f32.mrb[18].mxu0 }
 0x11d   : > { %v2192_v30 = vpop.f32.mrb[19].mxu1  ;;  %v2104_v39 = vpop.f32.mrb[19].mxu0 }
 0x11e   : > { %v903_v32 = vadd.f32 %v2190_v28, %v2078_v49  ;;  %v2193_v33 = vadd.f32 %v2192_v30, %v2191_v29  ;;  %v2737_v40 = vadd.f32 %v2104_v39, %v2103_v37 }
 0x120   : > { %v906_v38 = vadd.f32 %v2193_v33, %v2081_v52  ;;  %v1320_v41 = vmul.f32 %v1163_v24, %v903_v32  ;;  %v1188_v24 = vpop.permute.xlu1 %1187 }
 0x122   : > { %v1321_v42 = vmul.f32 %v1168_v35, %v906_v38  ;;  %v2194_v44 = vpop.f32.mrb[20].mxu1  ;;  %v2106_v49 = vpop.f32.mrb[20].mxu0 }
 0x123   : > { %v2195_v46 = vpop.f32.mrb[21].mxu1  ;;  %v2107_v57 = vpop.f32.mrb[21].mxu0 }
 0x124   : > { %v1352_v48 = vpack.c.bf16 %v1321_v42, %v1320_v41  ;;  %v2196_v50 = vadd.f32 %v2195_v46, %v2194_v44  ;;  %v2197_v51 = vpop.f32.mrb[22].mxu1  ;;  %v2739_v58 = vadd.f32 %v2107_v57, %v2106_v49  ;;  %v2109_v52 = vpop.f32.mrb[22].mxu0 }
 0x125   : > { %v2198_v53 = vpop.f32.mrb[23].mxu1  ;;  %v2110_v62 = vpop.f32.mrb[23].mxu0 }
 0x126   : > { %v911_v54 = vadd.f32 %v2196_v50, %v2084_v61  ;;  %v2199_v56 = vadd.f32 %v2198_v53, %v2197_v51  ;;  %2324 = vmatprep.mubr.bf16.mxu0 %v1352_v48  ;;  %v2741_v1 = vadd.f32 %v2110_v62, %v2109_v52  ;;  %v1193_v44 = vpop.permute.xlu0 %1192 }
 0x128   : > { %v914_v60 = vadd.f32 %v2199_v56, %v2087_v0  ;;  %v1322_v2 = vmul.f32 %v1173_v45, %v911_v54  ;;  %v1198_v45 = vpop.permute.xlu1 %1197 }
 0x12a   : > { %v1323_v4 = vmul.f32 %v1178_v63, %v914_v60  ;;  %v2200_v5 = vpop.f32.mrb[24].mxu1  ;;  %v2112_v61 = vpop.f32.mrb[24].mxu0 }
 0x12b   : > { %v2201_v6 = vpop.f32.mrb[25].mxu1  ;;  %v2113_v17 = vpop.f32.mrb[25].mxu0 }
 0x12c   : > { %v1353_v8 = vpack.c.bf16 %v1323_v4, %v1322_v2  ;;  %v2202_v10 = vadd.f32 %v2201_v6, %v2200_v5  ;;  %v2203_v11 = vpop.f32.mrb[26].mxu1  ;;  %v2743_v18 = vadd.f32 %v2113_v17, %v2112_v61  ;;  %v2115_v0 = vpop.f32.mrb[26].mxu0 }
 0x12d   : > { %v2204_v13 = vpop.f32.mrb[27].mxu1  ;;  %v2116_v22 = vpop.f32.mrb[27].mxu0 }
 0x12e   : > { %v919_v14 = vadd.f32 %v2202_v10, %v2090_v9  ;;  %v2205_v16 = vadd.f32 %v2204_v13, %v2203_v11  ;;  %2325 = vmatmul.mubr.bf16.vlgmr.msra.gmra.mrb[48].mxu0 %v1353_v8  ;;  %v2746_v26 = vadd.f32 %v2116_v22, %v2115_v0  ;;  %v1203_v5 = vpop.permute.xlu0 %1202  ;;  %v1208_v6 = vpop.permute.xlu1 %1207 }
 0x130   : > { %v922_v20 = vadd.f32 %v2205_v16, %v2725_v12  ;;  %v1324_v27 = vmul.f32 %v1183_v23, %v919_v14 }
 0x132   : > { %v1325_v28 = vmul.f32 %v1188_v24, %v922_v20  ;;  %v2206_v29 = vpop.f32.mrb[28].mxu1  ;;  %v2118_v34 = vpop.f32.mrb[28].mxu0 }
 0x133   : > { %v2207_v30 = vpop.f32.mrb[29].mxu1  ;;  %v2119_v38 = vpop.f32.mrb[29].mxu0 }
 0x134   : > { %v2208_v31 = vadd.f32 %v2207_v30, %v2206_v29  ;;  %v2209_v32 = vpop.f32.mrb[30].mxu1  ;;  %v1354_v9 = vpack.c.bf16 %v1325_v28, %v1324_v27  ;;  %v2749_v12 = vadd.f32 %v2119_v38, %v2118_v34  ;;  %v2121_v39 = vpop.f32.mrb[30].mxu0 }
 0x135   : > { %v2210_v33 = vpop.f32.mrb[31].mxu1  ;;  %v2122_v42 = vpop.f32.mrb[31].mxu0 }
 0x136   : > { %v927_v35 = vadd.f32 %v2208_v31, %v2731_v21  ;;  %v2211_v37 = vadd.f32 %v2210_v33, %v2209_v32  ;;  %2328 = vmatprep.mubr.bf16.mxu0 %v1354_v9  ;;  %v2752_v46 = vadd.f32 %v2122_v42, %v2121_v39  ;;  %v1213_v29 = vpop.permute.xlu0 %1212  ;;  %v1218_v30 = vpop.permute.xlu1 %1217 }
 0x138   : > { %v930_v41 = vadd.f32 %v2211_v37, %v2733_v25  ;;  %v1326_v48 = vmul.f32 %v1193_v44, %v927_v35 }
 0x13a   : > { %v1327_v50 = vmul.f32 %v1198_v45, %v930_v41  ;;  %v2212_v51 = vpop.f32.mrb[32].mxu1  ;;  %v2124_v57 = vpop.f32.mrb[32].mxu0 }
 0x13b   : > { %v2213_v53 = vpop.f32.mrb[33].mxu1  ;;  %v2125_v62 = vpop.f32.mrb[33].mxu0 }
 0x13c   : > { %v2214_v49 = vadd.f32 %v2213_v53, %v2212_v51  ;;  %v2215_v54 = vpop.f32.mrb[34].mxu1  ;;  %v1355_v21 = vpack.c.bf16 %v1327_v50, %v1326_v48  ;;  %v2755_v25 = vadd.f32 %v2125_v62, %v2124_v57  ;;  %v2127_v63 = vpop.f32.mrb[34].mxu0 }
 0x13d   : > { %v2216_v56 = vpop.f32.mrb[35].mxu1  ;;  %v2128_v4 = vpop.f32.mrb[35].mxu0 }
 0x13e   : > { %v935_v52 = vadd.f32 %v2214_v49, %v2735_v36  ;;  %v2217_v60 = vadd.f32 %v2216_v56, %v2215_v54  ;;  %2329 = vmatmul.mubr.bf16.gmra.mrb[52].mxu0 %v1355_v21  ;;  %v2758_v8 = vadd.f32 %v2128_v4, %v2127_v63  ;;  %v1223_v51 = vpop.permute.xlu0 %1222  ;;  %v1228_v53 = vpop.permute.xlu1 %1227 }
 0x140   : > { %v938_v2 = vadd.f32 %v2217_v60, %v2737_v40  ;;  %v1328_v10 = vmul.f32 %v1203_v5, %v935_v52 }
 0x142   : > { %v1329_v11 = vmul.f32 %v1208_v6, %v938_v2  ;;  %v2218_v13 = vpop.f32.mrb[36].mxu1  ;;  %v2130_v0 = vpop.f32.mrb[36].mxu0 }
 0x143   : > { %v2219_v61 = vpop.f32.mrb[37].mxu1  ;;  %v2131_v23 = vpop.f32.mrb[37].mxu0 }
 0x144   : > { %v2220_v14 = vadd.f32 %v2219_v61, %v2218_v13  ;;  %v2221_v16 = vpop.f32.mrb[38].mxu1  ;;  %v1356_v36 = vpack.c.bf16 %v1329_v11, %v1328_v10  ;;  %v2761_v40 = vadd.f32 %v2131_v23, %v2130_v0  ;;  %v2133_v24 = vpop.f32.mrb[38].mxu0 }
 0x145   : > { %v2222_v17 = vpop.f32.mrb[39].mxu1  ;;  %v2134_v28 = vpop.f32.mrb[39].mxu0 }
 0x146   : > { %v943_v20 = vadd.f32 %v2220_v14, %v2739_v58  ;;  %v2223_v22 = vadd.f32 %v2222_v17, %v2221_v16  ;;  %2332 = vmatprep.mubr.bf16.mxu0 %v1356_v36  ;;  %v2764_v31 = vadd.f32 %v2134_v28, %v2133_v24  ;;  %v1233_v13 = vpop.permute.xlu0 %1232  ;;  %v1238_v61 = vpop.permute.xlu1 %1237 }
 0x148   : > { %v946_v27 = vadd.f32 %v2223_v22, %v2741_v1  ;;  %v1330_v32 = vmul.f32 %v1213_v29, %v943_v20 }
 0x14a   : > { %v1331_v9 = vmul.f32 %v1218_v30, %v946_v27  ;;  %v2224_v33 = vpop.f32.mrb[40].mxu1  ;;  %v2136_v39 = vpop.f32.mrb[40].mxu0 }
 0x14b   : > { %v2225_v34 = vpop.f32.mrb[41].mxu1  ;;  %v2137_v44 = vpop.f32.mrb[41].mxu0 }
 0x14c   : > { %v2226_v35 = vadd.f32 %v2225_v34, %v2224_v33  ;;  %v2227_v37 = vpop.f32.mrb[42].mxu1  ;;  %v1357_v58 = vpack.c.bf16 %v1331_v9, %v1330_v32  ;;  %v2767_v1 = vadd.f32 %v2137_v44, %v2136_v39  ;;  %v2139_v45 = vpop.f32.mrb[42].mxu0 }
 0x14d   : > { %v2228_v38 = vpop.f32.mrb[43].mxu1  ;;  %v2140_v50 = vpop.f32.mrb[43].mxu0 }
 0x14e   : > { %v951_v41 = vadd.f32 %v2226_v35, %v2743_v18  ;;  %v2229_v42 = vadd.f32 %v2228_v38, %v2227_v37  ;;  %2333 = vmatmul.mubr.bf16.gmra.mrb[56].mxu0 %v1357_v58  ;;  %v2141_v49 = vadd.f32 %v2140_v50, %v2139_v45  ;;  %v1243_v29 = vpop.permute.xlu0 %1242 }
 0x150   : > { %v954_v48 = vadd.f32 %v2229_v42, %v2746_v26  ;;  %v1332_v54 = vmul.f32 %v1223_v51, %v951_v41 }
 0x152   : > { %v1333_v21 = vmul.f32 %v1228_v53, %v954_v48  ;;  %v2230_v56 = vpop.f32.mrb[44].mxu1  ;;  %v2142_v63 = vpop.f32.mrb[44].mxu0 }
 0x153   : > { %v2231_v57 = vpop.f32.mrb[45].mxu1  ;;  %v2143_v5 = vpop.f32.mrb[45].mxu0 }
 0x154   : > { %v2232_v52 = vadd.f32 %v2231_v57, %v2230_v56  ;;  %v2233_v60 = vpop.f32.mrb[46].mxu1  ;;  %v1358_v62 = vpack.c.bf16 %v1333_v21, %v1332_v54  ;;  %v2144_v6 = vadd.f32 %v2143_v5, %v2142_v63  ;;  %v2145_v26 = vpop.f32.mrb[46].mxu0 }
 0x155   : > { %v2234_v18 = vpop.f32.mrb[47].mxu1  ;;  %v2146_v11 = vpop.f32.mrb[47].mxu0 }
 0x156   : > { %v959_v2 = vadd.f32 %v2232_v52, %v2749_v12  ;;  %v2235_v4 = vadd.f32 %v2234_v18, %v2233_v60  ;;  %2336 = vmatprep.mubr.bf16.mxu0 %v1358_v62  ;;  %v2147_v14 = vadd.f32 %v2146_v11, %v2145_v26  ;;  %v1253_v41 = vpop.permute.xlu0 %1252 }
 0x158   : > { %v962_v10 = vadd.f32 %v2235_v4, %v2752_v46  ;;  %v1334_v16 = vmul.f32 %v1233_v13, %v959_v2  ;;  %v1248_v46 = vpop.permute.xlu1 %1247 }
 0x15a   : > { %v1335_v36 = vmul.f32 %v1238_v61, %v962_v10  ;;  %v2236_v17 = vpop.f32.mrb[48].mxu1 }
 0x15b   : > { %v2237_v0 = vpop.f32.mrb[49].mxu1 }
 0x15c   : > { %v2238_v20 = vadd.f32 %v2237_v0, %v2236_v17  ;;  %v2239_v22 = vpop.f32.mrb[50].mxu1  ;;  %v1359_v23 = vpack.c.bf16 %v1335_v36, %v1334_v16  ;;  %v1258_v42 = vpop.permute.xlu1 %1257 }
 0x15d   : > { %v2240_v24 = vpop.f32.mrb[51].mxu1 }
 0x15e   : > { %v967_v12 = vadd.f32 %v2238_v20, %v2755_v25  ;;  %v2241_v27 = vadd.f32 %v2240_v24, %v2239_v22  ;;  %2337 = vmatmul.mubr.bf16.gmra.mrb[60].mxu0 %v1359_v23 }
 0x160   : > { %v970_v28 = vadd.f32 %v2241_v27, %v2758_v8  ;;  %v1336_v30 = vmul.f32 %v1243_v29, %v967_v12  ;;  %v1268_v52 = vpop.permute.xlu1 %1267 }
 0x162   : > { %v1337_v32 = vmul.f32 %v1248_v46, %v970_v28  ;;  %v2242_v9 = vpop.f32.mrb[52].mxu1 }
 0x163   : > { %v2243_v33 = vpop.f32.mrb[53].mxu1 }
 0x164   : > { %v2244_v34 = vadd.f32 %v2243_v33, %v2242_v9  ;;  %v2245_v35 = vpop.f32.mrb[54].mxu1  ;;  %v1360_v37 = vpack.c.bf16 %v1337_v32, %v1336_v30  ;;  %v1278_v61 = vpop.permute.xlu1 %1277 }
 0x165   : > { %v2246_v58 = vpop.f32.mrb[55].mxu1 }
 0x166   : > { %v975_v38 = vadd.f32 %v2244_v34, %v2761_v40  ;;  %v2247_v39 = vadd.f32 %v2246_v58, %v2245_v35  ;;  %2340 = vmatprep.mubr.bf16.mxu0 %v1360_v37  ;;  %v1263_v40 = vpop.permute.xlu0 %1262 }
 0x168   : > { %v978_v25 = vadd.f32 %v2247_v39, %v2764_v31  ;;  %v1338_v44 = vmul.f32 %v1253_v41, %v975_v38  ;;  %v1288_v27 = vpop.permute.xlu1 %1287 }
 0x16a   : > { %v1339_v8 = vmul.f32 %v1258_v42, %v978_v25  ;;  %v2248_v45 = vpop.f32.mrb[56].mxu1  ;;  %v1273_v13 = vpop.permute.xlu0 %1272 }
 0x16b   : > { %v2249_v48 = vpop.f32.mrb[57].mxu1 }
 0x16c   : > { %v2250_v50 = vadd.f32 %v2249_v48, %v2248_v45  ;;  %v2251_v51 = vpop.f32.mrb[58].mxu1  ;;  %v1361_v53 = vpack.c.bf16 %v1339_v8, %v1338_v44  ;;  %v1298_v58 = vpop.permute.xlu1 %1297 }
 0x16d   : > { %v2252_v54 = vpop.f32.mrb[59].mxu1 }
 0x16e   : > { %v983_v21 = vadd.f32 %v2250_v50, %v2767_v1  ;;  %v2253_v56 = vadd.f32 %v2252_v54, %v2251_v51  ;;  %2341 = vmatmul.mubr.bf16.gmra.mrb[64].mxu0 %v1361_v53 }
 0x170   : > { %v986_v57 = vadd.f32 %v2253_v56, %v2141_v49  ;;  %v1340_v60 = vmul.f32 %v1263_v40, %v983_v21  ;;  %v1308_v51 = vpop.permute.xlu1 %1307 }
 0x172   : > { %v1341_v62 = vmul.f32 %v1268_v52, %v986_v57  ;;  %v2254_v31 = vpop.f32.mrb[60].mxu1 }
 0x173   : > { %v2255_v18 = vpop.f32.mrb[61].mxu1 }
 0x174   : > { %v2256_v63 = vadd.f32 %v2255_v18, %v2254_v31  ;;  %v2257_v2 = vpop.f32.mrb[62].mxu1  ;;  %v1362_v4 = vpack.c.bf16 %v1341_v62, %v1340_v60  ;;  %v1318_v18 = vpop.permute.xlu1 %1317 }
 0x175   : > { %v2258_v5 = vpop.f32.mrb[63].mxu1 }
 0x176   : > { %v991_v26 = vadd.f32 %v2256_v63, %v2144_v6  ;;  %v2259_v10 = vadd.f32 %v2258_v5, %v2257_v2  ;;  %2344 = vmatprep.mubr.bf16.mxu0 %v1362_v4  ;;  %v1283_v6 = vpop.permute.xlu0 %1282  ;;  %v2788_v5 = vld [vmem:[%s2857_s4] ss:$0 sm:$0xff] }
 0x178   : > { %v994_v11 = vadd.f32 %v2259_v10, %v2147_v14  ;;  %v1342_v1 = vmul.f32 %v1273_v13, %v991_v26 }
 0x17a   : > { %v1343_v16 = vmul.f32 %v1278_v61, %v994_v11  ;;  %v2260_v36 = vpop.f32.mrb[64].mxu1  ;;  %v1293_v37 = vpop.permute.xlu0 %1292 }
 0x17b   : > { %v2261_v49 = vpop.f32.mrb[65].mxu1 }
 0x17c   : > { %v2262_v17 = vadd.f32 %v2261_v49, %v2260_v36  ;;  %v2263_v0 = vpop.f32.mrb[66].mxu1  ;;  %v1363_v20 = vpack.c.bf16 %v1343_v16, %v1342_v1 }
 0x17d   : > { %v2264_v22 = vpop.f32.mrb[67].mxu1 }
 0x17e   : > { %v999_v23 = vadd.f32 %v2262_v17, %v2713_v43  ;;  %v2265_v24 = vadd.f32 %v2264_v22, %v2263_v0  ;;  %2345 = vmatmul.mubr.bf16.gmra.mrb[68].mxu0 %v1363_v20  ;;  %v1303_v50 = vpop.permute.xlu0 %1302 }
 0x180   : > { %v1002_v12 = vadd.f32 %v2265_v24, %v2715_v47  ;;  %v1344_v28 = vmul.f32 %v1283_v6, %v999_v23 }
 0x182   : > { %v1345_v14 = vmul.f32 %v1288_v27, %v1002_v12  ;;  %v2266_v29 = vpop.f32.mrb[68].mxu1  ;;  %v1313_v31 = vpop.permute.xlu0 %1312 }
 0x183   : > { %v2267_v46 = vpop.f32.mrb[69].mxu1 }
 0x184   : > { %v2268_v30 = vadd.f32 %v2267_v46, %v2266_v29  ;;  %v2269_v32 = vpop.f32.mrb[70].mxu1  ;;  %v1364_v9 = vpack.c.bf16 %v1345_v14, %v1344_v28 }
 0x185   : > { %v2270_v33 = vpop.f32.mrb[71].mxu1 }
 0x186   : > { %v1007_v34 = vadd.f32 %v2268_v30, %v2717_v55  ;;  %v2271_v35 = vadd.f32 %v2270_v33, %v2269_v32  ;;  %2348 = vmatprep.mubr.bf16.mxu0 %v1364_v9 }
 0x188   : > { %v1010_v43 = vadd.f32 %v2271_v35, %v2719_v59  ;;  %v1346_v38 = vmul.f32 %v1293_v37, %v1007_v34 }
 0x18a   : > { %v1347_v47 = vmul.f32 %v1298_v58, %v1010_v43  ;;  %v2272_v39 = vpop.f32.mrb[72].mxu1 }
 0x18b   : > { %v2273_v25 = vpop.f32.mrb[73].mxu1 }
 0x18c   : > { %v2274_v41 = vadd.f32 %v2273_v25, %v2272_v39  ;;  %v2275_v42 = vpop.f32.mrb[74].mxu1  ;;  %v1365_v44 = vpack.c.bf16 %v1347_v47, %v1346_v38 }
 0x18d   : > { %v2276_v8 = vpop.f32.mrb[75].mxu1 }
 0x18e   : > { %v1015_v45 = vadd.f32 %v2274_v41, %v2721_v3  ;;  %v2277_v48 = vadd.f32 %v2276_v8, %v2275_v42  ;;  %2349 = vmatmul.mubr.bf16.gmra.mrb[72].mxu0 %v1365_v44 }
 0x190   : > { %v1018_v55 = vadd.f32 %v2277_v48, %v2723_v7  ;;  %v1348_v53 = vmul.f32 %v1303_v50, %v1015_v45 }
 0x192   : > { %v1349_v59 = vmul.f32 %v1308_v51, %v1018_v55  ;;  %v2278_v54 = vpop.f32.mrb[76].mxu1 }
 0x193   : > { %v2279_v21 = vpop.f32.mrb[77].mxu1 }
 0x194   : > { %v2280_v56 = vadd.f32 %v2279_v21, %v2278_v54  ;;  %v2281_v57 = vpop.f32.mrb[78].mxu1  ;;  %v1366_v40 = vpack.c.bf16 %v1349_v59, %v1348_v53 }
 0x195   : > { %v2282_v52 = vpop.f32.mrb[79].mxu1 }
 0x196   : > { %v1023_v60 = vadd.f32 %v2280_v56, %v2727_v15  ;;  %v2283_v62 = vadd.f32 %v2282_v52, %v2281_v57  ;;  %2352 = vmatprep.mubr.bf16.mxu0 %v1366_v40 }
 0x198   : > { %v1026_v3 = vadd.f32 %v2283_v62, %v2729_v19  ;;  %v1350_v7 = vmul.f32 %v1313_v31, %v1023_v60 }
 0x19a   : > { %v1351_v63 = vmul.f32 %v1318_v18, %v1026_v3 }
 0x19c   : > { %v1367_v2 = vpack.c.bf16 %v1351_v63, %v1350_v7 }
 0x19e   : > { %2353 = vmatmul.mubr.bf16.gmra.mrb[76].mxu0 %v1367_v2 }
 0x201   : > { %v2326_v4 = vpop.f32.mrb[48].mxu0 }
 0x202   : > { %v1473_v26 = vpop.f32.mrb[49].mxu0  ;;  %v1482_v15 = vadd.f32 %v2326_v4, %v2788_v5 }
 0x203   : > { %v2327_v10 = vpop.f32.mrb[50].mxu0  ;;  %v1474_v13 = vadd.f32 %v2788_v5, %v1473_v26 }
 0x204   : > { %v1485_v11 = vadd.f32 %v2327_v10, %v2788_v5  ;;  %v1476_v19 = vpop.f32.mrb[51].mxu0 }
 0x205   : > { %v1477_v61 = vadd.f32 %v2788_v5, %v1476_v19 }
 0x206   : > { %v1973_v1 = vpack.c.bf16 %v1485_v11, %v1482_v15 }
 0x207   : > { %v1968_v16 = vpack.c.bf16 %v1477_v61, %v1474_v13 }
 0x208   : > { %2045 = vst [vmem:[%s2797_s6 + $0x8] sm:$0xff] %v1973_v1  }
 0x209   : > { %1969 = vst [vmem:[%s2797_s6] sm:$0xff] %v1968_v16  }
 0x211   : > { %v2330_v36 = vpop.f32.mrb[52].mxu0 }
 0x212   : > { %v1489_v49 = vpop.f32.mrb[53].mxu0  ;;  %v1498_v0 = vadd.f32 %v2330_v36, %v2788_v5 }
 0x213   : > { %v2331_v17 = vpop.f32.mrb[54].mxu0  ;;  %v1490_v23 = vadd.f32 %v2788_v5, %v1489_v49 }
 0x214   : > { %v1501_v20 = vadd.f32 %v2331_v17, %v2788_v5  ;;  %v1492_v22 = vpop.f32.mrb[55].mxu0 }
 0x215   : > { %v1493_v24 = vadd.f32 %v2788_v5, %v1492_v22 }
 0x216   : > { %v1983_v12 = vpack.c.bf16 %v1501_v20, %v1498_v0 }
 0x217   : > { %v1978_v6 = vpack.c.bf16 %v1493_v24, %v1490_v23 }
 0x218   : > { %2047 = vst [vmem:[%s2797_s6 + $0x18] sm:$0xff] %v1983_v12  }
 0x219   : > { %2046 = vst [vmem:[%s2797_s6 + $0x10] sm:$0xff] %v1978_v6  }
 0x221   : > { %v2334_v27 = vpop.f32.mrb[56].mxu0 }
 0x222   : > { %v1505_v28 = vpop.f32.mrb[57].mxu0  ;;  %v1514_v29 = vadd.f32 %v2334_v27, %v2788_v5 }
 0x223   : > { %v2335_v14 = vpop.f32.mrb[58].mxu0  ;;  %v1506_v32 = vadd.f32 %v2788_v5, %v1505_v28 }
 0x224   : > { %v1517_v46 = vadd.f32 %v2335_v14, %v2788_v5  ;;  %v1508_v30 = vpop.f32.mrb[59].mxu0 }
 0x225   : > { %v1509_v9 = vadd.f32 %v2788_v5, %v1508_v30 }
 0x226   : > { %v1993_v33 = vpack.c.bf16 %v1517_v46, %v1514_v29 }
 0x227   : > { %v1988_v34 = vpack.c.bf16 %v1509_v9, %v1506_v32 }
 0x228   : > { %2049 = vst [vmem:[%s2797_s6 + $0x28] sm:$0xff] %v1993_v33  }
 0x229   : > { %2048 = vst [vmem:[%s2797_s6 + $0x20] sm:$0xff] %v1988_v34  }
 0x231   : > { %v2338_v35 = vpop.f32.mrb[60].mxu0 }
 0x232   : > { %v1521_v43 = vpop.f32.mrb[61].mxu0  ;;  %v1530_v58 = vadd.f32 %v2338_v35, %v2788_v5 }
 0x233   : > { %v2339_v37 = vpop.f32.mrb[62].mxu0  ;;  %v1522_v39 = vadd.f32 %v2788_v5, %v1521_v43 }
 0x234   : > { %v1533_v38 = vadd.f32 %v2339_v37, %v2788_v5  ;;  %v1524_v47 = vpop.f32.mrb[63].mxu0 }
 0x235   : > { %v1525_v25 = vadd.f32 %v2788_v5, %v1524_v47 }
 0x236   : > { %v2003_v41 = vpack.c.bf16 %v1533_v38, %v1530_v58 }
 0x237   : > { %v1998_v42 = vpack.c.bf16 %v1525_v25, %v1522_v39 }
 0x238   : > { %2051 = vst [vmem:[%s2797_s6 + $0x38] sm:$0xff] %v2003_v41  }
 0x239   : > { %2050 = vst [vmem:[%s2797_s6 + $0x30] sm:$0xff] %v1998_v42  }
 0x241   : > { %v2342_v44 = vpop.f32.mrb[64].mxu0 }
 0x242   : > { %v1537_v8 = vpop.f32.mrb[65].mxu0  ;;  %v1546_v48 = vadd.f32 %v2342_v44, %v2788_v5 }
 0x243   : > { %v2343_v45 = vpop.f32.mrb[66].mxu0  ;;  %v1538_v51 = vadd.f32 %v2788_v5, %v1537_v8 }
 0x244   : > { %v1549_v55 = vadd.f32 %v2343_v45, %v2788_v5  ;;  %v1540_v50 = vpop.f32.mrb[67].mxu0 }
 0x245   : > { %v1541_v53 = vadd.f32 %v2788_v5, %v1540_v50 }
 0x246   : > { %v2013_v59 = vpack.c.bf16 %v1549_v55, %v1546_v48 }
 0x247   : > { %v2008_v54 = vpack.c.bf16 %v1541_v53, %v1538_v51 }
 0x248   : > { %2053 = vst [vmem:[%s2797_s6 + $0x48] sm:$0xff] %v2013_v59  }
 0x249   : > { %2052 = vst [vmem:[%s2797_s6 + $0x40] sm:$0xff] %v2008_v54  }
 0x251   : > { %v2346_v21 = vpop.f32.mrb[68].mxu0 }
 0x252   : > { %v1553_v56 = vpop.f32.mrb[69].mxu0  ;;  %v1562_v40 = vadd.f32 %v2346_v21, %v2788_v5 }
 0x253   : > { %v2347_v57 = vpop.f32.mrb[70].mxu0  ;;  %v1554_v62 = vadd.f32 %v2788_v5, %v1553_v56 }
 0x254   : > { %v1565_v52 = vadd.f32 %v2347_v57, %v2788_v5  ;;  %v1556_v60 = vpop.f32.mrb[71].mxu0 }
 0x255   : > { %v1557_v3 = vadd.f32 %v2788_v5, %v1556_v60 }
 0x256   : > { %v2023_v31 = vpack.c.bf16 %v1565_v52, %v1562_v40 }
 0x257   : > { %v2018_v18 = vpack.c.bf16 %v1557_v3, %v1554_v62 }
 0x258   : > { %2055 = vst [vmem:[%s2797_s6 + $0x58] sm:$0xff] %v2023_v31  }
 0x259   : > { %2054 = vst [vmem:[%s2797_s6 + $0x50] sm:$0xff] %v2018_v18  }
 0x261   : > { %v2350_v7 = vpop.f32.mrb[72].mxu0 }
 0x262   : > { %v1569_v63 = vpop.f32.mrb[73].mxu0  ;;  %v1578_v4 = vadd.f32 %v2350_v7, %v2788_v5 }
 0x263   : > { %v2351_v2 = vpop.f32.mrb[74].mxu0  ;;  %v1570_v15 = vadd.f32 %v2788_v5, %v1569_v63 }
 0x264   : > { %v1581_v26 = vadd.f32 %v2351_v2, %v2788_v5  ;;  %v1572_v10 = vpop.f32.mrb[75].mxu0 }
 0x265   : > { %v1573_v11 = vadd.f32 %v2788_v5, %v1572_v10 }
 0x266   : > { %v2033_v19 = vpack.c.bf16 %v1581_v26, %v1578_v4 }
 0x267   : > { %v2028_v13 = vpack.c.bf16 %v1573_v11, %v1570_v15 }
 0x268   : > { %2057 = vst [vmem:[%s2797_s6 + $0x68] sm:$0xff] %v2033_v19  }
 0x269   : > { %2056 = vst [vmem:[%s2797_s6 + $0x60] sm:$0xff] %v2028_v13  }
 0x271   : > { %v2354_v61 = vpop.f32.mrb[76].mxu0 }
 0x272   : > { %v1585_v1 = vpop.f32.mrb[77].mxu0  ;;  %v1594_v36 = vadd.f32 %v2354_v61, %v2788_v5 }
 0x273   : > { %v2355_v16 = vpop.f32.mrb[78].mxu0  ;;  %v1586_v0 = vadd.f32 %v2788_v5, %v1585_v1 }
 0x274   : > { %v1597_v49 = vadd.f32 %v2355_v16, %v2788_v5  ;;  %v1588_v17 = vpop.f32.mrb[79].mxu0 }
 0x275   : > { %v1589_v20 = vadd.f32 %v2788_v5, %v1588_v17 }
 0x276   : > { %v2043_v22 = vpack.c.bf16 %v1597_v49, %v1594_v36 }
 0x277   : > { %v2038_v23 = vpack.c.bf16 %v1589_v20, %v1586_v0 }
 0x278   : > { %2059 = vst [vmem:[%s2797_s6 + $0x78] sm:$0xff] %v2043_v22  }
 0x279   : > { %2058 = vst [vmem:[%s2797_s6 + $0x70] sm:$0xff] %v2038_v23  }
 0x27a PF: > { %s15_s20 = sadd.s32 1, %s2461_s20   ;;  %s2859_s18 = smov %s2457_s19 }
 0x27b   : > { %p12_p6 = scmp.ge.s32.totalorder %s15_s20, 4   ;;  %s2860_s19 = smov %s2862_s21 }
 0x27d   :  { %14 = sbr.rel (!%p12_p6) target bundleno = 2 (0x2), region = 82 }

// kernel: gcn_forward.7
= control target key start
LH: loop header
LB: loop body
LE: loop exit
PB: predicated region body
PF: predicated region fallthrough
CT: control target
= control target key end

     0   :  { %v682_v34 = vmov 0.0   ;;  %vm683_vm0 = vmmov 0   ;;  %s850_s1 = inlined_call_operand.vmem [shape: bf16[512,128], index: 1, kind: input, shape index: {}]   ;;  %s851_s0 = inlined_call_operand.vmem [shape: bf16[16,512], index: 0, kind: input, shape index: {}]   ;;  %s852_s2 = inlined_call_operand.vmem [shape: bf16[128,128], index: 2, kind: input, shape index: {}]   ;;  %s853_s3 = inlined_call_operand.vmem [shape: f32[1,128], index: 3, kind: input, shape index: {}]   ;;  %s854_s4 = inlined_call_operand.vmem [shape: f32[16,128], index: 4, kind: output, shape index: {}]  }
   0x1   :  { %v636_v0 = vld [vmem:[%s850_s1 + $0x40] sm:$0xff]   ;;  %v640_v4 = vld [vmem:[%s850_s1 + $0x48] sm:$0xff]   ;;  %v644_v8 = vld [vmem:[%s850_s1 + $0x50] sm:$0xff]  }
   0x2   :  { %v637_v1 = vld [vmem:[%s850_s1 + $0xc0] sm:$0xff]   ;;  %561 = vmatprep.subr.bf16.mxu0 %v636_v0  ;;  %v641_v5 = vld [vmem:[%s850_s1 + $0xc8] sm:$0xff]   ;;  %v645_v9 = vld [vmem:[%s850_s1 + $0xd0] sm:$0xff]  }
   0x3   :  { %v638_v2 = vld [vmem:[%s850_s1] sm:$0xff]   ;;  %583 = vmatprep.subr.bf16.mxu1 %v637_v1  ;;  %v642_v6 = vld [vmem:[%s850_s1 + $0x8] sm:$0xff]   ;;  %v646_v10 = vld [vmem:[%s850_s1 + $0x10] sm:$0xff]  }
   0x4   :  { %v639_v3 = vld [vmem:[%s850_s1 + $0x80] sm:$0xff]   ;;  %562 = vmatpush3.bf16.msra.mxu0 %v638_v2  ;;  %v643_v7 = vld [vmem:[%s850_s1 + $0x88] sm:$0xff]   ;;  %v647_v11 = vld [vmem:[%s850_s1 + $0x90] sm:$0xff]  }
   0x5   :  { %584 = vmatpush3.bf16.msra.mxu1 %v639_v3  ;;  %563 = vmatprep.subr.bf16.mxu0 %v640_v4  ;;  %v648_v12 = vld [vmem:[%s850_s1 + $0x58] sm:$0xff]   ;;  %v652_v16 = vld [vmem:[%s850_s1 + $0x60] sm:$0xff]   ;;  %v656_v20 = vld [vmem:[%s850_s1 + $0x68] sm:$0xff]  }
   0x6   :  { %585 = vmatprep.subr.bf16.mxu1 %v641_v5  ;;  %v649_v13 = vld [vmem:[%s850_s1 + $0xd8] sm:$0xff]   ;;  %v653_v17 = vld [vmem:[%s850_s1 + $0xe0] sm:$0xff]   ;;  %v657_v21 = vld [vmem:[%s850_s1 + $0xe8] sm:$0xff]  }
   0x7   :  { %v650_v14 = vld [vmem:[%s850_s1 + $0x18] sm:$0xff]   ;;  %v654_v18 = vld [vmem:[%s850_s1 + $0x20] sm:$0xff]   ;;  %v658_v22 = vld [vmem:[%s850_s1 + $0x28] sm:$0xff]  }
   0x8   :  { %564 = vmatpush3.bf16.msra.mxu0 %v642_v6  ;;  %v651_v15 = vld [vmem:[%s850_s1 + $0x98] sm:$0xff]   ;;  %v655_v19 = vld [vmem:[%s850_s1 + $0xa0] sm:$0xff]   ;;  %v659_v23 = vld [vmem:[%s850_s1 + $0xa8] sm:$0xff]  }
   0x9   :  { %586 = vmatpush3.bf16.msra.mxu1 %v643_v7  ;;  %565 = vmatprep.subr.bf16.mxu0 %v644_v8  ;;  %v660_v24 = vld [vmem:[%s850_s1 + $0x70] sm:$0xff]   ;;  %v664_v28 = vld [vmem:[%s850_s1 + $0x78] sm:$0xff]   ;;  %v674_v37 = vld [vmem:[%s852_s2] sm:$0xff]  }
   0xa   :  { %587 = vmatprep.subr.bf16.mxu1 %v645_v9  ;;  %v661_v25 = vld [vmem:[%s850_s1 + $0xf0] sm:$0xff]   ;;  %v665_v29 = vld [vmem:[%s850_s1 + $0xf8] sm:$0xff]   ;;  %v675_v38 = vld [vmem:[%s852_s2 + $0x8] sm:$0xff]  }
   0xb   :  { %v662_v26 = vld [vmem:[%s850_s1 + $0x30] sm:$0xff]   ;;  %v666_v30 = vld [vmem:[%s850_s1 + $0x38] sm:$0xff]   ;;  %v678_v41 = vld [vmem:[%s852_s2 + $0x20] sm:$0xff]  }
   0xc   :  { %566 = vmatpush3.bf16.msra.mxu0 %v646_v10  ;;  %v663_v27 = vld [vmem:[%s850_s1 + $0xb0] sm:$0xff]   ;;  %v667_v31 = vld [vmem:[%s850_s1 + $0xb8] sm:$0xff]   ;;  %v679_v42 = vld [vmem:[%s852_s2 + $0x28] sm:$0xff]  }
   0xd   :  { %588 = vmatpush3.bf16.msra.mxu1 %v647_v11  ;;  %567 = vmatprep.subr.bf16.mxu0 %v648_v12  ;;  %v668_v32 = vld [vmem:[%s851_s0] ss:$16 sps:$4 sm:$0xff]   ;;  %v670_v33 = vld [vmem:[%s851_s0 + $0x4] ss:$16 sps:$4 sm:$0xff]   ;;  %v671_v35 = vld [vmem:[%s851_s0 + $0x8] ss:$16 sps:$4 sm:$0xff]  }
   0xe   :  { %589 = vmatprep.subr.bf16.mxu1 %v649_v13  ;;  %v673_v36 = vld [vmem:[%s851_s0 + $0xc] ss:$16 sps:$4 sm:$0xff]   ;;  %338 = vmatprep.mubr.bf16.mxu0 %v670_v33  ;;  %v676_v39 = vld [vmem:[%s852_s2 + $0x10] sm:$0xff]   ;;  %v552_v60 = vld [vmem:[%s853_s3] ss:$0 sm:$0xff] }
   0xf   :  { %379 = vmatprep.mubr.bf16.mxu1 %v673_v36  ;;  %v677_v40 = vld [vmem:[%s852_s2 + $0x18] sm:$0xff]   ;;  %v680_v43 = vld [vmem:[%s852_s2 + $0x30] sm:$0xff]  }
  0x10   :  { %568 = vmatpush3.bf16.msra.mxu0 %v650_v14  ;;  %v681_v44 = vld [vmem:[%s852_s2 + $0x38] sm:$0xff]  }
  0x11   :  { %590 = vmatpush3.bf16.msra.mxu1 %v651_v15  ;;  %569 = vmatprep.subr.bf16.mxu0 %v652_v16 }
  0x12   :  { %591 = vmatprep.subr.bf16.mxu1 %v653_v17 }
  0x14   :  { %570 = vmatpush3.bf16.msra.mxu0 %v654_v18 }
  0x15   :  { %592 = vmatpush3.bf16.msra.mxu1 %v655_v19  ;;  %571 = vmatprep.subr.bf16.mxu0 %v656_v20 }
  0x16   :  { %593 = vmatprep.subr.bf16.mxu1 %v657_v21 }
  0x18   :  { %572 = vmatpush3.bf16.msra.mxu0 %v658_v22 }
  0x19   :  { %594 = vmatpush3.bf16.msra.mxu1 %v659_v23  ;;  %573 = vmatprep.subr.bf16.mxu0 %v660_v24 }
  0x1a   :  { %595 = vmatprep.subr.bf16.mxu1 %v661_v25 }
  0x1c   :  { %574 = vmatpush3.bf16.msra.mxu0 %v662_v26 }
  0x1d   :  { %596 = vmatpush3.bf16.msra.mxu1 %v663_v27  ;;  %575 = vmatprep.subr.bf16.mxu0 %v664_v28 }
  0x1e   :  { %597 = vmatprep.subr.bf16.mxu1 %v665_v29 }
  0x20   :  { %576 = vmatpush3.bf16.msra.mxu0 %v666_v30 }
  0x21   :  { %598 = vmatpush3.bf16.msra.mxu1 %v667_v31  ;;  %614 = vmatprep.subr.bf16.mxu0 %v682_v34 }
  0x23   :  { %339 = vmatmul.mubr.bf16.vlgmr.msra.gmra.mrb[0].mxu0 %v668_v32 }
  0x24   :  { %380 = vmatmul.mubr.bf16.vlgmr.msra.gmra.mrb[0].mxu1 %v671_v35  ;;  %615 = vmatpush3.bf16.msra.mxu0 %v674_v37 }
  0x25   :  { %616 = vmatprep.subr.bf16.mxu0 %v682_v34  ;;  %630 = vmatprep.mubr.msk.bf16.mxu0 %vm683_vm0, %v682_v34 }
  0x28   :  { %617 = vmatpush3.bf16.msra.mxu0 %v675_v38 }
  0x29   :  { %618 = vmatprep.subr.bf16.mxu0 %v682_v34 }
  0x2c   :  { %619 = vmatpush3.bf16.msra.mxu0 %v676_v39 }
  0x2d   :  { %620 = vmatprep.subr.bf16.mxu0 %v682_v34 }
  0x30   :  { %621 = vmatpush3.bf16.msra.mxu0 %v677_v40 }
  0x31   :  { %622 = vmatprep.subr.bf16.mxu0 %v682_v34 }
  0x34   :  { %623 = vmatpush3.bf16.msra.mxu0 %v678_v41 }
  0x35   :  { %624 = vmatprep.subr.bf16.mxu0 %v682_v34 }
  0x38   :  { %625 = vmatpush3.bf16.msra.mxu0 %v679_v42 }
  0x39   :  { %626 = vmatprep.subr.bf16.mxu0 %v682_v34 }
  0x3c   :  { %627 = vmatpush3.bf16.msra.mxu0 %v680_v43 }
  0x3d   :  { %628 = vmatprep.subr.bf16.mxu0 %v682_v34 }
  0x40   :  { %629 = vmatpush3.bf16.msra.mxu0 %v681_v44 }
  0xf6   :  { %v577_v45 = vpop.f32.mrb[0].mxu0 }
  0xf7   :  { %v599_v46 = vpop.f32.mrb[0].mxu1  ;;  %v578_v47 = vpop.f32.mrb[1].mxu0 }
  0xf8   :  { %v579_v48 = vadd.f32 %v578_v47, %v577_v45  ;;  %v600_v49 = vpop.f32.mrb[1].mxu1  ;;  %v580_v50 = vpop.f32.mrb[2].mxu0 }
  0xf9   :  { %v601_v51 = vadd.f32 %v600_v49, %v599_v46  ;;  %v602_v52 = vpop.f32.mrb[2].mxu1  ;;  %v581_v53 = vpop.f32.mrb[3].mxu0 }
  0xfa   :  { %v582_v54 = vadd.f32 %v581_v53, %v580_v50  ;;  %v603_v55 = vpop.f32.mrb[3].mxu1 }
  0xfb   :  { %v382_v56 = vadd.f32 %v601_v51, %v579_v48  ;;  %v604_v57 = vadd.f32 %v603_v55, %v602_v52 }
  0xfd   :  { %v385_v58 = vadd.f32 %v604_v57, %v582_v54 }
  0xff   :  { %v397_v59 = vpack.c.bf16 %v385_v58, %v382_v56 }
 0x101   :  { %631 = vmatmul.mubr.bf16.vlgmr.msra.gmra.mrb[4].mxu0 %v397_v59 }
 0x1d4   :  { %v503_v61 = vpop.f32.mrb[4].mxu0 }
 0x1d5   :  { %v504_v62 = vadd.f32 %v552_v60, %v503_v61  ;;  %v632_v63 = vpop.f32.mrb[5].mxu0 }
 0x1d6   :  { %v506_v0 = vpop.f32.mrb[6].mxu0 }
 0x1d7   :  { %510 = vst [vmem:[%s854_s4] sm:$0xff] %v504_v62  ;;  %v507_v1 = vadd.f32 %v552_v60, %v506_v0  ;;  %v633_v2 = vpop.f32.mrb[7].mxu0 }
 0x1d9   :  { %511 = vst [vmem:[%s854_s4 + $0x8] sm:$0xff] %v507_v1 }

</bundles_post_ra>
